<compile_context>
chip_gen: v5e
topology: v5e:2x2
jax: 0.10.0
libtpu: 0.0.40
codegen_flags: <defaults>
</compile_context>

<pallas_src>
from functools import partial

import jax
import jax.numpy as jnp
from jax.experimental import pallas as pl
from jax.experimental.pallas import tpu as pltpu

SQ_K = 3       # square_kernel_size
BAND_K = 11    # band_kernel_size
PAD_H = BAND_K // 2   # halo rows above/below (leading dim of scratch: offsets are free)
PAD_W = 8             # halo columns (sublane axis): 8 >= 5 keeps the center store aligned


def _make_taps():
    """Union of the tap offsets of the three depthwise branches (25 taps)."""
    taps = []
    r = SQ_K // 2
    for dh in range(-r, r + 1):          # 3x3 square branch: 9 taps
        for dw in range(-r, r + 1):
            taps.append((dh, dw))
    rb = BAND_K // 2
    for dw in range(-rb, rb + 1):        # 1x11 band-W branch: 8 extra taps
        if abs(dw) > r:
            taps.append((0, dw))
    for dh in range(-rb, rb + 1):        # 11x1 band-H branch: 8 extra taps
        if abs(dh) > r:
            taps.append((dh, 0))
    return tuple(taps)


TAPS = _make_taps()   # 25 fused taps


def _build_fused_weights(params):
    """Fused (n_taps, 1, 3*gc) weight table + (1, 1, 3*gc) bias, f32.

    Channel layout on lanes: [0:gc) square 3x3, [gc:2gc) band 1x11,
    [2gc:3gc) band 11x1.  A tap's weight is zero for channels whose branch
    does not contain that tap.
    """
    gc = params["w_hw"].shape[0]
    sq = params["w_hw"].reshape(gc, SQ_K, SQ_K).astype(jnp.float32)
    bw = params["w_w"].reshape(gc, BAND_K).astype(jnp.float32)
    bh = params["w_h"].reshape(gc, BAND_K).astype(jnp.float32)
    zeros = jnp.zeros((gc,), jnp.float32)
    r = SQ_K // 2
    rb = BAND_K // 2

    rows = []
    for (dh, dw) in TAPS:
        w_sq = sq[:, dh + r, dw + r] if (abs(dh) <= r and abs(dw) <= r) else zeros
        w_bw = bw[:, dw + rb] if dh == 0 else zeros
        w_bh = bh[:, dh + rb] if dw == 0 else zeros
        rows.append(jnp.concatenate([w_sq, w_bw, w_bh]))
    wt = jnp.stack(rows)[:, None, :]                                   # (25, 1, 3gc)
    bias = jnp.concatenate(
        [params["b_hw"], params["b_w"], params["b_h"]]
    ).astype(jnp.float32)[None, None, :]                               # (1, 1, 3gc)
    return wt, bias


def _fused_dw_kernel(x_ref, w_ref, b_ref, o_ref, xpad_ref, *, H, W, Cf, taps):
    """One batch image: (H, W, Cf) channels-last block, Cf = 3*gc on lanes."""
    # Build the halo'd input in VMEM (no HBM padding copies).  The border is
    # re-zeroed every step so correctness does not depend on grid scheduling
    # (megacore-safe); the center block is overwritten each step.
    xpad_ref[...] = jnp.zeros(xpad_ref.shape, xpad_ref.dtype)
    xpad_ref[PAD_H:PAD_H + H, PAD_W:PAD_W + W, :] = x_ref[...].astype(jnp.float32)

    # 25 fused taps: each is a row/sublane-shifted slice times a lane-aligned
    # (1, Cf) weight vector -> pure VALU multiply-accumulate, no lane work.
    acc = jnp.zeros((H, W, Cf), jnp.float32)
    for t, (dh, dw) in enumerate(taps):
        sl = xpad_ref[PAD_H + dh:PAD_H + dh + H, PAD_W + dw:PAD_W + dw + W, :]
        acc = acc + sl * w_ref[t]                       # w_ref[t]: (1, Cf)

    o_ref[...] = (acc + b_ref[0]).astype(o_ref.dtype)   # b_ref[0]: (1, Cf)


def inception_dwconv2d(x, params):
    """x: (B, C, H, W). Returns (B, C, H, W) in x.dtype."""
    B, C, H, W = x.shape
    gc = params["w_hw"].shape[0]
    Cf = 3 * gc
    id_ch = C - Cf

    x_id = x[:, :id_ch]
    # Channels-last, branch-fused slab: (B, H, W, 3*gc) — fused channels on lanes.
    xt = jnp.transpose(x[:, id_ch:], (0, 2, 3, 1))

    wt, bias = _build_fused_weights(params)
    n_taps = len(TAPS)

    yt = pl.pallas_call(
        partial(_fused_dw_kernel, H=H, W=W, Cf=Cf, taps=TAPS),
        grid=(B,),
        in_specs=[
            # whole (H, W, 3gc) plane per step (~0.5-2 MiB at real shapes)
            pl.BlockSpec((None, H, W, Cf), lambda b: (b, 0, 0, 0)),
            # lane-aligned weight table / bias, resident in VMEM across steps
            pl.BlockSpec((n_taps, 1, Cf), lambda b: (0, 0, 0)),
            pl.BlockSpec((1, 1, Cf), lambda b: (0, 0, 0)),
        ],
        out_specs=pl.BlockSpec((None, H, W, Cf), lambda b: (b, 0, 0, 0)),
        out_shape=jax.ShapeDtypeStruct((B, H, W, Cf), x.dtype),
        scratch_shapes=[
            pltpu.VMEM((H + 2 * PAD_H, W + 2 * PAD_W, Cf), jnp.float32),
        ],
        compiler_params=pltpu.CompilerParams(
            dimension_semantics=("parallel",),          # batch over both TCs
            vmem_limit_bytes=48 * 1024 * 1024,          # explicit; < v7x 64 MiB
        ),
    )(xt, wt, bias)

    y = jnp.transpose(yt, (0, 3, 1, 2))                 # back to NCHW
    return jnp.concatenate([x_id, y], axis=1)


# ---------------------------- reference (plain JAX) -------------------------
def _dwconv_ref(x, w, b, pad):
    out = jax.lax.conv_general_dilated(
        x, w, window_strides=(1, 1), padding=pad,
        dimension_numbers=("NCHW", "OIHW", "NCHW"),
        feature_group_count=x.shape[1])
    return out + b[None, :, None, None]


def inception_dwconv2d_ref(x, params):
    B, C, H, W = x.shape
    gc = params["w_hw"].shape[0]
    id_ch = C - 3 * gc
    x_id = x[:, :id_ch]
    x_hw = x[:, id_ch:id_ch + gc]
    x_w = x[:, id_ch + gc:id_ch + 2 * gc]
    x_h = x[:, id_ch + 2 * gc:]
    o_hw = _dwconv_ref(x_hw, params["w_hw"], params["b_hw"], [(1, 1), (1, 1)])
    o_w = _dwconv_ref(x_w, params["w_w"], params["b_w"], [(0, 0), (5, 5)])
    o_h = _dwconv_ref(x_h, params["w_h"], params["b_h"], [(5, 5), (0, 0)])
    return jnp.concatenate([x_id, o_hw, o_w, o_h], axis=1)


if __name__ == "__main__":
    B, C, H, W = 2, 32, 16, 16
    branch_ratio = 0.125
    gc = int(C * branch_ratio)  # = 4

    key = jax.random.PRNGKey(0)
    k1, k2, k3, k4, k5, k6, kx = jax.random.split(key, 7)

    # PyTorch depthwise weight shapes: (gc, 1, kh, kw); biases: (gc,).
    params = {
        "w_hw": jax.random.normal(k1, (gc, 1, SQ_K, SQ_K), jnp.float32) * 0.2,
        "b_hw": jax.random.normal(k2, (gc,), jnp.float32) * 0.1,
        "w_w": jax.random.normal(k3, (gc, 1, 1, BAND_K), jnp.float32) * 0.2,
        "b_w": jax.random.normal(k4, (gc,), jnp.float32) * 0.1,
        "w_h": jax.random.normal(k5, (gc, 1, BAND_K, 1), jnp.float32) * 0.2,
        "b_h": jax.random.normal(k6, (gc,), jnp.float32) * 0.1,
    }

    x = jax.random.normal(kx, (B, C, H, W), jnp.float32)

    out = jax.jit(lambda v: inception_dwconv2d(v, params))(x)
    out = jax.block_until_ready(out)

    ref = inception_dwconv2d_ref(x, params)

    assert out.shape == (B, C, H, W), out.shape
    assert out.dtype == x.dtype, out.dtype
    assert jnp.allclose(out, ref, atol=1e-4, rtol=1e-4), (
        float(jnp.max(jnp.abs(out - ref))))

    print("KERNEL_OK")
</pallas_src>

<mosaic_0001>
module attributes {stable_mosaic.version = 11 : i64} {
  func.func @_fused_dw_kernel(%arg0: i32, %arg1: memref<1x16x16x12xf32, #tpu.memory_space<vmem>>, %arg2: memref<25x1x12xf32, #tpu.memory_space<vmem>>, %arg3: memref<1x1x12xf32, #tpu.memory_space<vmem>>, %arg4: memref<1x16x16x12xf32, #tpu.memory_space<vmem>>, %arg5: memref<26x32x12xf32, #tpu.memory_space<vmem>>) attributes {dimension_semantics = [#tpu.dimension_semantics<parallel>], iteration_bounds = array<i64: 2>, scalar_prefetch = 0 : i64, scratch_operands = 1 : i64, tpu.core_type = #tpu.core_type<tc>, window_params = [{transform_indices = @transform_0, window_bounds = array<i64: 1, 16, 16, 12>}, {pipeline_mode = #tpu.pipeline_mode<synchronous>, transform_indices = @transform_1, window_bounds = array<i64: 25, 1, 12>}, {pipeline_mode = #tpu.pipeline_mode<synchronous>, transform_indices = @transform_2, window_bounds = array<i64: 1, 1, 12>}, {transform_indices = @transform_3, window_bounds = array<i64: 1, 16, 16, 12>}]} {
    %cst = arith.constant 0.000000e+00 : f32
    %0 = vector.broadcast %cst : f32 to vector<26x32x12xf32>
    %c0 = arith.constant 0 : index
    %c0_0 = arith.constant 0 : index
    %c0_1 = arith.constant 0 : index
    %1 = vector.load %arg5[%c0, %c0_0, %c0_1] : memref<26x32x12xf32, #tpu.memory_space<vmem>>, vector<26x32x12xf32>
    tpu.vector_store %arg5[%c0, %c0_0, %c0_1], %0 {strides = array<i32>} : memref<26x32x12xf32, #tpu.memory_space<vmem>>, vector<26x32x12xf32>,
    %c0_2 = arith.constant 0 : index
    %c0_3 = arith.constant 0 : index
    %c0_4 = arith.constant 0 : index
    %c0_5 = arith.constant 0 : index
    %2 = vector.load %arg1[%c0_2, %c0_3, %c0_4, %c0_5] : memref<1x16x16x12xf32, #tpu.memory_space<vmem>>, vector<1x16x16x12xf32>
    %3 = vector.shape_cast %2 : vector<1x16x16x12xf32> to vector<16x16x12xf32>
    %c5 = arith.constant 5 : index
    %c8 = arith.constant 8 : index
    %c0_6 = arith.constant 0 : index
    %4 = vector.load %arg5[%c5, %c8, %c0_6] : memref<26x32x12xf32, #tpu.memory_space<vmem>>, vector<16x16x12xf32>
    tpu.vector_store %arg5[%c5, %c8, %c0_6], %3 {strides = array<i32>} : memref<26x32x12xf32, #tpu.memory_space<vmem>>, vector<16x16x12xf32>,
    %cst_7 = arith.constant 0.000000e+00 : f32
    %5 = vector.broadcast %cst_7 : f32 to vector<16x16x12xf32>
    %c4 = arith.constant 4 : index
    %c7 = arith.constant 7 : index
    %c0_8 = arith.constant 0 : index
    %6 = vector.load %arg5[%c4, %c7, %c0_8] : memref<26x32x12xf32, #tpu.memory_space<vmem>>, vector<16x16x12xf32>
    %c0_9 = arith.constant 0 : index
    %c0_10 = arith.constant 0 : index
    %c0_11 = arith.constant 0 : index
    %7 = vector.load %arg2[%c0_9, %c0_10, %c0_11] : memref<25x1x12xf32, #tpu.memory_space<vmem>>, vector<1x1x12xf32>
    %8 = vector.shape_cast %7 : vector<1x1x12xf32> to vector<1x12xf32>
    %9 = vector.shape_cast %8 : vector<1x12xf32> to vector<1x1x12xf32>
    %10 = vector.broadcast %9 : vector<1x1x12xf32> to vector<16x16x12xf32>
    %11 = arith.mulf %6, %10 : vector<16x16x12xf32>
    %12 = arith.addf %5, %11 : vector<16x16x12xf32>
    %c4_12 = arith.constant 4 : index
    %c8_13 = arith.constant 8 : index
    %c0_14 = arith.constant 0 : index
    %13 = vector.load %arg5[%c4_12, %c8_13, %c0_14] : memref<26x32x12xf32, #tpu.memory_space<vmem>>, vector<16x16x12xf32>
    %c1 = arith.constant 1 : index
    %c0_15 = arith.constant 0 : index
    %c0_16 = arith.constant 0 : index
    %14 = vector.load %arg2[%c1, %c0_15, %c0_16] : memref<25x1x12xf32, #tpu.memory_space<vmem>>, vector<1x1x12xf32>
    %15 = vector.shape_cast %14 : vector<1x1x12xf32> to vector<1x12xf32>
    %16 = vector.shape_cast %15 : vector<1x12xf32> to vector<1x1x12xf32>
    %17 = vector.broadcast %16 : vector<1x1x12xf32> to vector<16x16x12xf32>
    %18 = arith.mulf %13, %17 : vector<16x16x12xf32>
    %19 = arith.addf %12, %18 : vector<16x16x12xf32>
    %c4_17 = arith.constant 4 : index
    %c9 = arith.constant 9 : index
    %c0_18 = arith.constant 0 : index
    %20 = vector.load %arg5[%c4_17, %c9, %c0_18] : memref<26x32x12xf32, #tpu.memory_space<vmem>>, vector<16x16x12xf32>
    %c2 = arith.constant 2 : index
    %c0_19 = arith.constant 0 : index
    %c0_20 = arith.constant 0 : index
    %21 = vector.load %arg2[%c2, %c0_19, %c0_20] : memref<25x1x12xf32, #tpu.memory_space<vmem>>, vector<1x1x12xf32>
    %22 = vector.shape_cast %21 : vector<1x1x12xf32> to vector<1x12xf32>
    %23 = vector.shape_cast %22 : vector<1x12xf32> to vector<1x1x12xf32>
    %24 = vector.broadcast %23 : vector<1x1x12xf32> to vector<16x16x12xf32>
    %25 = arith.mulf %20, %24 : vector<16x16x12xf32>
    %26 = arith.addf %19, %25 : vector<16x16x12xf32>
    %c5_21 = arith.constant 5 : index
    %c7_22 = arith.constant 7 : index
    %c0_23 = arith.constant 0 : index
    %27 = vector.load %arg5[%c5_21, %c7_22, %c0_23] : memref<26x32x12xf32, #tpu.memory_space<vmem>>, vector<16x16x12xf32>
    %c3 = arith.constant 3 : index
    %c0_24 = arith.constant 0 : index
    %c0_25 = arith.constant 0 : index
    %28 = vector.load %arg2[%c3, %c0_24, %c0_25] : memref<25x1x12xf32, #tpu.memory_space<vmem>>, vector<1x1x12xf32>
    %29 = vector.shape_cast %28 : vector<1x1x12xf32> to vector<1x12xf32>
    %30 = vector.shape_cast %29 : vector<1x12xf32> to vector<1x1x12xf32>
    %31 = vector.broadcast %30 : vector<1x1x12xf32> to vector<16x16x12xf32>
    %32 = arith.mulf %27, %31 : vector<16x16x12xf32>
    %33 = arith.addf %26, %32 : vector<16x16x12xf32>
    %c5_26 = arith.constant 5 : index
    %c8_27 = arith.constant 8 : index
    %c0_28 = arith.constant 0 : index
    %34 = vector.load %arg5[%c5_26, %c8_27, %c0_28] : memref<26x32x12xf32, #tpu.memory_space<vmem>>, vector<16x16x12xf32>
    %c4_29 = arith.constant 4 : index
    %c0_30 = arith.constant 0 : index
    %c0_31 = arith.constant 0 : index
    %35 = vector.load %arg2[%c4_29, %c0_30, %c0_31] : memref<25x1x12xf32, #tpu.memory_space<vmem>>, vector<1x1x12xf32>
    %36 = vector.shape_cast %35 : vector<1x1x12xf32> to vector<1x12xf32>
    %37 = vector.shape_cast %36 : vector<1x12xf32> to vector<1x1x12xf32>
    %38 = vector.broadcast %37 : vector<1x1x12xf32> to vector<16x16x12xf32>
    %39 = arith.mulf %34, %38 : vector<16x16x12xf32>
    %40 = arith.addf %33, %39 : vector<16x16x12xf32>
    %c5_32 = arith.constant 5 : index
    %c9_33 = arith.constant 9 : index
    %c0_34 = arith.constant 0 : index
    %41 = vector.load %arg5[%c5_32, %c9_33, %c0_34] : memref<26x32x12xf32, #tpu.memory_space<vmem>>, vector<16x16x12xf32>
    %c5_35 = arith.constant 5 : index
    %c0_36 = arith.constant 0 : index
    %c0_37 = arith.constant 0 : index
    %42 = vector.load %arg2[%c5_35, %c0_36, %c0_37] : memref<25x1x12xf32, #tpu.memory_space<vmem>>, vector<1x1x12xf32>
    %43 = vector.shape_cast %42 : vector<1x1x12xf32> to vector<1x12xf32>
    %44 = vector.shape_cast %43 : vector<1x12xf32> to vector<1x1x12xf32>
    %45 = vector.broadcast %44 : vector<1x1x12xf32> to vector<16x16x12xf32>
    %46 = arith.mulf %41, %45 : vector<16x16x12xf32>
    %47 = arith.addf %40, %46 : vector<16x16x12xf32>
    %c6 = arith.constant 6 : index
    %c7_38 = arith.constant 7 : index
    %c0_39 = arith.constant 0 : index
    %48 = vector.load %arg5[%c6, %c7_38, %c0_39] : memref<26x32x12xf32, #tpu.memory_space<vmem>>, vector<16x16x12xf32>
    %c6_40 = arith.constant 6 : index
    %c0_41 = arith.constant 0 : index
    %c0_42 = arith.constant 0 : index
    %49 = vector.load %arg2[%c6_40, %c0_41, %c0_42] : memref<25x1x12xf32, #tpu.memory_space<vmem>>, vector<1x1x12xf32>
    %50 = vector.shape_cast %49 : vector<1x1x12xf32> to vector<1x12xf32>
    %51 = vector.shape_cast %50 : vector<1x12xf32> to vector<1x1x12xf32>
    %52 = vector.broadcast %51 : vector<1x1x12xf32> to vector<16x16x12xf32>
    %53 = arith.mulf %48, %52 : vector<16x16x12xf32>
    %54 = arith.addf %47, %53 : vector<16x16x12xf32>
    %c6_43 = arith.constant 6 : index
    %c8_44 = arith.constant 8 : index
    %c0_45 = arith.constant 0 : index
    %55 = vector.load %arg5[%c6_43, %c8_44, %c0_45] : memref<26x32x12xf32, #tpu.memory_space<vmem>>, vector<16x16x12xf32>
    %c7_46 = arith.constant 7 : index
    %c0_47 = arith.constant 0 : index
    %c0_48 = arith.constant 0 : index
    %56 = vector.load %arg2[%c7_46, %c0_47, %c0_48] : memref<25x1x12xf32, #tpu.memory_space<vmem>>, vector<1x1x12xf32>
    %57 = vector.shape_cast %56 : vector<1x1x12xf32> to vector<1x12xf32>
    %58 = vector.shape_cast %57 : vector<1x12xf32> to vector<1x1x12xf32>
    %59 = vector.broadcast %58 : vector<1x1x12xf32> to vector<16x16x12xf32>
    %60 = arith.mulf %55, %59 : vector<16x16x12xf32>
    %61 = arith.addf %54, %60 : vector<16x16x12xf32>
    %c6_49 = arith.constant 6 : index
    %c9_50 = arith.constant 9 : index
    %c0_51 = arith.constant 0 : index
    %62 = vector.load %arg5[%c6_49, %c9_50, %c0_51] : memref<26x32x12xf32, #tpu.memory_space<vmem>>, vector<16x16x12xf32>
    %c8_52 = arith.constant 8 : index
    %c0_53 = arith.constant 0 : index
    %c0_54 = arith.constant 0 : index
    %63 = vector.load %arg2[%c8_52, %c0_53, %c0_54] : memref<25x1x12xf32, #tpu.memory_space<vmem>>, vector<1x1x12xf32>
    %64 = vector.shape_cast %63 : vector<1x1x12xf32> to vector<1x12xf32>
    %65 = vector.shape_cast %64 : vector<1x12xf32> to vector<1x1x12xf32>
    %66 = vector.broadcast %65 : vector<1x1x12xf32> to vector<16x16x12xf32>
    %67 = arith.mulf %62, %66 : vector<16x16x12xf32>
    %68 = arith.addf %61, %67 : vector<16x16x12xf32>
    %c5_55 = arith.constant 5 : index
    %c3_56 = arith.constant 3 : index
    %c0_57 = arith.constant 0 : index
    %69 = vector.load %arg5[%c5_55, %c3_56, %c0_57] : memref<26x32x12xf32, #tpu.memory_space<vmem>>, vector<16x16x12xf32>
    %c9_58 = arith.constant 9 : index
    %c0_59 = arith.constant 0 : index
    %c0_60 = arith.constant 0 : index
    %70 = vector.load %arg2[%c9_58, %c0_59, %c0_60] : memref<25x1x12xf32, #tpu.memory_space<vmem>>, vector<1x1x12xf32>
    %71 = vector.shape_cast %70 : vector<1x1x12xf32> to vector<1x12xf32>
    %72 = vector.shape_cast %71 : vector<1x12xf32> to vector<1x1x12xf32>
    %73 = vector.broadcast %72 : vector<1x1x12xf32> to vector<16x16x12xf32>
    %74 = arith.mulf %69, %73 : vector<16x16x12xf32>
    %75 = arith.addf %68, %74 : vector<16x16x12xf32>
    %c5_61 = arith.constant 5 : index
    %c4_62 = arith.constant 4 : index
    %c0_63 = arith.constant 0 : index
    %76 = vector.load %arg5[%c5_61, %c4_62, %c0_63] : memref<26x32x12xf32, #tpu.memory_space<vmem>>, vector<16x16x12xf32>
    %c10 = arith.constant 10 : index
    %c0_64 = arith.constant 0 : index
    %c0_65 = arith.constant 0 : index
    %77 = vector.load %arg2[%c10, %c0_64, %c0_65] : memref<25x1x12xf32, #tpu.memory_space<vmem>>, vector<1x1x12xf32>
    %78 = vector.shape_cast %77 : vector<1x1x12xf32> to vector<1x12xf32>
    %79 = vector.shape_cast %78 : vector<1x12xf32> to vector<1x1x12xf32>
    %80 = vector.broadcast %79 : vector<1x1x12xf32> to vector<16x16x12xf32>
    %81 = arith.mulf %76, %80 : vector<16x16x12xf32>
    %82 = arith.addf %75, %81 : vector<16x16x12xf32>
    %c5_66 = arith.constant 5 : index
    %c5_67 = arith.constant 5 : index
    %c0_68 = arith.constant 0 : index
    %83 = vector.load %arg5[%c5_66, %c5_67, %c0_68] : memref<26x32x12xf32, #tpu.memory_space<vmem>>, vector<16x16x12xf32>
    %c11 = arith.constant 11 : index
    %c0_69 = arith.constant 0 : index
    %c0_70 = arith.constant 0 : index
    %84 = vector.load %arg2[%c11, %c0_69, %c0_70] : memref<25x1x12xf32, #tpu.memory_space<vmem>>, vector<1x1x12xf32>
    %85 = vector.shape_cast %84 : vector<1x1x12xf32> to vector<1x12xf32>
    %86 = vector.shape_cast %85 : vector<1x12xf32> to vector<1x1x12xf32>
    %87 = vector.broadcast %86 : vector<1x1x12xf32> to vector<16x16x12xf32>
    %88 = arith.mulf %83, %87 : vector<16x16x12xf32>
    %89 = arith.addf %82, %88 : vector<16x16x12xf32>
    %c5_71 = arith.constant 5 : index
    %c6_72 = arith.constant 6 : index
    %c0_73 = arith.constant 0 : index
    %90 = vector.load %arg5[%c5_71, %c6_72, %c0_73] : memref<26x32x12xf32, #tpu.memory_space<vmem>>, vector<16x16x12xf32>
    %c12 = arith.constant 12 : index
    %c0_74 = arith.constant 0 : index
    %c0_75 = arith.constant 0 : index
    %91 = vector.load %arg2[%c12, %c0_74, %c0_75] : memref<25x1x12xf32, #tpu.memory_space<vmem>>, vector<1x1x12xf32>
    %92 = vector.shape_cast %91 : vector<1x1x12xf32> to vector<1x12xf32>
    %93 = vector.shape_cast %92 : vector<1x12xf32> to vector<1x1x12xf32>
    %94 = vector.broadcast %93 : vector<1x1x12xf32> to vector<16x16x12xf32>
    %95 = arith.mulf %90, %94 : vector<16x16x12xf32>
    %96 = arith.addf %89, %95 : vector<16x16x12xf32>
    %c5_76 = arith.constant 5 : index
    %c10_77 = arith.constant 10 : index
    %c0_78 = arith.constant 0 : index
    %97 = vector.load %arg5[%c5_76, %c10_77, %c0_78] : memref<26x32x12xf32, #tpu.memory_space<vmem>>, vector<16x16x12xf32>
    %c13 = arith.constant 13 : index
    %c0_79 = arith.constant 0 : index
    %c0_80 = arith.constant 0 : index
    %98 = vector.load %arg2[%c13, %c0_79, %c0_80] : memref<25x1x12xf32, #tpu.memory_space<vmem>>, vector<1x1x12xf32>
    %99 = vector.shape_cast %98 : vector<1x1x12xf32> to vector<1x12xf32>
    %100 = vector.shape_cast %99 : vector<1x12xf32> to vector<1x1x12xf32>
    %101 = vector.broadcast %100 : vector<1x1x12xf32> to vector<16x16x12xf32>
    %102 = arith.mulf %97, %101 : vector<16x16x12xf32>
    %103 = arith.addf %96, %102 : vector<16x16x12xf32>
    %c5_81 = arith.constant 5 : index
    %c11_82 = arith.constant 11 : index
    %c0_83 = arith.constant 0 : index
    %104 = vector.load %arg5[%c5_81, %c11_82, %c0_83] : memref<26x32x12xf32, #tpu.memory_space<vmem>>, vector<16x16x12xf32>
    %c14 = arith.constant 14 : index
    %c0_84 = arith.constant 0 : index
    %c0_85 = arith.constant 0 : index
    %105 = vector.load %arg2[%c14, %c0_84, %c0_85] : memref<25x1x12xf32, #tpu.memory_space<vmem>>, vector<1x1x12xf32>
    %106 = vector.shape_cast %105 : vector<1x1x12xf32> to vector<1x12xf32>
    %107 = vector.shape_cast %106 : vector<1x12xf32> to vector<1x1x12xf32>
    %108 = vector.broadcast %107 : vector<1x1x12xf32> to vector<16x16x12xf32>
    %109 = arith.mulf %104, %108 : vector<16x16x12xf32>
    %110 = arith.addf %103, %109 : vector<16x16x12xf32>
    %c5_86 = arith.constant 5 : index
    %c12_87 = arith.constant 12 : index
    %c0_88 = arith.constant 0 : index
    %111 = vector.load %arg5[%c5_86, %c12_87, %c0_88] : memref<26x32x12xf32, #tpu.memory_space<vmem>>, vector<16x16x12xf32>
    %c15 = arith.constant 15 : index
    %c0_89 = arith.constant 0 : index
    %c0_90 = arith.constant 0 : index
    %112 = vector.load %arg2[%c15, %c0_89, %c0_90] : memref<25x1x12xf32, #tpu.memory_space<vmem>>, vector<1x1x12xf32>
    %113 = vector.shape_cast %112 : vector<1x1x12xf32> to vector<1x12xf32>
    %114 = vector.shape_cast %113 : vector<1x12xf32> to vector<1x1x12xf32>
    %115 = vector.broadcast %114 : vector<1x1x12xf32> to vector<16x16x12xf32>
    %116 = arith.mulf %111, %115 : vector<16x16x12xf32>
    %117 = arith.addf %110, %116 : vector<16x16x12xf32>
    %c5_91 = arith.constant 5 : index
    %c13_92 = arith.constant 13 : index
    %c0_93 = arith.constant 0 : index
    %118 = vector.load %arg5[%c5_91, %c13_92, %c0_93] : memref<26x32x12xf32, #tpu.memory_space<vmem>>, vector<16x16x12xf32>
    %c16 = arith.constant 16 : index
    %c0_94 = arith.constant 0 : index
    %c0_95 = arith.constant 0 : index
    %119 = vector.load %arg2[%c16, %c0_94, %c0_95] : memref<25x1x12xf32, #tpu.memory_space<vmem>>, vector<1x1x12xf32>
    %120 = vector.shape_cast %119 : vector<1x1x12xf32> to vector<1x12xf32>
    %121 = vector.shape_cast %120 : vector<1x12xf32> to vector<1x1x12xf32>
    %122 = vector.broadcast %121 : vector<1x1x12xf32> to vector<16x16x12xf32>
    %123 = arith.mulf %118, %122 : vector<16x16x12xf32>
    %124 = arith.addf %117, %123 : vector<16x16x12xf32>
    %c0_96 = arith.constant 0 : index
    %c8_97 = arith.constant 8 : index
    %c0_98 = arith.constant 0 : index
    %125 = vector.load %arg5[%c0_96, %c8_97, %c0_98] : memref<26x32x12xf32, #tpu.memory_space<vmem>>, vector<16x16x12xf32>
    %c17 = arith.constant 17 : index
    %c0_99 = arith.constant 0 : index
    %c0_100 = arith.constant 0 : index
    %126 = vector.load %arg2[%c17, %c0_99, %c0_100] : memref<25x1x12xf32, #tpu.memory_space<vmem>>, vector<1x1x12xf32>
    %127 = vector.shape_cast %126 : vector<1x1x12xf32> to vector<1x12xf32>
    %128 = vector.shape_cast %127 : vector<1x12xf32> to vector<1x1x12xf32>
    %129 = vector.broadcast %128 : vector<1x1x12xf32> to vector<16x16x12xf32>
    %130 = arith.mulf %125, %129 : vector<16x16x12xf32>
    %131 = arith.addf %124, %130 : vector<16x16x12xf32>
    %c1_101 = arith.constant 1 : index
    %c8_102 = arith.constant 8 : index
    %c0_103 = arith.constant 0 : index
    %132 = vector.load %arg5[%c1_101, %c8_102, %c0_103] : memref<26x32x12xf32, #tpu.memory_space<vmem>>, vector<16x16x12xf32>
    %c18 = arith.constant 18 : index
    %c0_104 = arith.constant 0 : index
    %c0_105 = arith.constant 0 : index
    %133 = vector.load %arg2[%c18, %c0_104, %c0_105] : memref<25x1x12xf32, #tpu.memory_space<vmem>>, vector<1x1x12xf32>
    %134 = vector.shape_cast %133 : vector<1x1x12xf32> to vector<1x12xf32>
    %135 = vector.shape_cast %134 : vector<1x12xf32> to vector<1x1x12xf32>
    %136 = vector.broadcast %135 : vector<1x1x12xf32> to vector<16x16x12xf32>
    %137 = arith.mulf %132, %136 : vector<16x16x12xf32>
    %138 = arith.addf %131, %137 : vector<16x16x12xf32>
    %c2_106 = arith.constant 2 : index
    %c8_107 = arith.constant 8 : index
    %c0_108 = arith.constant 0 : index
    %139 = vector.load %arg5[%c2_106, %c8_107, %c0_108] : memref<26x32x12xf32, #tpu.memory_space<vmem>>, vector<16x16x12xf32>
    %c19 = arith.constant 19 : index
    %c0_109 = arith.constant 0 : index
    %c0_110 = arith.constant 0 : index
    %140 = vector.load %arg2[%c19, %c0_109, %c0_110] : memref<25x1x12xf32, #tpu.memory_space<vmem>>, vector<1x1x12xf32>
    %141 = vector.shape_cast %140 : vector<1x1x12xf32> to vector<1x12xf32>
    %142 = vector.shape_cast %141 : vector<1x12xf32> to vector<1x1x12xf32>
    %143 = vector.broadcast %142 : vector<1x1x12xf32> to vector<16x16x12xf32>
    %144 = arith.mulf %139, %143 : vector<16x16x12xf32>
    %145 = arith.addf %138, %144 : vector<16x16x12xf32>
    %c3_111 = arith.constant 3 : index
    %c8_112 = arith.constant 8 : index
    %c0_113 = arith.constant 0 : index
    %146 = vector.load %arg5[%c3_111, %c8_112, %c0_113] : memref<26x32x12xf32, #tpu.memory_space<vmem>>, vector<16x16x12xf32>
    %c20 = arith.constant 20 : index
    %c0_114 = arith.constant 0 : index
    %c0_115 = arith.constant 0 : index
    %147 = vector.load %arg2[%c20, %c0_114, %c0_115] : memref<25x1x12xf32, #tpu.memory_space<vmem>>, vector<1x1x12xf32>
    %148 = vector.shape_cast %147 : vector<1x1x12xf32> to vector<1x12xf32>
    %149 = vector.shape_cast %148 : vector<1x12xf32> to vector<1x1x12xf32>
    %150 = vector.broadcast %149 : vector<1x1x12xf32> to vector<16x16x12xf32>
    %151 = arith.mulf %146, %150 : vector<16x16x12xf32>
    %152 = arith.addf %145, %151 : vector<16x16x12xf32>
    %c7_116 = arith.constant 7 : index
    %c8_117 = arith.constant 8 : index
    %c0_118 = arith.constant 0 : index
    %153 = vector.load %arg5[%c7_116, %c8_117, %c0_118] : memref<26x32x12xf32, #tpu.memory_space<vmem>>, vector<16x16x12xf32>
    %c21 = arith.constant 21 : index
    %c0_119 = arith.constant 0 : index
    %c0_120 = arith.constant 0 : index
    %154 = vector.load %arg2[%c21, %c0_119, %c0_120] : memref<25x1x12xf32, #tpu.memory_space<vmem>>, vector<1x1x12xf32>
    %155 = vector.shape_cast %154 : vector<1x1x12xf32> to vector<1x12xf32>
    %156 = vector.shape_cast %155 : vector<1x12xf32> to vector<1x1x12xf32>
    %157 = vector.broadcast %156 : vector<1x1x12xf32> to vector<16x16x12xf32>
    %158 = arith.mulf %153, %157 : vector<16x16x12xf32>
    %159 = arith.addf %152, %158 : vector<16x16x12xf32>
    %c8_121 = arith.constant 8 : index
    %c8_122 = arith.constant 8 : index
    %c0_123 = arith.constant 0 : index
    %160 = vector.load %arg5[%c8_121, %c8_122, %c0_123] : memref<26x32x12xf32, #tpu.memory_space<vmem>>, vector<16x16x12xf32>
    %c22 = arith.constant 22 : index
    %c0_124 = arith.constant 0 : index
    %c0_125 = arith.constant 0 : index
    %161 = vector.load %arg2[%c22, %c0_124, %c0_125] : memref<25x1x12xf32, #tpu.memory_space<vmem>>, vector<1x1x12xf32>
    %162 = vector.shape_cast %161 : vector<1x1x12xf32> to vector<1x12xf32>
    %163 = vector.shape_cast %162 : vector<1x12xf32> to vector<1x1x12xf32>
    %164 = vector.broadcast %163 : vector<1x1x12xf32> to vector<16x16x12xf32>
    %165 = arith.mulf %160, %164 : vector<16x16x12xf32>
    %166 = arith.addf %159, %165 : vector<16x16x12xf32>
    %c9_126 = arith.constant 9 : index
    %c8_127 = arith.constant 8 : index
    %c0_128 = arith.constant 0 : index
    %167 = vector.load %arg5[%c9_126, %c8_127, %c0_128] : memref<26x32x12xf32, #tpu.memory_space<vmem>>, vector<16x16x12xf32>
    %c23 = arith.constant 23 : index
    %c0_129 = arith.constant 0 : index
    %c0_130 = arith.constant 0 : index
    %168 = vector.load %arg2[%c23, %c0_129, %c0_130] : memref<25x1x12xf32, #tpu.memory_space<vmem>>, vector<1x1x12xf32>
    %169 = vector.shape_cast %168 : vector<1x1x12xf32> to vector<1x12xf32>
    %170 = vector.shape_cast %169 : vector<1x12xf32> to vector<1x1x12xf32>
    %171 = vector.broadcast %170 : vector<1x1x12xf32> to vector<16x16x12xf32>
    %172 = arith.mulf %167, %171 : vector<16x16x12xf32>
    %173 = arith.addf %166, %172 : vector<16x16x12xf32>
    %c10_131 = arith.constant 10 : index
    %c8_132 = arith.constant 8 : index
    %c0_133 = arith.constant 0 : index
    %174 = vector.load %arg5[%c10_131, %c8_132, %c0_133] : memref<26x32x12xf32, #tpu.memory_space<vmem>>, vector<16x16x12xf32>
    %c24 = arith.constant 24 : index
    %c0_134 = arith.constant 0 : index
    %c0_135 = arith.constant 0 : index
    %175 = vector.load %arg2[%c24, %c0_134, %c0_135] : memref<25x1x12xf32, #tpu.memory_space<vmem>>, vector<1x1x12xf32>
    %176 = vector.shape_cast %175 : vector<1x1x12xf32> to vector<1x12xf32>
    %177 = vector.shape_cast %176 : vector<1x12xf32> to vector<1x1x12xf32>
    %178 = vector.broadcast %177 : vector<1x1x12xf32> to vector<16x16x12xf32>
    %179 = arith.mulf %174, %178 : vector<16x16x12xf32>
    %180 = arith.addf %173, %179 : vector<16x16x12xf32>
    %c0_136 = arith.constant 0 : index
    %c0_137 = arith.constant 0 : index
    %c0_138 = arith.constant 0 : index
    %181 = vector.load %arg3[%c0_136, %c0_137, %c0_138] : memref<1x1x12xf32, #tpu.memory_space<vmem>>, vector<1x1x12xf32>
    %182 = vector.shape_cast %181 : vector<1x1x12xf32> to vector<1x12xf32>
    %183 = vector.shape_cast %182 : vector<1x12xf32> to vector<1x1x12xf32>
    %184 = vector.broadcast %183 : vector<1x1x12xf32> to vector<16x16x12xf32>
    %185 = arith.addf %180, %184 : vector<16x16x12xf32>
    %c0_139 = arith.constant 0 : index
    %c0_140 = arith.constant 0 : index
    %c0_141 = arith.constant 0 : index
    %c0_142 = arith.constant 0 : index
    %186 = vector.load %arg4[%c0_139, %c0_140, %c0_141, %c0_142] : memref<1x16x16x12xf32, #tpu.memory_space<vmem>>, vector<1x16x16x12xf32>
    %187 = vector.shape_cast %186 : vector<1x16x16x12xf32> to vector<16x16x12xf32>
    %188 = vector.shape_cast %185 : vector<16x16x12xf32> to vector<1x16x16x12xf32>
    tpu.vector_store %arg4[%c0_139, %c0_140, %c0_141, %c0_142], %188 {strides = array<i32>} : memref<1x16x16x12xf32, #tpu.memory_space<vmem>>, vector<1x16x16x12xf32>,
    return
  }
  func.func @transform_0(%arg0: i32) -> (i32, i32, i32, i32) {
    %c0_i32 = arith.constant 0 : i32
    %c0_i32_0 = arith.constant 0 : i32
    %c0_i32_1 = arith.constant 0 : i32
    %c0_i32_2 = arith.constant 0 : i32
    return %arg0, %c0_i32, %c0_i32_0, %c0_i32_1 : i32, i32, i32, i32
  }
  func.func @transform_1(%arg0: i32) -> (i32, i32, i32) {
    %c0_i32 = arith.constant 0 : i32
    %c0_i32_0 = arith.constant 0 : i32
    %c0_i32_1 = arith.constant 0 : i32
    %c0_i32_2 = arith.constant 0 : i32
    return %c0_i32, %c0_i32_0, %c0_i32_1 : i32, i32, i32
  }
  func.func @transform_2(%arg0: i32) -> (i32, i32, i32) {
    %c0_i32 = arith.constant 0 : i32
    %c0_i32_0 = arith.constant 0 : i32
    %c0_i32_1 = arith.constant 0 : i32
    %c0_i32_2 = arith.constant 0 : i32
    return %c0_i32, %c0_i32_0, %c0_i32_1 : i32, i32, i32
  }
  func.func @transform_3(%arg0: i32) -> (i32, i32, i32, i32) {
    %c0_i32 = arith.constant 0 : i32
    %c0_i32_0 = arith.constant 0 : i32
    %c0_i32_1 = arith.constant 0 : i32
    %c0_i32_2 = arith.constant 0 : i32
    return %arg0, %c0_i32, %c0_i32_0, %c0_i32_1 : i32, i32, i32, i32
  }
}

</mosaic_0001>

<bundles_post_ra>
// kernel: _lambda_.1
= control target key start
LH: loop header
LB: loop body
LE: loop exit
PB: predicated region body
PF: predicated region fallthrough
CT: control target
= control target key end

     0   :  { %s3096_s12 = smov 0   ;;  %s5385_s0 = inlined_call_operand.vmem [shape: f32[2,16,16,12], index: 0, kind: input, shape index: {}]   ;;  %s5386_s1 = inlined_call_operand.vmem [shape: f32[25,1,12], index: 1, kind: input, shape index: {}]   ;;  %s5387_s2 = inlined_call_operand.vmem [shape: f32[1,1,12], index: 2, kind: input, shape index: {}]   ;;  %s5388_s3 = inlined_call_operand.vmem [shape: f32[2,16,16,12], index: 3, kind: output, shape index: {}]  }
   0x1 LB: > { %s2949_s13 = sadd.s32 4294967295, %s3073_s12   ;;  %p2953_p0 = scmp.ge.s32.totalorder %s3073_s12, 1  ;;  %s3073_s12 = sphi %s3096_s12, %s13_s12  }
   0x2   : > { %p137_p1 = scmp.lt.s32.totalorder %s3073_s12, 3 }
   0x4   : > { %p138_p2 = pnand %p2953_p0, %p137_p1 }
   0x6   : > { %141 = sbr.rel (%p138_p2) target bundleno = 519 (0x207), region = 32 }
   0xb   : > { %vm171_vm0 = vcmask 97280   ;;  %v3075_v0 = vmov 0.0   ;;  %p161_p3 = scmp.lt.s32.totalorder %s2949_s13, 1  ;;  %v3286_v1 = vld [vmem:[%s5386_s1] ss:$0 sm:$0xff] }
   0xc   : > { %188 = vst.msk [vmem:[#allocation2 + $0x80] sm:$0xff] %vm171_vm0, %v3075_v0  ;;  %v3291_v2 = vld [vmem:[%s5386_s1 + $0x1] ss:$0 sm:$0xff]  ;;  %v3310_v10 = vld [vmem:[%s5386_s1 + $0x2] ss:$0 sm:$0xff] }
   0xd   : > { %173 = vst.msk [vmem:[#allocation2 + $0x8] sm:$0xff] %vm171_vm0, %v3075_v0  ;;  %s5564_s13 = smov (!%p161_p3, %s2949_s13), 1  ;;  %v3328_v23 = vld [vmem:[%s5386_s1 + $0x3] ss:$0 sm:$0xff]  ;;  %v3336_v27 = vld [vmem:[%s5386_s1 + $0x4] ss:$0 sm:$0xff] }
   0xe   : > { %174 = vst.msk [vmem:[#allocation2 + $0x10] sm:$0xff] %vm171_vm0, %v3075_v0  ;;  %s2984_s14 = sshll.u32 %s5564_s13, 8  ;;  %v3354_v45 = vld [vmem:[%s5386_s1 + $0x5] ss:$0 sm:$0xff]  ;;  %v3359_v46 = vld [vmem:[%s5386_s1 + $0x6] ss:$0 sm:$0xff] }
   0xf   : > { %177 = vst.msk [vmem:[#allocation2 + $0x28] sm:$0xff] %vm171_vm0, %v3075_v0  ;;  %s3298_s21 = scalar_lea.vmem %s5385_s0, %s2984_s14  ;;  %v3366_v55 = vld [vmem:[%s5386_s1 + $0x7] ss:$0 sm:$0xff]  ;;  %v3371_v63 = vld [vmem:[%s5386_s1 + $0x9] ss:$0 sm:$0xff]  ;;  %s4264_s25 = scalar_lea.vmem %s5388_s3, %s2984_s14 }
  0x10   : > { %178 = vst.msk [vmem:[#allocation2 + $0x30] sm:$0xff] %vm171_vm0, %v3075_v0  ;;  %v276_v6 = vld [vmem:[%s3298_s21] sm:$0xff]  ;;  %v277_v11 = vld [vmem:[%s3298_s21 + $0x8] sm:$0xff]  ;;  %v278_v13 = vld [vmem:[%s3298_s21 + $0x10] sm:$0xff] }
  0x11   : > { %181 = vst.msk [vmem:[#allocation2 + $0x48] sm:$0xff] %vm171_vm0, %v3075_v0  ;;  %v279_v14 = vld [vmem:[%s3298_s21 + $0x18] sm:$0xff]  ;;  %v280_v17 = vld [vmem:[%s3298_s21 + $0x20] sm:$0xff]  ;;  %v281_v21 = vld [vmem:[%s3298_s21 + $0x28] sm:$0xff] }
  0x12   : > { %182 = vst.msk [vmem:[#allocation2 + $0x50] sm:$0xff] %vm171_vm0, %v3075_v0  ;;  %v282_v22 = vld [vmem:[%s3298_s21 + $0x30] sm:$0xff]  ;;  %v283_v24 = vld [vmem:[%s3298_s21 + $0x38] sm:$0xff]  ;;  %v284_v28 = vld [vmem:[%s3298_s21 + $0x40] sm:$0xff] }
  0x13   : > { %185 = vst.msk [vmem:[#allocation2 + $0x68] sm:$0xff] %vm171_vm0, %v3075_v0  ;;  %v285_v30 = vld [vmem:[%s3298_s21 + $0x48] sm:$0xff] }
  0x14   : > { %186 = vst.msk [vmem:[#allocation2 + $0x70] sm:$0xff] %vm171_vm0, %v3075_v0 }
  0x15   : > { %189 = vst.msk [vmem:[#allocation2 + $0x88] sm:$0xff] %vm171_vm0, %v3075_v0 }
  0x16   : > { %190 = vst.msk [vmem:[#allocation2 + $0x90] sm:$0xff] %vm171_vm0, %v3075_v0 }
  0x17   : > { %191 = vst.msk [vmem:[#allocation2 + $0x98] sm:$0xff] %vm171_vm0, %v3075_v0 }
  0x18   : > { %192 = vst.msk [vmem:[#allocation2 + $0xa0] sm:$0xff] %vm171_vm0, %v3075_v0 }
  0x19   : > { %193 = vst.msk [vmem:[#allocation2 + $0xa8] sm:$0xff] %vm171_vm0, %v3075_v0 }
  0x1a   : > { %194 = vst.msk [vmem:[#allocation2 + $0xb0] sm:$0xff] %vm171_vm0, %v3075_v0 }
  0x1b   : > { %195 = vst.msk [vmem:[#allocation2 + $0xb8] sm:$0xff] %vm171_vm0, %v3075_v0 }
  0x1c   : > { %196 = vst.msk [vmem:[#allocation2 + $0xc0] sm:$0xff] %vm171_vm0, %v3075_v0  ;;  %v342_v3 = vld [vmem:[#allocation2 + $0x87] sm:$0xff] }
  0x1d   : > { %197 = vst.msk [vmem:[#allocation2 + $0xc8] sm:$0xff] %vm171_vm0, %v3075_v0  ;;  %v442_v4 = vld [vmem:[#allocation2 + $0x88] sm:$0xff]  ;;  %v378_v7 = vmul.f32 %v3286_v1, %v342_v3  ;;  %v443_v8 = vld [vmem:[#allocation2 + $0x90] sm:$0xff] }
  0x1e   : > { %198 = vst.msk [vmem:[#allocation2 + $0xd0] sm:$0xff] %vm171_vm0, %v3075_v0  ;;  %v343_v5 = vld [vmem:[#allocation2 + $0x8f] sm:$0xff]  ;;  %v479_v9 = vmul.f32 %v3291_v2, %v442_v4  ;;  %v480_v16 = vmul.f32 %v3291_v2, %v443_v8 }
  0x1f   : > { %199 = vst.msk [vmem:[#allocation2 + $0xd8] sm:$0xff] %vm171_vm0, %v3075_v0  ;;  %v543_v12 = vld [vmem:[#allocation2 + $0x89] sm:$0xff]  ;;  %v379_v15 = vmul.f32 %v3286_v1, %v343_v5  ;;  %v544_v19 = vld [vmem:[#allocation2 + $0x91] sm:$0xff] }
  0x20   : > { %200 = vst.msk [vmem:[#allocation2 + $0xe0] sm:$0xff] %vm171_vm0, %v3075_v0  ;;  %v511_v18 = vadd.f32 %v479_v9, %v378_v7  ;;  %v580_v20 = vmul.f32 %v3310_v10, %v543_v12  ;;  %v581_v26 = vmul.f32 %v3310_v10, %v544_v19 }
  0x21   : > { %201 = vst.msk [vmem:[#allocation2 + $0xe8] sm:$0xff] %vm171_vm0, %v3075_v0  ;;  %v512_v25 = vadd.f32 %v480_v16, %v379_v15  ;;  %v3393_v15 = vld [vmem:[%s5386_s1 + $0xa] ss:$0 sm:$0xff]  ;;  %v3398_v16 = vld [vmem:[%s5386_s1 + $0xb] ss:$0 sm:$0xff] }
  0x22   : > { %202 = vst.msk [vmem:[#allocation2 + $0xf0] sm:$0xff] %vm171_vm0, %v3075_v0  ;;  %v612_v29 = vadd.f32 %v580_v20, %v511_v18 }
  0x23   : > { %203 = vst.msk [vmem:[#allocation2 + $0xf8] sm:$0xff] %vm171_vm0, %v3075_v0  ;;  %v613_v36 = vadd.f32 %v581_v26, %v512_v25 }
  0x24   : > { %204 = vst.msk [vmem:[#allocation2 + $0x100] sm:$0xff] %vm171_vm0, %v3075_v0 }
  0x25   : > { %205 = vst.msk [vmem:[#allocation2 + $0x108] sm:$0xff] %vm171_vm0, %v3075_v0 }
  0x26   : > { %206 = vst.msk [vmem:[#allocation2 + $0x110] sm:$0xff] %vm171_vm0, %v3075_v0 }
  0x27   : > { %207 = vst.msk [vmem:[#allocation2 + $0x118] sm:$0xff] %vm171_vm0, %v3075_v0 }
  0x28   : > { %208 = vst.msk [vmem:[#allocation2 + $0x120] sm:$0xff] %vm171_vm0, %v3075_v0 }
  0x29   : > { %209 = vst.msk [vmem:[#allocation2 + $0x128] sm:$0xff] %vm171_vm0, %v3075_v0 }
  0x2a   : > { %210 = vst.msk [vmem:[#allocation2 + $0x130] sm:$0xff] %vm171_vm0, %v3075_v0 }
  0x2b   : > { %211 = vst.msk [vmem:[#allocation2 + $0x138] sm:$0xff] %vm171_vm0, %v3075_v0 }
  0x2c   : > { %212 = vst.msk [vmem:[#allocation2 + $0x140] sm:$0xff] %vm171_vm0, %v3075_v0 }
  0x2d   : > { %213 = vst.msk [vmem:[#allocation2 + $0x148] sm:$0xff] %vm171_vm0, %v3075_v0 }
  0x2e   : > { %214 = vst.msk [vmem:[#allocation2 + $0x150] sm:$0xff] %vm171_vm0, %v3075_v0 }
  0x2f   : > { %215 = vst.msk [vmem:[#allocation2 + $0x158] sm:$0xff] %vm171_vm0, %v3075_v0 }
  0x30   : > { %216 = vst.msk [vmem:[#allocation2 + $0x160] sm:$0xff] %vm171_vm0, %v3075_v0 }
  0x31   : > { %217 = vst.msk [vmem:[#allocation2 + $0x168] sm:$0xff] %vm171_vm0, %v3075_v0 }
  0x32   : > { %218 = vst.msk [vmem:[#allocation2 + $0x170] sm:$0xff] %vm171_vm0, %v3075_v0 }
  0x33   : > { %219 = vst.msk [vmem:[#allocation2 + $0x178] sm:$0xff] %vm171_vm0, %v3075_v0 }
  0x34   : > { %220 = vst.msk [vmem:[#allocation2 + $0x180] sm:$0xff] %vm171_vm0, %v3075_v0 }
  0x35   : > { %221 = vst.msk [vmem:[#allocation2 + $0x188] sm:$0xff] %vm171_vm0, %v3075_v0 }
  0x36   : > { %222 = vst.msk [vmem:[#allocation2 + $0x190] sm:$0xff] %vm171_vm0, %v3075_v0 }
  0x37   : > { %223 = vst.msk [vmem:[#allocation2 + $0x198] sm:$0xff] %vm171_vm0, %v3075_v0 }
  0x38   : > { %224 = vst.msk [vmem:[#allocation2 + $0x1a0] sm:$0xff] %vm171_vm0, %v3075_v0 }
  0x39   : > { %225 = vst.msk [vmem:[#allocation2 + $0x1a8] sm:$0xff] %vm171_vm0, %v3075_v0 }
  0x3a   : > { %226 = vst.msk [vmem:[#allocation2 + $0x1b0] sm:$0xff] %vm171_vm0, %v3075_v0 }
  0x3b   : > { %227 = vst.msk [vmem:[#allocation2 + $0x1b8] sm:$0xff] %vm171_vm0, %v3075_v0 }
  0x3c   : > { %228 = vst.msk [vmem:[#allocation2 + $0x1c0] sm:$0xff] %vm171_vm0, %v3075_v0 }
  0x3d   : > { %229 = vst.msk [vmem:[#allocation2 + $0x1c8] sm:$0xff] %vm171_vm0, %v3075_v0 }
  0x3e   : > { %230 = vst.msk [vmem:[#allocation2 + $0x1d0] sm:$0xff] %vm171_vm0, %v3075_v0 }
  0x3f   : > { %231 = vst.msk [vmem:[#allocation2 + $0x1d8] sm:$0xff] %vm171_vm0, %v3075_v0 }
  0x40   : > { %232 = vst.msk [vmem:[#allocation2 + $0x1e0] sm:$0xff] %vm171_vm0, %v3075_v0 }
  0x41   : > { %233 = vst.msk [vmem:[#allocation2 + $0x1e8] sm:$0xff] %vm171_vm0, %v3075_v0 }
  0x42   : > { %234 = vst.msk [vmem:[#allocation2 + $0x1f0] sm:$0xff] %vm171_vm0, %v3075_v0 }
  0x43   : > { %235 = vst.msk [vmem:[#allocation2 + $0x1f8] sm:$0xff] %vm171_vm0, %v3075_v0 }
  0x44   : > { %236 = vst.msk [vmem:[#allocation2 + $0x200] sm:$0xff] %vm171_vm0, %v3075_v0 }
  0x45   : > { %237 = vst.msk [vmem:[#allocation2 + $0x208] sm:$0xff] %vm171_vm0, %v3075_v0 }
  0x46   : > { %238 = vst.msk [vmem:[#allocation2 + $0x210] sm:$0xff] %vm171_vm0, %v3075_v0 }
  0x47   : > { %239 = vst.msk [vmem:[#allocation2 + $0x218] sm:$0xff] %vm171_vm0, %v3075_v0 }
  0x48   : > { %240 = vst.msk [vmem:[#allocation2 + $0x220] sm:$0xff] %vm171_vm0, %v3075_v0 }
  0x49   : > { %241 = vst.msk [vmem:[#allocation2 + $0x228] sm:$0xff] %vm171_vm0, %v3075_v0 }
  0x4a   : > { %242 = vst.msk [vmem:[#allocation2 + $0x230] sm:$0xff] %vm171_vm0, %v3075_v0 }
  0x4b   : > { %243 = vst.msk [vmem:[#allocation2 + $0x238] sm:$0xff] %vm171_vm0, %v3075_v0 }
  0x4c   : > { %244 = vst.msk [vmem:[#allocation2 + $0x240] sm:$0xff] %vm171_vm0, %v3075_v0 }
  0x4d   : > { %245 = vst.msk [vmem:[#allocation2 + $0x248] sm:$0xff] %vm171_vm0, %v3075_v0 }
  0x4e   : > { %246 = vst.msk [vmem:[#allocation2 + $0x250] sm:$0xff] %vm171_vm0, %v3075_v0 }
  0x4f   : > { %247 = vst.msk [vmem:[#allocation2 + $0x258] sm:$0xff] %vm171_vm0, %v3075_v0 }
  0x50   : > { %248 = vst.msk [vmem:[#allocation2 + $0x260] sm:$0xff] %vm171_vm0, %v3075_v0 }
  0x51   : > { %249 = vst.msk [vmem:[#allocation2 + $0x268] sm:$0xff] %vm171_vm0, %v3075_v0 }
  0x52   : > { %250 = vst.msk [vmem:[#allocation2 + $0x270] sm:$0xff] %vm171_vm0, %v3075_v0 }
  0x53   : > { %251 = vst.msk [vmem:[#allocation2 + $0x278] sm:$0xff] %vm171_vm0, %v3075_v0 }
  0x54   : > { %252 = vst.msk [vmem:[#allocation2 + $0x280] sm:$0xff] %vm171_vm0, %v3075_v0 }
  0x55   : > { %253 = vst.msk [vmem:[#allocation2 + $0x288] sm:$0xff] %vm171_vm0, %v3075_v0 }
  0x56   : > { %254 = vst.msk [vmem:[#allocation2 + $0x290] sm:$0xff] %vm171_vm0, %v3075_v0 }
  0x57   : > { %255 = vst.msk [vmem:[#allocation2 + $0x298] sm:$0xff] %vm171_vm0, %v3075_v0 }
  0x58   : > { %256 = vst.msk [vmem:[#allocation2 + $0x2a0] sm:$0xff] %vm171_vm0, %v3075_v0 }
  0x59   : > { %257 = vst.msk [vmem:[#allocation2 + $0x2a8] sm:$0xff] %vm171_vm0, %v3075_v0 }
  0x5a   : > { %258 = vst.msk [vmem:[#allocation2 + $0x2b0] sm:$0xff] %vm171_vm0, %v3075_v0 }
  0x5b   : > { %259 = vst.msk [vmem:[#allocation2 + $0x2b8] sm:$0xff] %vm171_vm0, %v3075_v0 }
  0x5c   : > { %261 = vst.msk [vmem:[#allocation2 + $0x2c8] sm:$0xff] %vm171_vm0, %v3075_v0 }
  0x5d   : > { %262 = vst.msk [vmem:[#allocation2 + $0x2d0] sm:$0xff] %vm171_vm0, %v3075_v0 }
  0x5e   : > { %265 = vst.msk [vmem:[#allocation2 + $0x2e8] sm:$0xff] %vm171_vm0, %v3075_v0 }
  0x5f   : > { %266 = vst.msk [vmem:[#allocation2 + $0x2f0] sm:$0xff] %vm171_vm0, %v3075_v0 }
  0x60   : > { %269 = vst.msk [vmem:[#allocation2 + $0x308] sm:$0xff] %vm171_vm0, %v3075_v0  ;;  %v978_v47 = vld [vmem:[#allocation2 + $0x2a7] sm:$0xff] }
  0x61   : > { %270 = vst.msk [vmem:[#allocation2 + $0x310] sm:$0xff] %vm171_vm0, %v3075_v0  ;;  %v1079_v48 = vld [vmem:[#allocation2 + $0x2a8] sm:$0xff]  ;;  %v1080_v57 = vld [vmem:[#allocation2 + $0x2b0] sm:$0xff]  ;;  %v3376_v4 = vmul.f32 %v3359_v46, %v978_v47 }
  0x62   : > { %273 = vst.msk [vmem:[#allocation2 + $0x328] sm:$0xff] %vm171_vm0, %v3075_v0  ;;  %v979_v56 = vld [vmem:[#allocation2 + $0x2af] sm:$0xff]  ;;  %v3379_v5 = vmul.f32 %v3366_v55, %v1079_v48  ;;  %v3404_v19 = vmul.f32 %v3366_v55, %v1080_v57 }
  0x63   : > { %274 = vst.msk [vmem:[#allocation2 + $0x330] sm:$0xff] %vm171_vm0, %v3075_v0  ;;  %v1180_v58 = vld [vmem:[#allocation2 + $0x2a9] sm:$0xff]  ;;  %v1181_v62 = vld [vmem:[#allocation2 + $0x2b1] sm:$0xff]  ;;  %v3401_v18 = vmul.f32 %v3359_v46, %v979_v56 }
  0x64   : > { %309 = vst.msk [vmem:[#allocation2 + $0xa8] sm:$0xff] %vm171_vm0, %v276_v6  ;;  %v3384_v6 = vld [vmem:[%s5386_s1 + $0x8] ss:$0 sm:$0xff] }
  0x65   : > { %310 = vst.msk [vmem:[#allocation2 + $0xb0] sm:$0xff] %vm171_vm0, %v277_v11  ;;  %v3407_v20 = vmul.f32 %v3384_v6, %v1180_v58 }
  0x66   : > { %311 = vst.msk [vmem:[#allocation2 + $0xc8] sm:$0xff] %vm171_vm0, %v278_v13 }
  0x67   : > { %312 = vst.msk [vmem:[#allocation2 + $0xd0] sm:$0xff] %vm171_vm0, %v279_v14 }
  0x68   : > { %313 = vst.msk [vmem:[#allocation2 + $0xe8] sm:$0xff] %vm171_vm0, %v280_v17 }
  0x69   : > { %314 = vst.msk [vmem:[#allocation2 + $0xf0] sm:$0xff] %vm171_vm0, %v281_v21 }
  0x6a   : > { %315 = vst.msk [vmem:[#allocation2 + $0x108] sm:$0xff] %vm171_vm0, %v282_v22 }
  0x6b   : > { %v344_v31 = vld [vmem:[#allocation2 + $0xa7] sm:$0xff]  ;;  %316 = vst.msk [vmem:[#allocation2 + $0x110] sm:$0xff] %vm171_vm0, %v283_v24 }
  0x6c   : > { %v444_v32 = vld [vmem:[#allocation2 + $0xa8] sm:$0xff]  ;;  %v380_v33 = vmul.f32 %v3286_v1, %v344_v31  ;;  %v681_v35 = vmul.f32 %v3328_v23, %v344_v31  ;;  %317 = vst.msk [vmem:[#allocation2 + $0x128] sm:$0xff] %vm171_vm0, %v284_v28  ;;  %v445_v39 = vld [vmem:[#allocation2 + $0xb0] sm:$0xff]  ;;  %v3410_v28 = vmul.f32 %v3384_v6, %v1181_v62 }
  0x6d   : > { %v481_v34 = vmul.f32 %v3291_v2, %v444_v32  ;;  %v782_v37 = vmul.f32 %v3336_v27, %v444_v32  ;;  %v345_v38 = vld [vmem:[#allocation2 + $0xaf] sm:$0xff]  ;;  %318 = vst.msk [vmem:[#allocation2 + $0x130] sm:$0xff] %vm171_vm0, %v285_v30  ;;  %v482_v44 = vmul.f32 %v3291_v2, %v445_v39  ;;  %v346_v53 = vld [vmem:[#allocation2 + $0xc7] sm:$0xff]  ;;  %v783_v8 = vmul.f32 %v3336_v27, %v445_v39 }
  0x6e   : > { %v545_v40 = vld [vmem:[#allocation2 + $0xa9] sm:$0xff]  ;;  %v713_v42 = vadd.f32 %v681_v35, %v612_v29  ;;  %v381_v43 = vmul.f32 %v3286_v1, %v345_v38  ;;  %v546_v49 = vld [vmem:[#allocation2 + $0xb1] sm:$0xff]  ;;  %v682_v51 = vmul.f32 %v3328_v23, %v345_v38  ;;  %v382_v9 = vmul.f32 %v3286_v1, %v346_v53  ;;  %5393 = vst [vmem:[#allocation3_spill] sm:$0xff] %v3404_v19  ;;  %v292_v19 = vld [vmem:[%s3298_s21 + $0x80] sm:$0xff] }
  0x6f   : > { %v513_v41 = vadd.f32 %v481_v34, %v380_v33  ;;  %v582_v50 = vmul.f32 %v3310_v10, %v545_v40  ;;  %v446_v54 = vld [vmem:[#allocation2 + $0xc8] sm:$0xff]  ;;  %v583_v0 = vmul.f32 %v3310_v10, %v546_v49  ;;  %v883_v3 = vmul.f32 %v3354_v45, %v545_v40  ;;  %v447_v14 = vld [vmem:[#allocation2 + $0xd0] sm:$0xff]  ;;  %5394 = vst [vmem:[#allocation4_spill] sm:$0xff] %v3410_v28 }
  0x70   : > { %v814_v52 = vadd.f32 %v782_v37, %v713_v42  ;;  %v514_v59 = vadd.f32 %v482_v44, %v381_v43  ;;  %v714_v61 = vadd.f32 %v682_v51, %v613_v36  ;;  %v1251_v7 = vld [vmem:[#allocation2 + $0xa3] sm:$0xff]  ;;  %v483_v11 = vmul.f32 %v3291_v2, %v446_v54  ;;  %v347_v13 = vld [vmem:[#allocation2 + $0xcf] sm:$0xff]  ;;  %325 = vst.msk [vmem:[#allocation2 + $0x1a8] sm:$0xff] %vm171_vm0, %v292_v19 }
  0x71   : > { %v614_v60 = vadd.f32 %v582_v50, %v513_v41  ;;  %v683_v12 = vmul.f32 %v3328_v23, %v346_v53  ;;  %v1352_v21 = vld [vmem:[#allocation2 + $0xa4] sm:$0xff]  ;;  %v3413_v29 = vmul.f32 %v3371_v63, %v1251_v7  ;;  %v985_v30 = vmul.f32 %v3359_v46, %v346_v53 }
  0x72   : > { %v915_v17 = vadd.f32 %v883_v3, %v814_v52  ;;  %v1453_v22 = vld [vmem:[#allocation2 + $0xa5] sm:$0xff]  ;;  %v615_v24 = vadd.f32 %v583_v0, %v514_v59  ;;  %v815_v25 = vadd.f32 %v783_v8, %v714_v61  ;;  %v383_v31 = vmul.f32 %v3286_v1, %v347_v13 }
  0x73   : > { %v715_v26 = vadd.f32 %v683_v12, %v614_v60  ;;  %v484_v32 = vmul.f32 %v3291_v2, %v447_v14  ;;  %v547_v33 = vld [vmem:[#allocation2 + $0xc9] sm:$0xff]  ;;  %v884_v34 = vmul.f32 %v3354_v45, %v546_v49  ;;  %v515_v35 = vadd.f32 %v483_v11, %v382_v9  ;;  %v548_v49 = vld [vmem:[#allocation2 + $0xd1] sm:$0xff] }
  0x74   : > { %v784_v36 = vmul.f32 %v3336_v27, %v446_v54  ;;  %v1253_v37 = vld [vmem:[#allocation2 + $0xc3] sm:$0xff]  ;;  %v684_v40 = vmul.f32 %v3328_v23, %v347_v13  ;;  %v3422_v41 = vmul.f32 %v3393_v15, %v1352_v21  ;;  %v3425_v42 = vmul.f32 %v3398_v16, %v1453_v22  ;;  %v349_v9 = vld [vmem:[#allocation2 + $0xef] sm:$0xff] }
  0x75   : > { %v1354_v38 = vld [vmem:[#allocation2 + $0xc4] sm:$0xff]  ;;  %v1017_v43 = vadd.f32 %v985_v30, %v915_v17  ;;  %v1086_v44 = vmul.f32 %v3366_v55, %v446_v54  ;;  %v916_v47 = vadd.f32 %v884_v34, %v815_v25  ;;  %v584_v50 = vmul.f32 %v3310_v10, %v547_v33  ;;  %v3444_v11 = vld [vmem:[#allocation2 + $0xf0] sm:$0xff] }
  0x76   : > { %v1455_v39 = vld [vmem:[#allocation2 + $0xc5] sm:$0xff]  ;;  %v816_v48 = vadd.f32 %v784_v36, %v715_v26  ;;  %v716_v51 = vadd.f32 %v684_v40, %v615_v24  ;;  %v3430_v56 = vmul.f32 %v3371_v63, %v1253_v37  ;;  %v3433_v57 = vmul.f32 %v3393_v15, %v1354_v38  ;;  %v286_v24 = vld [vmem:[%s3298_s21 + $0x50] sm:$0xff] }
  0x77   : > { %v348_v52 = vld [vmem:[#allocation2 + $0xe7] sm:$0xff]  ;;  %v3436_v58 = vmul.f32 %v3398_v16, %v1455_v39  ;;  %v516_v59 = vadd.f32 %v484_v32, %v383_v31  ;;  %v616_v54 = vadd.f32 %v584_v50, %v515_v35  ;;  %v785_v60 = vmul.f32 %v3336_v27, %v447_v14  ;;  %319 = vst.msk [vmem:[#allocation2 + $0x148] sm:$0xff] %vm171_vm0, %v286_v24 }
  0x78   : > { %v448_v53 = vld [vmem:[#allocation2 + $0xe8] sm:$0xff]  ;;  %v885_v61 = vmul.f32 %v3354_v45, %v547_v33  ;;  %v986_v62 = vmul.f32 %v3359_v46, %v347_v13  ;;  %v1118_v0 = vadd.f32 %v1086_v44, %v1017_v43  ;;  %v585_v3 = vmul.f32 %v3310_v10, %v548_v49  ;;  %v287_v13 = vld [vmem:[%s3298_s21 + $0x58] sm:$0xff]  ;;  %v288_v32 = vld [vmem:[%s3298_s21 + $0x60] sm:$0xff] }
  0x79   : > { %v384_v7 = vmul.f32 %v3286_v1, %v348_v52  ;;  %v485_v8 = vmul.f32 %v3291_v2, %v448_v53  ;;  %v817_v12 = vadd.f32 %v785_v60, %v716_v51  ;;  %v685_v22 = vmul.f32 %v3328_v23, %v348_v52  ;;  %v289_v34 = vld [vmem:[%s3298_s21 + $0x68] sm:$0xff]  ;;  %320 = vst.msk [vmem:[#allocation2 + $0x150] sm:$0xff] %vm171_vm0, %v287_v13  ;;  %v290_v43 = vld [vmem:[%s3298_s21 + $0x70] sm:$0xff] }
  0x7a   : > { %v917_v17 = vadd.f32 %v885_v61, %v816_v48  ;;  %v1018_v21 = vadd.f32 %v986_v62, %v916_v47  ;;  %v617_v25 = vadd.f32 %v585_v3, %v516_v59  ;;  %v886_v26 = vmul.f32 %v3354_v45, %v548_v49  ;;  %v1255_v37 = vld [vmem:[#allocation2 + $0xe3] sm:$0xff]  ;;  %321 = vst.msk [vmem:[#allocation2 + $0x168] sm:$0xff] %vm171_vm0, %v288_v32 }
  0x7b   : > { %v1087_v30 = vmul.f32 %v3366_v55, %v447_v14  ;;  %v1187_v31 = vmul.f32 %v3384_v6, %v547_v33  ;;  %v717_v35 = vadd.f32 %v685_v22, %v616_v54  ;;  %v987_v36 = vmul.f32 %v3359_v46, %v348_v52  ;;  %v549_v40 = vld [vmem:[#allocation2 + $0xe9] sm:$0xff]  ;;  %322 = vst.msk [vmem:[#allocation2 + $0x170] sm:$0xff] %vm171_vm0, %v289_v34 }
  0x7c   : > { %v385_v38 = vmul.f32 %v3286_v1, %v349_v9  ;;  %v486_v39 = vmul.f32 %v3291_v2, %v3444_v11  ;;  %v3462_v14 = vmul.f32 %v3384_v6, %v548_v49  ;;  %v517_v44 = vadd.f32 %v485_v8, %v384_v7  ;;  %v1356_v47 = vld [vmem:[#allocation2 + $0xe4] sm:$0xff]  ;;  %323 = vst.msk [vmem:[#allocation2 + $0x188] sm:$0xff] %vm171_vm0, %v290_v43  ;;  %v291_v8 = vld [vmem:[%s3298_s21 + $0x78] sm:$0xff]  ;;  %v351_v34 = vld [vmem:[#allocation2 + $0x10f] sm:$0xff] }
  0x7d   : > { %v3464_v33 = vadd.f32 %v1187_v31, %v1118_v0  ;;  %v686_v48 = vmul.f32 %v3328_v23, %v349_v9  ;;  %v918_v50 = vadd.f32 %v886_v26, %v817_v12  ;;  %v3468_v51 = vadd.f32 %v1087_v30, %v1018_v21  ;;  %v350_v54 = vld [vmem:[#allocation2 + $0x107] sm:$0xff]  ;;  %v550_v0 = vld [vmem:[#allocation2 + $0xf1] sm:$0xff]  ;;  %324 = vst.msk [vmem:[#allocation2 + $0x190] sm:$0xff] %vm171_vm0, %v291_v8 }
  0x7e   : > { %v786_v52 = vmul.f32 %v3336_v27, %v448_v53  ;;  %v1019_v59 = vadd.f32 %v987_v36, %v917_v17  ;;  %v450_v60 = vld [vmem:[#allocation2 + $0x108] sm:$0xff]  ;;  %v1088_v49 = vmul.f32 %v3366_v55, %v448_v53  ;;  %v3474_v61 = vmul.f32 %v3371_v63, %v1255_v37 }
  0x7f   : > { %v1457_v62 = vld [vmem:[#allocation2 + $0xe5] sm:$0xff]  ;;  %v586_v3 = vmul.f32 %v3310_v10, %v549_v40  ;;  %v718_v7 = vadd.f32 %v686_v48, %v617_v25  ;;  %v3480_v17 = vmul.f32 %v3393_v15, %v1356_v47  ;;  %v518_v21 = vadd.f32 %v486_v39, %v385_v38 }
  0x80   : > { %5395 = vst [vmem:[#allocation5_spill] sm:$0xff] %v3474_v61  ;;  %v818_v12 = vadd.f32 %v786_v52, %v717_v35  ;;  %v787_v22 = vmul.f32 %v3336_v27, %v3444_v11  ;;  %v988_v24 = vmul.f32 %v3359_v46, %v349_v9  ;;  %v386_v13 = vmul.f32 %v3286_v1, %v350_v54  ;;  %v451_v35 = vld [vmem:[#allocation2 + $0x110] sm:$0xff]  ;;  %v1461_v19 = vld [vmem:[#allocation2 + $0x125] sm:$0xff] }
  0x81   : > { %5396 = vst [vmem:[#allocation6_spill] sm:$0xff] %v3480_v17  ;;  %v618_v53 = vadd.f32 %v586_v3, %v517_v44  ;;  %v487_v25 = vmul.f32 %v3291_v2, %v450_v60  ;;  %v1120_v26 = vadd.f32 %v1088_v49, %v1019_v59  ;;  %v3489_v30 = vmul.f32 %v3398_v16, %v1457_v62  ;;  %v551_v48 = vld [vmem:[#allocation2 + $0x109] sm:$0xff] }
  0x82   : > { %v587_v31 = vmul.f32 %v3310_v10, %v550_v0  ;;  %v887_v32 = vmul.f32 %v3354_v45, %v549_v40  ;;  %v819_v36 = vadd.f32 %v787_v22, %v718_v7  ;;  %v888_v37 = vmul.f32 %v3354_v45, %v550_v0  ;;  %v1257_v49 = vld [vmem:[#allocation2 + $0x103] sm:$0xff] }
  0x83   : > { %5397 = vst [vmem:[#allocation7_spill] sm:$0xff] %v3489_v30  ;;  %v1020_v38 = vadd.f32 %v988_v24, %v918_v50  ;;  %v687_v9 = vmul.f32 %v3328_v23, %v350_v54  ;;  %v1089_v44 = vmul.f32 %v3366_v55, %v3444_v11  ;;  %v1189_v47 = vmul.f32 %v3384_v6, %v549_v40  ;;  %v352_v24 = vld [vmem:[#allocation2 + $0x127] sm:$0xff] }
  0x84   : > { %v619_v39 = vadd.f32 %v587_v31, %v518_v21  ;;  %v919_v43 = vadd.f32 %v887_v32, %v818_v12  ;;  %v519_v52 = vadd.f32 %v487_v25, %v386_v13  ;;  %v387_v62 = vmul.f32 %v3286_v1, %v351_v34  ;;  %v1358_v12 = vld [vmem:[#allocation2 + $0x104] sm:$0xff] }
  0x85   : > { %v719_v59 = vadd.f32 %v687_v9, %v618_v53  ;;  %v488_v3 = vmul.f32 %v3291_v2, %v451_v35  ;;  %v3501_v7 = vmul.f32 %v3384_v6, %v550_v0  ;;  %v3503_v50 = vadd.f32 %v1189_v47, %v1120_v26  ;;  %v452_v13 = vld [vmem:[#allocation2 + $0x128] sm:$0xff] }
  0x86   : > { %v989_v8 = vmul.f32 %v3359_v46, %v350_v54  ;;  %v688_v11 = vmul.f32 %v3328_v23, %v351_v34  ;;  %v920_v21 = vadd.f32 %v888_v37, %v819_v36  ;;  %v3507_v40 = vadd.f32 %v1089_v44, %v1020_v38  ;;  %v1459_v31 = vld [vmem:[#allocation2 + $0x105] sm:$0xff]  ;;  %v552_v54 = vld [vmem:[#allocation2 + $0x111] sm:$0xff] }
  0x87   : > { %v788_v22 = vmul.f32 %v3336_v27, %v450_v60  ;;  %v588_v53 = vmul.f32 %v3310_v10, %v551_v48  ;;  %v1090_v0 = vmul.f32 %v3366_v55, %v450_v60  ;;  %v3513_v26 = vmul.f32 %v3371_v63, %v1257_v49 }
  0x88   : > { %v1021_v25 = vadd.f32 %v989_v8, %v919_v43  ;;  %v720_v32 = vadd.f32 %v688_v11, %v619_v39  ;;  %v3516_v36 = vmul.f32 %v3393_v15, %v1358_v12  ;;  %v520_v37 = vadd.f32 %v488_v3, %v387_v62  ;;  %v353_v62 = vld [vmem:[#allocation2 + $0x12f] sm:$0xff] }
  0x89   : > { %5398 = vst [vmem:[#allocation8_spill] sm:$0xff] %v3513_v26  ;;  %v820_v9 = vadd.f32 %v788_v22, %v719_v59  ;;  %v620_v38 = vadd.f32 %v588_v53, %v519_v52  ;;  %v789_v44 = vmul.f32 %v3336_v27, %v451_v35  ;;  %v990_v47 = vmul.f32 %v3359_v46, %v351_v34  ;;  %v453_v3 = vld [vmem:[#allocation2 + $0x130] sm:$0xff] }
  0x8a   : > { %5399 = vst [vmem:[#allocation9_spill] sm:$0xff] %v3516_v36  ;;  %v388_v43 = vmul.f32 %v3286_v1, %v352_v24  ;;  %v489_v60 = vmul.f32 %v3291_v2, %v452_v13  ;;  %v3523_v49 = vmul.f32 %v3398_v16, %v1459_v31  ;;  %v589_v39 = vmul.f32 %v3310_v10, %v552_v54  ;;  %v553_v22 = vld [vmem:[#allocation2 + $0x129] sm:$0xff] }
  0x8b   : > { %v889_v59 = vmul.f32 %v3354_v45, %v551_v48  ;;  %v689_v52 = vmul.f32 %v3328_v23, %v352_v24  ;;  %v1122_v8 = vadd.f32 %v1090_v0, %v1021_v25  ;;  %v821_v34 = vadd.f32 %v789_v44, %v720_v32  ;;  %v293_v36 = vld [vmem:[%s3298_s21 + $0x88] sm:$0xff]  ;;  %v294_v26 = vld [vmem:[%s3298_s21 + $0x90] sm:$0xff] }
  0x8c   : > { %5400 = vst [vmem:[#allocation10_spill] sm:$0xff] %v3523_v49  ;;  %v890_v12 = vmul.f32 %v3354_v45, %v552_v54  ;;  %v1022_v11 = vadd.f32 %v990_v47, %v920_v21  ;;  %v621_v53 = vadd.f32 %v589_v39, %v520_v37  ;;  %v1091_v31 = vmul.f32 %v3366_v55, %v451_v35  ;;  %v1259_v32 = vld [vmem:[#allocation2 + $0x123] sm:$0xff]  ;;  %v554_v47 = vld [vmem:[#allocation2 + $0x131] sm:$0xff] }
  0x8d   : > { %v921_v28 = vadd.f32 %v889_v59, %v820_v9  ;;  %v721_v49 = vadd.f32 %v689_v52, %v620_v38  ;;  %v1191_v30 = vmul.f32 %v3384_v6, %v551_v48  ;;  %v521_v17 = vadd.f32 %v489_v60, %v388_v43  ;;  %v1360_v9 = vld [vmem:[#allocation2 + $0x124] sm:$0xff]  ;;  %326 = vst.msk [vmem:[#allocation2 + $0x1b0] sm:$0xff] %vm171_vm0, %v293_v36 }
  0x8e   : > { %v389_v61 = vmul.f32 %v3286_v1, %v353_v62  ;;  %v490_v25 = vmul.f32 %v3291_v2, %v453_v3  ;;  %v3538_v21 = vmul.f32 %v3384_v6, %v552_v54  ;;  %v790_v0 = vmul.f32 %v3336_v27, %v452_v13  ;;  %327 = vst.msk [vmem:[#allocation2 + $0x1c8] sm:$0xff] %vm171_vm0, %v294_v26  ;;  %v354_v59 = vld [vmem:[#allocation2 + $0x147] sm:$0xff] }
  0x8f   : > { %v991_v35 = vmul.f32 %v3359_v46, %v352_v24  ;;  %v690_v37 = vmul.f32 %v3328_v23, %v353_v62  ;;  %v922_v48 = vadd.f32 %v890_v12, %v821_v34  ;;  %v3544_v38 = vadd.f32 %v1091_v31, %v1022_v11  ;;  %v454_v52 = vld [vmem:[#allocation2 + $0x148] sm:$0xff]  ;;  %v455_v31 = vld [vmem:[#allocation2 + $0x150] sm:$0xff] }
  0x90   : > { %5401 = vst [vmem:[#allocation11_spill] sm:$0xff] %v3538_v21  ;;  %v3546_v44 = vadd.f32 %v1191_v30, %v1122_v8  ;;  %v590_v54 = vmul.f32 %v3310_v10, %v553_v22  ;;  %v822_v43 = vadd.f32 %v790_v0, %v721_v49  ;;  %v1092_v60 = vmul.f32 %v3366_v55, %v452_v13  ;;  %v295_v21 = vld [vmem:[%s3298_s21 + $0x98] sm:$0xff] }
  0x91   : > { %v1023_v24 = vadd.f32 %v991_v35, %v921_v28  ;;  %v722_v39 = vadd.f32 %v690_v37, %v621_v53  ;;  %v3553_v36 = vmul.f32 %v3371_v63, %v1259_v32  ;;  %v3556_v30 = vmul.f32 %v3393_v15, %v1360_v9  ;;  %328 = vst.msk [vmem:[#allocation2 + $0x1d0] sm:$0xff] %vm171_vm0, %v295_v21 }
  0x92   : > { %5402 = vst [vmem:[#allocation12_spill] sm:$0xff] %v3546_v44  ;;  %v522_v8 = vadd.f32 %v490_v25, %v389_v61  ;;  %v622_v34 = vadd.f32 %v590_v54, %v521_v17  ;;  %v3560_v26 = vmul.f32 %v3398_v16, %v1461_v19  ;;  %v791_v28 = vmul.f32 %v3336_v27, %v453_v3  ;;  %v355_v17 = vld [vmem:[#allocation2 + $0x14f] sm:$0xff] }
  0x93   : > { %5403 = vst [vmem:[#allocation13_spill] sm:$0xff] %v3553_v36  ;;  %v891_v13 = vmul.f32 %v3354_v45, %v553_v22  ;;  %v992_v49 = vmul.f32 %v3359_v46, %v353_v62  ;;  %v591_v12 = vmul.f32 %v3310_v10, %v554_v47  ;;  %v390_v11 = vmul.f32 %v3286_v1, %v354_v59  ;;  %v555_v36 = vld [vmem:[#allocation2 + $0x149] sm:$0xff] }
  0x94   : > { %5404 = vst [vmem:[#allocation14_spill] sm:$0xff] %v3556_v30  ;;  %v491_v53 = vmul.f32 %v3291_v2, %v454_v52  ;;  %v691_v61 = vmul.f32 %v3328_v23, %v354_v59  ;;  %v1124_v25 = vadd.f32 %v1092_v60, %v1023_v24  ;;  %v823_v21 = vadd.f32 %v791_v28, %v722_v39  ;;  %v1261_v60 = vld [vmem:[#allocation2 + $0x143] sm:$0xff] }
  0x95   : > { %5405 = vst [vmem:[#allocation15_spill] sm:$0xff] %v3560_v26  ;;  %v923_v0 = vadd.f32 %v891_v13, %v822_v43  ;;  %v1024_v35 = vadd.f32 %v992_v49, %v922_v48  ;;  %v623_v32 = vadd.f32 %v591_v12, %v522_v8  ;;  %v892_v9 = vmul.f32 %v3354_v45, %v554_v47  ;;  %v1362_v39 = vld [vmem:[#allocation2 + $0x144] sm:$0xff]  ;;  %v556_v49 = vld [vmem:[#allocation2 + $0x151] sm:$0xff] }
  0x96   : > { %v1093_v37 = vmul.f32 %v3366_v55, %v453_v3  ;;  %v723_v62 = vadd.f32 %v691_v61, %v622_v34  ;;  %v1193_v19 = vmul.f32 %v3384_v6, %v553_v22  ;;  %v993_v54 = vmul.f32 %v3359_v46, %v354_v59  ;;  %v1463_v8 = vld [vmem:[#allocation2 + $0x145] sm:$0xff] }
  0x97   : > { %v391_v26 = vmul.f32 %v3286_v1, %v355_v17  ;;  %v492_v30 = vmul.f32 %v3291_v2, %v455_v31  ;;  %v3576_v24 = vmul.f32 %v3384_v6, %v554_v47  ;;  %v523_v43 = vadd.f32 %v491_v53, %v390_v11  ;;  %v356_v53 = vld [vmem:[#allocation2 + $0x167] sm:$0xff] }
  0x98   : > { %v792_v48 = vmul.f32 %v3336_v27, %v454_v52  ;;  %v692_v3 = vmul.f32 %v3328_v23, %v355_v17  ;;  %v924_v34 = vadd.f32 %v892_v9, %v823_v21  ;;  %v3580_v22 = vadd.f32 %v1093_v37, %v1024_v35  ;;  %v456_v61 = vld [vmem:[#allocation2 + $0x168] sm:$0xff] }
  0x99   : > { %5406 = vst [vmem:[#allocation16_spill] sm:$0xff] %v3576_v24  ;;  %v3582_v59 = vadd.f32 %v1193_v19, %v1124_v25  ;;  %v1025_v28 = vadd.f32 %v993_v54, %v923_v0  ;;  %v1094_v47 = vmul.f32 %v3366_v55, %v454_v52  ;;  %v592_v12 = vmul.f32 %v3310_v10, %v555_v36 }
  0x9a   : > { %5407 = vst [vmem:[#allocation17_spill] sm:$0xff] %v3580_v22  ;;  %v824_v13 = vadd.f32 %v792_v48, %v723_v62  ;;  %v724_v11 = vadd.f32 %v692_v3, %v623_v32  ;;  %v3587_v24 = vmul.f32 %v3371_v63, %v1261_v60  ;;  %v3590_v21 = vmul.f32 %v3393_v15, %v1362_v39  ;;  %v296_v32 = vld [vmem:[%s3298_s21 + $0xa0] sm:$0xff]  ;;  %v297_v62 = vld [vmem:[%s3298_s21 + $0xa8] sm:$0xff] }
  0x9b   : > { %5408 = vst [vmem:[#allocation18_spill] sm:$0xff] %v3582_v59  ;;  %v3593_v25 = vmul.f32 %v3398_v16, %v1463_v8  ;;  %v524_v0 = vadd.f32 %v492_v30, %v391_v26  ;;  %v624_v35 = vadd.f32 %v592_v12, %v523_v43  ;;  %v793_v9 = vmul.f32 %v3336_v27, %v455_v31  ;;  %v357_v39 = vld [vmem:[#allocation2 + $0x16f] sm:$0xff]  ;;  %v1263_v59 = vld [vmem:[#allocation2 + $0x163] sm:$0xff] }
  0x9c   : > { %5409 = vst [vmem:[#allocation19_spill] sm:$0xff] %v3587_v24  ;;  %v893_v52 = vmul.f32 %v3354_v45, %v555_v36  ;;  %v994_v37 = vmul.f32 %v3359_v46, %v355_v17  ;;  %v1126_v19 = vadd.f32 %v1094_v47, %v1025_v28  ;;  %v593_v54 = vmul.f32 %v3310_v10, %v556_v49  ;;  %v457_v8 = vld [vmem:[#allocation2 + $0x170] sm:$0xff] }
  0x9d   : > { %5410 = vst [vmem:[#allocation20_spill] sm:$0xff] %v3590_v21  ;;  %v392_v48 = vmul.f32 %v3286_v1, %v356_v53  ;;  %v493_v60 = vmul.f32 %v3291_v2, %v456_v61  ;;  %v825_v30 = vadd.f32 %v793_v9, %v724_v11  ;;  %v693_v3 = vmul.f32 %v3328_v23, %v356_v53 }
  0x9e   : > { %5411 = vst [vmem:[#allocation21_spill] sm:$0xff] %v3593_v25  ;;  %v925_v26 = vadd.f32 %v893_v52, %v824_v13  ;;  %v1026_v43 = vadd.f32 %v994_v37, %v924_v34  ;;  %v625_v17 = vadd.f32 %v593_v54, %v524_v0  ;;  %v894_v28 = vmul.f32 %v3354_v45, %v556_v49  ;;  %v298_v25 = vld [vmem:[%s3298_s21 + $0xb0] sm:$0xff]  ;;  %v458_v54 = vld [vmem:[#allocation2 + $0x188] sm:$0xff] }
  0x9f   : > { %329 = vst.msk [vmem:[#allocation2 + $0x1e8] sm:$0xff] %vm171_vm0, %v296_v32  ;;  %v1095_v47 = vmul.f32 %v3366_v55, %v455_v31  ;;  %v1195_v12 = vmul.f32 %v3384_v6, %v555_v36  ;;  %v725_v21 = vadd.f32 %v693_v3, %v624_v35  ;;  %v995_v24 = vmul.f32 %v3359_v46, %v356_v53  ;;  %v557_v13 = vld [vmem:[#allocation2 + $0x169] sm:$0xff]  ;;  %v558_v3 = vld [vmem:[#allocation2 + $0x171] sm:$0xff] }
  0xa0   : > { %330 = vst.msk [vmem:[#allocation2 + $0x1f0] sm:$0xff] %vm171_vm0, %v297_v62  ;;  %v393_v11 = vmul.f32 %v3286_v1, %v357_v39  ;;  %v494_v34 = vmul.f32 %v3291_v2, %v457_v8  ;;  %v3615_v0 = vmul.f32 %v3384_v6, %v556_v49  ;;  %v525_v31 = vadd.f32 %v493_v60, %v392_v48  ;;  %v1364_v36 = vld [vmem:[#allocation2 + $0x164] sm:$0xff] }
  0xa1   : > { %331 = vst.msk [vmem:[#allocation2 + $0x208] sm:$0xff] %vm171_vm0, %v298_v25  ;;  %v3617_v9 = vadd.f32 %v1195_v12, %v1126_v19  ;;  %v694_v35 = vmul.f32 %v3328_v23, %v357_v39  ;;  %v926_v52 = vadd.f32 %v894_v28, %v825_v30  ;;  %v3620_v53 = vadd.f32 %v1095_v47, %v1026_v43  ;;  %v358_v62 = vld [vmem:[#allocation2 + $0x187] sm:$0xff]  ;;  %v299_v12 = vld [vmem:[%s3298_s21 + $0xb8] sm:$0xff] }
  0xa2   : > { %5412 = vst [vmem:[#allocation22_spill] sm:$0xff] %v3615_v0  ;;  %v794_v37 = vmul.f32 %v3336_v27, %v456_v61  ;;  %v1027_v32 = vadd.f32 %v995_v24, %v925_v26  ;;  %v1096_v25 = vmul.f32 %v3366_v55, %v456_v61  ;;  %v3625_v49 = vmul.f32 %v3371_v63, %v1263_v59  ;;  %v1465_v19 = vld [vmem:[#allocation2 + $0x165] sm:$0xff] }
  0xa3   : > { %5413 = vst [vmem:[#allocation23_spill] sm:$0xff] %v3617_v9  ;;  %v594_v48 = vmul.f32 %v3310_v10, %v557_v13  ;;  %v726_v60 = vadd.f32 %v694_v35, %v625_v17  ;;  %v3630_v30 = vmul.f32 %v3393_v15, %v1364_v36  ;;  %v526_v43 = vadd.f32 %v494_v34, %v393_v11  ;;  %v359_v34 = vld [vmem:[#allocation2 + $0x18f] sm:$0xff]  ;;  %v1265_v0 = vld [vmem:[#allocation2 + $0x183] sm:$0xff] }
  0xa4   : > { %5414 = vst [vmem:[#allocation24_spill] sm:$0xff] %v3620_v53  ;;  %v826_v9 = vadd.f32 %v794_v37, %v725_v21  ;;  %v795_v24 = vmul.f32 %v3336_v27, %v457_v8  ;;  %v996_v61 = vmul.f32 %v3359_v46, %v357_v39  ;;  %v394_v59 = vmul.f32 %v3286_v1, %v358_v62  ;;  %v459_v36 = vld [vmem:[#allocation2 + $0x190] sm:$0xff] }
  0xa5   : > { %5415 = vst [vmem:[#allocation25_spill] sm:$0xff] %v3625_v49  ;;  %v626_v26 = vadd.f32 %v594_v48, %v525_v31  ;;  %v495_v28 = vmul.f32 %v3291_v2, %v458_v54  ;;  %v1128_v47 = vadd.f32 %v1096_v25, %v1027_v32  ;;  %v3638_v17 = vmul.f32 %v3398_v16, %v1465_v19  ;;  %v559_v25 = vld [vmem:[#allocation2 + $0x189] sm:$0xff]  ;;  %v300_v19 = vld [vmem:[%s3298_s21 + $0xc0] sm:$0xff] }
  0xa6   : > { %5416 = vst [vmem:[#allocation26_spill] sm:$0xff] %v3630_v30  ;;  %v595_v21 = vmul.f32 %v3310_v10, %v558_v3  ;;  %v895_v11 = vmul.f32 %v3354_v45, %v557_v13  ;;  %v827_v35 = vadd.f32 %v795_v24, %v726_v60  ;;  %v896_v31 = vmul.f32 %v3354_v45, %v558_v3 }
  0xa7   : > { %332 = vst.msk [vmem:[#allocation2 + $0x210] sm:$0xff] %vm171_vm0, %v299_v12  ;;  %v1028_v37 = vadd.f32 %v996_v61, %v926_v52  ;;  %v695_v39 = vmul.f32 %v3328_v23, %v358_v62  ;;  %v1097_v30 = vmul.f32 %v3366_v55, %v457_v8  ;;  %v1197_v32 = vmul.f32 %v3384_v6, %v557_v13  ;;  %v1366_v13 = vld [vmem:[#allocation2 + $0x184] sm:$0xff] }
  0xa8   : > { %5417 = vst [vmem:[#allocation27_spill] sm:$0xff] %v3638_v17  ;;  %v627_v48 = vadd.f32 %v595_v21, %v526_v43  ;;  %v927_v12 = vadd.f32 %v895_v11, %v826_v9  ;;  %v527_v17 = vadd.f32 %v495_v28, %v394_v59  ;;  %v395_v53 = vmul.f32 %v3286_v1, %v359_v34  ;;  %v360_v28 = vld [vmem:[#allocation2 + $0x1a7] sm:$0xff] }
  0xa9   : > { %v727_v49 = vadd.f32 %v695_v39, %v626_v26  ;;  %v496_v60 = vmul.f32 %v3291_v2, %v459_v36  ;;  %333 = vst.msk [vmem:[#allocation2 + $0x228] sm:$0xff] %vm171_vm0, %v300_v19  ;;  %v3651_v52 = vmul.f32 %v3384_v6, %v558_v3  ;;  %v3653_v43 = vadd.f32 %v1197_v32, %v1128_v47  ;;  %v460_v21 = vld [vmem:[#allocation2 + $0x1a8] sm:$0xff] }
  0xaa   : > { %v997_v8 = vmul.f32 %v3359_v46, %v358_v62  ;;  %v696_v9 = vmul.f32 %v3328_v23, %v359_v34  ;;  %v928_v24 = vadd.f32 %v896_v31, %v827_v35  ;;  %v3657_v26 = vadd.f32 %v1097_v30, %v1028_v37  ;;  %v1467_v39 = vld [vmem:[#allocation2 + $0x185] sm:$0xff]  ;;  %v560_v62 = vld [vmem:[#allocation2 + $0x191] sm:$0xff] }
  0xab   : > { %5418 = vst [vmem:[#allocation28_spill] sm:$0xff] %v3651_v52  ;;  %v796_v61 = vmul.f32 %v3336_v27, %v458_v54  ;;  %v596_v59 = vmul.f32 %v3310_v10, %v559_v25  ;;  %v1098_v3 = vmul.f32 %v3366_v55, %v458_v54  ;;  %v3663_v47 = vmul.f32 %v3371_v63, %v1265_v0  ;;  %v301_v19 = vld [vmem:[%s3298_s21 + $0xc8] sm:$0xff] }
  0xac   : > { %5419 = vst [vmem:[#allocation29_spill] sm:$0xff] %v3653_v43  ;;  %v1029_v11 = vadd.f32 %v997_v8, %v927_v12  ;;  %v728_v32 = vadd.f32 %v696_v9, %v627_v48  ;;  %v3667_v30 = vmul.f32 %v3393_v15, %v1366_v13  ;;  %v528_v35 = vadd.f32 %v496_v60, %v395_v53  ;;  %v3680_v60 = vld [vmem:[#allocation2 + $0x1b0] sm:$0xff] }
  0xad   : > { %5420 = vst [vmem:[#allocation30_spill] sm:$0xff] %v3657_v26  ;;  %v828_v43 = vadd.f32 %v796_v61, %v727_v49  ;;  %v628_v31 = vadd.f32 %v596_v59, %v527_v17  ;;  %v797_v37 = vmul.f32 %v3336_v27, %v459_v36  ;;  %v998_v12 = vmul.f32 %v3359_v46, %v359_v34  ;;  %v361_v17 = vld [vmem:[#allocation2 + $0x1af] sm:$0xff] }
  0xae   : > { %5421 = vst [vmem:[#allocation31_spill] sm:$0xff] %v3663_v47  ;;  %v396_v54 = vmul.f32 %v3286_v1, %v360_v28  ;;  %v497_v0 = vmul.f32 %v3291_v2, %v460_v21  ;;  %v3675_v48 = vmul.f32 %v3398_v16, %v1467_v39  ;;  %v597_v49 = vmul.f32 %v3310_v10, %v560_v62  ;;  %v302_v47 = vld [vmem:[%s3298_s21 + $0xd0] sm:$0xff] }
  0xaf   : > { %5422 = vst [vmem:[#allocation32_spill] sm:$0xff] %v3667_v30  ;;  %v897_v8 = vmul.f32 %v3354_v45, %v559_v25  ;;  %v697_v53 = vmul.f32 %v3328_v23, %v360_v28  ;;  %v1130_v13 = vadd.f32 %v1098_v3, %v1029_v11  ;;  %v829_v9 = vadd.f32 %v797_v37, %v728_v32  ;;  %v1368_v37 = vld [vmem:[#allocation2 + $0x1a4] sm:$0xff] }
  0xb0   : > { %334 = vst.msk [vmem:[#allocation2 + $0x230] sm:$0xff] %vm171_vm0, %v301_v19  ;;  %v898_v34 = vmul.f32 %v3354_v45, %v560_v62  ;;  %v1030_v61 = vadd.f32 %v998_v12, %v928_v24  ;;  %v629_v59 = vadd.f32 %v597_v49, %v528_v35  ;;  %v1099_v30 = vmul.f32 %v3366_v55, %v459_v36  ;;  %v1267_v24 = vld [vmem:[#allocation2 + $0x1a3] sm:$0xff] }
  0xb1   : > { %5423 = vst [vmem:[#allocation33_spill] sm:$0xff] %v3675_v48  ;;  %v929_v19 = vadd.f32 %v897_v8, %v828_v43  ;;  %v729_v39 = vadd.f32 %v697_v53, %v628_v31  ;;  %v561_v48 = vld [vmem:[#allocation2 + $0x1a9] sm:$0xff]  ;;  %v1199_v52 = vmul.f32 %v3384_v6, %v559_v25  ;;  %v529_v26 = vadd.f32 %v497_v0, %v396_v54  ;;  %v303_v53 = vld [vmem:[%s3298_s21 + $0xd8] sm:$0xff] }
  0xb2   : > { %v397_v22 = vmul.f32 %v3286_v1, %v361_v17  ;;  %v498_v44 = vmul.f32 %v3291_v2, %v3680_v60  ;;  %335 = vst.msk [vmem:[#allocation2 + $0x248] sm:$0xff] %vm171_vm0, %v302_v47  ;;  %v3691_v11 = vmul.f32 %v3384_v6, %v560_v62  ;;  %v798_v43 = vmul.f32 %v3336_v27, %v460_v21  ;;  %v362_v25 = vld [vmem:[#allocation2 + $0x1c7] sm:$0xff] }
  0xb3   : > { %v999_v36 = vmul.f32 %v3359_v46, %v360_v28  ;;  %v698_v3 = vmul.f32 %v3328_v23, %v361_v17  ;;  %v930_v32 = vadd.f32 %v898_v34, %v829_v9  ;;  %v3696_v35 = vadd.f32 %v1099_v30, %v1030_v61  ;;  %v462_v12 = vld [vmem:[#allocation2 + $0x1c8] sm:$0xff]  ;;  %v562_v28 = vld [vmem:[#allocation2 + $0x1b1] sm:$0xff]  ;;  %336 = vst.msk [vmem:[#allocation2 + $0x250] sm:$0xff] %vm171_vm0, %v303_v53 }
  0xb4   : > { %5424 = vst [vmem:[#allocation34_spill] sm:$0xff] %v3691_v11  ;;  %v3698_v31 = vadd.f32 %v1199_v52, %v1130_v13  ;;  %v598_v47 = vmul.f32 %v3310_v10, %v561_v48  ;;  %v830_v62 = vadd.f32 %v798_v43, %v729_v39  ;;  %v1100_v0 = vmul.f32 %v3366_v55, %v460_v21  ;;  %v1469_v49 = vld [vmem:[#allocation2 + $0x1a5] sm:$0xff]  ;;  %v3721_v39 = vld [vmem:[#allocation2 + $0x1d0] sm:$0xff] }
  0xb5   : > { %5425 = vst [vmem:[#allocation35_spill] sm:$0xff] %v3696_v35  ;;  %v1031_v54 = vadd.f32 %v999_v36, %v929_v19  ;;  %v730_v8 = vadd.f32 %v698_v3, %v629_v59  ;;  %v3704_v11 = vmul.f32 %v3371_v63, %v1267_v24  ;;  %v530_v9 = vadd.f32 %v498_v44, %v397_v22  ;;  %v363_v19 = vld [vmem:[#allocation2 + $0x1cf] sm:$0xff] }
  0xb6   : > { %5426 = vst [vmem:[#allocation36_spill] sm:$0xff] %v3698_v31  ;;  %v630_v30 = vadd.f32 %v598_v47, %v529_v26  ;;  %v398_v52 = vmul.f32 %v3286_v1, %v362_v25  ;;  %v3709_v13 = vmul.f32 %v3393_v15, %v1368_v37  ;;  %v799_v34 = vmul.f32 %v3336_v27, %v3680_v60  ;;  %v563_v37 = vld [vmem:[#allocation2 + $0x1c9] sm:$0xff] }
  0xb7   : > { %5427 = vst [vmem:[#allocation37_spill] sm:$0xff] %v3704_v11  ;;  %v899_v21 = vmul.f32 %v3354_v45, %v561_v48  ;;  %v499_v61 = vmul.f32 %v3291_v2, %v462_v12  ;;  %v3716_v59 = vmul.f32 %v3398_v16, %v1469_v49  ;;  %v599_v44 = vmul.f32 %v3310_v10, %v562_v28 }
  0xb8   : > { %5428 = vst [vmem:[#allocation38_spill] sm:$0xff] %v3709_v13  ;;  %v1000_v22 = vmul.f32 %v3359_v46, %v361_v17  ;;  %v699_v26 = vmul.f32 %v3328_v23, %v362_v25  ;;  %v1132_v43 = vadd.f32 %v1100_v0, %v1031_v54  ;;  %v831_v36 = vadd.f32 %v799_v34, %v730_v8  ;;  %v1370_v34 = vld [vmem:[#allocation2 + $0x1c4] sm:$0xff] }
  0xb9   : > { %5429 = vst [vmem:[#allocation39_spill] sm:$0xff] %v3716_v59  ;;  %v900_v24 = vmul.f32 %v3354_v45, %v562_v28  ;;  %v931_v3 = vadd.f32 %v899_v21, %v830_v62  ;;  %v631_v47 = vadd.f32 %v599_v44, %v530_v9  ;;  %v531_v13 = vadd.f32 %v499_v61, %v398_v52  ;;  %v304_v59 = vld [vmem:[%s3298_s21 + $0xe0] sm:$0xff]  ;;  %v305_v44 = vld [vmem:[%s3298_s21 + $0xe8] sm:$0xff] }
  0xba   : > { %v1032_v53 = vadd.f32 %v1000_v22, %v930_v32  ;;  %v731_v49 = vadd.f32 %v699_v26, %v630_v30  ;;  %v1201_v11 = vmul.f32 %v3384_v6, %v561_v48  ;;  %v1001_v17 = vmul.f32 %v3359_v46, %v362_v25  ;;  %337 = vst.msk [vmem:[#allocation2 + $0x268] sm:$0xff] %vm171_vm0, %v304_v59  ;;  %v1269_v32 = vld [vmem:[#allocation2 + $0x1c3] sm:$0xff]  ;;  %v564_v26 = vld [vmem:[#allocation2 + $0x1d1] sm:$0xff] }
  0xbb   : > { %v399_v31 = vmul.f32 %v3286_v1, %v363_v19  ;;  %v500_v35 = vmul.f32 %v3291_v2, %v3721_v39  ;;  %v1101_v62 = vmul.f32 %v3366_v55, %v3680_v60  ;;  %v800_v54 = vmul.f32 %v3336_v27, %v462_v12  ;;  %v364_v9 = vld [vmem:[#allocation2 + $0x1e7] sm:$0xff]  ;;  %338 = vst.msk [vmem:[#allocation2 + $0x270] sm:$0xff] %vm171_vm0, %v305_v44 }
  0xbc   : > { %v600_v0 = vmul.f32 %v3310_v10, %v563_v37  ;;  %v700_v48 = vmul.f32 %v3328_v23, %v363_v19  ;;  %v932_v8 = vadd.f32 %v900_v24, %v831_v36  ;;  %v3737_v25 = vmul.f32 %v3384_v6, %v562_v28  ;;  %v464_v30 = vld [vmem:[#allocation2 + $0x1e8] sm:$0xff]  ;;  %v3765_v24 = vld [vmem:[#allocation2 + $0x1f0] sm:$0xff] }
  0xbd   : > { %v3739_v1 = vadd.f32 %v1201_v11, %v1132_v43  ;;  %v1033_v2 = vadd.f32 %v1001_v17, %v931_v3  ;;  %v3741_v52 = vadd.f32 %v1101_v62, %v1032_v53  ;;  %v832_v60 = vadd.f32 %v800_v54, %v731_v49  ;;  %v1471_v21 = vld [vmem:[#allocation2 + $0x1c5] sm:$0xff]  ;;  %v3777_v17 = vld [vmem:[%s5386_s1 + $0x2] ss:$0 sm:$0xff] }
  0xbe   : > { %5430 = vst [vmem:[#allocation40_spill] sm:$0xff] %v3737_v25  ;;  %v632_v61 = vadd.f32 %v600_v0, %v531_v13  ;;  %v732_v59 = vadd.f32 %v700_v48, %v631_v47  ;;  %v1102_v10 = vmul.f32 %v3366_v55, %v462_v12  ;;  %v3746_v22 = vmul.f32 %v3371_v63, %v1269_v32  ;;  %v3755_v13 = vld [vmem:[%s5386_s1] ss:$0 sm:$0xff]  ;;  %v3761_v12 = vld [vmem:[%s5386_s1 + $0x1] ss:$0 sm:$0xff] }
  0xbf   : > { %5431 = vst [vmem:[#allocation41_spill] sm:$0xff] %v3739_v1  ;;  %v532_v28 = vadd.f32 %v500_v35, %v399_v31  ;;  %v801_v11 = vmul.f32 %v3336_v27, %v3721_v39  ;;  %v901_v43 = vmul.f32 %v3354_v45, %v563_v37  ;;  %v400_v36 = vmul.f32 %v3755_v13, %v364_v9  ;;  %v365_v31 = vld [vmem:[#allocation2 + $0x1ef] sm:$0xff] }
  0xc0   : > { %5432 = vst [vmem:[#allocation42_spill] sm:$0xff] %v3741_v52  ;;  %v501_v35 = vmul.f32 %v3761_v12, %v464_v30  ;;  %v701_v27 = vmul.f32 %v3328_v23, %v364_v9  ;;  %v1134_v3 = vadd.f32 %v1102_v10, %v1033_v2  ;;  %v3768_v47 = vmul.f32 %v3393_v15, %v1370_v34 }
  0xc1   : > { %5433 = vst [vmem:[#allocation43_spill] sm:$0xff] %v3746_v22  ;;  %v3771_v53 = vmul.f32 %v3398_v16, %v1471_v21  ;;  %v1002_v49 = vmul.f32 %v3359_v46, %v363_v19  ;;  %v601_v62 = vmul.f32 %v3777_v17, %v564_v26  ;;  %v833_v23 = vadd.f32 %v801_v11, %v732_v59  ;;  %v565_v21 = vld [vmem:[#allocation2 + $0x1e9] sm:$0xff] }
  0xc2   : > { %5434 = vst [vmem:[#allocation44_spill] sm:$0xff] %v3768_v47  ;;  %v933_v54 = vadd.f32 %v901_v43, %v832_v60  ;;  %v733_v32 = vadd.f32 %v701_v27, %v632_v61  ;;  %v1203_v48 = vmul.f32 %v3384_v6, %v563_v37  ;;  %v401_v2 = vmul.f32 %v3755_v13, %v365_v31  ;;  %v3803_v27 = vld [vmem:[%s5386_s1 + $0x3] ss:$0 sm:$0xff]  ;;  %v3816_v47 = vld [vmem:[%s5386_s1 + $0x5] ss:$0 sm:$0xff] }
  0xc3   : > { %5435 = vst [vmem:[#allocation45_spill] sm:$0xff] %v3771_v53  ;;  %v1034_v0 = vadd.f32 %v1002_v49, %v932_v8  ;;  %v502_v34 = vmul.f32 %v3761_v12, %v3765_v24  ;;  %v633_v19 = vadd.f32 %v601_v62, %v532_v28  ;;  %v902_v44 = vmul.f32 %v3354_v45, %v564_v26  ;;  %v3788_v53 = vld [vmem:[%s5386_s1 + $0x4] ss:$0 sm:$0xff] }
  0xc4   : > { %v533_v10 = vadd.f32 %v501_v35, %v400_v36  ;;  %v802_v60 = vmul.f32 %v3788_v53, %v464_v30  ;;  %v1103_v37 = vmul.f32 %v3366_v55, %v3721_v39  ;;  %v3794_v8 = vmul.f32 %v3384_v6, %v564_v26  ;;  %v1271_v45 = vld [vmem:[#allocation2 + $0x1e3] sm:$0xff]  ;;  %v566_v36 = vld [vmem:[#allocation2 + $0x1f1] sm:$0xff] }
  0xc5   : > { %v3796_v61 = vadd.f32 %v1203_v48, %v1134_v3  ;;  %v1003_v59 = vmul.f32 %v3359_v46, %v364_v9  ;;  %v1372_v28 = vld [vmem:[#allocation2 + $0x1e4] sm:$0xff]  ;;  %v934_v11 = vadd.f32 %v902_v44, %v833_v23  ;;  %v602_v35 = vmul.f32 %v3777_v17, %v565_v21  ;;  %v306_v23 = vld [vmem:[%s3298_s21 + $0xf0] sm:$0xff] }
  0xc6   : > { %5436 = vst [vmem:[#allocation46_spill] sm:$0xff] %v3794_v8  ;;  %v834_v43 = vadd.f32 %v802_v60, %v733_v32  ;;  %v702_v39 = vmul.f32 %v3803_v27, %v365_v31  ;;  %v366_v26 = vld [vmem:[#allocation2 + $0x207] sm:$0xff]  ;;  %v3806_v49 = vadd.f32 %v1103_v37, %v1034_v0  ;;  %v1104_v9 = vmul.f32 %v3366_v55, %v464_v30  ;;  %v367_v37 = vld [vmem:[#allocation2 + $0x20f] sm:$0xff] }
  0xc7   : > { %5437 = vst [vmem:[#allocation47_spill] sm:$0xff] %v3796_v61  ;;  %v466_v3 = vld [vmem:[#allocation2 + $0x208] sm:$0xff]  ;;  %v1035_v46 = vadd.f32 %v1003_v59, %v933_v54  ;;  %v534_v62 = vadd.f32 %v502_v34, %v401_v2  ;;  %v3811_v32 = vmul.f32 %v3371_v63, %v1271_v45  ;;  %v634_v44 = vadd.f32 %v602_v35, %v533_v10  ;;  %v307_v54 = vld [vmem:[%s3298_s21 + $0xf8] sm:$0xff]  ;;  %v467_v59 = vld [vmem:[#allocation2 + $0x210] sm:$0xff] }
  0xc8   : > { %5438 = vst [vmem:[#allocation48_spill] sm:$0xff] %v3806_v49  ;;  %v1473_v48 = vld [vmem:[#allocation2 + $0x1e5] sm:$0xff]  ;;  %v734_v60 = vadd.f32 %v702_v39, %v633_v19  ;;  %v903_v22 = vmul.f32 %v3816_v47, %v565_v21  ;;  %v3822_v55 = vmul.f32 %v3393_v15, %v1372_v28  ;;  %v603_v30 = vmul.f32 %v3777_v17, %v566_v36 }
  0xc9   : > { %5439 = vst [vmem:[#allocation49_spill] sm:$0xff] %v3811_v32  ;;  %v402_v63 = vmul.f32 %v3755_v13, %v366_v26  ;;  %v503_v0 = vmul.f32 %v3761_v12, %v466_v3  ;;  %v803_v2 = vmul.f32 %v3788_v53, %v3765_v24  ;;  %v3833_v19 = vld [vmem:[%s5386_s1 + $0x6] ss:$0 sm:$0xff]  ;;  %v703_v10 = vmul.f32 %v3803_v27, %v366_v26 }
  0xca   : > { %339 = vst.msk [vmem:[#allocation2 + $0x288] sm:$0xff] %vm171_vm0, %v306_v23  ;;  %v935_v34 = vadd.f32 %v903_v22, %v834_v43  ;;  %v1004_v15 = vmul.f32 %v3833_v19, %v365_v31  ;;  %v1136_v45 = vadd.f32 %v1104_v9, %v1035_v46  ;;  %v3838_v28 = vmul.f32 %v3398_v16, %v1473_v48  ;;  %v3849_v16 = vld [vmem:[%s5386_s1 + $0x7] ss:$0 sm:$0xff]  ;;  %v3857_v9 = vld [vmem:[%s5386_s1 + $0x8] ss:$0 sm:$0xff] }
  0xcb   : > { %5440 = vst [vmem:[#allocation50_spill] sm:$0xff] %v3822_v55  ;;  %v635_v35 = vadd.f32 %v603_v30, %v534_v62  ;;  %v1205_v39 = vmul.f32 %v3384_v6, %v565_v21  ;;  %v835_v23 = vadd.f32 %v803_v2, %v734_v60  ;;  %v735_v43 = vadd.f32 %v703_v10, %v634_v44  ;;  %v567_v55 = vld [vmem:[#allocation2 + $0x209] sm:$0xff]  ;;  %v568_v44 = vld [vmem:[#allocation2 + $0x211] sm:$0xff] }
  0xcc   : > { %340 = vst.msk [vmem:[#allocation2 + $0x290] sm:$0xff] %vm171_vm0, %v307_v54  ;;  %v1036_v22 = vadd.f32 %v1004_v15, %v934_v11  ;;  %v1005_v54 = vmul.f32 %v3833_v19, %v366_v26  ;;  %v535_v32 = vadd.f32 %v503_v0, %v402_v63  ;;  %v403_v31 = vmul.f32 %v3755_v13, %v367_v37  ;;  %v1273_v26 = vld [vmem:[#allocation2 + $0x203] sm:$0xff] }
  0xcd   : > { %5441 = vst [vmem:[#allocation51_spill] sm:$0xff] %v3838_v28  ;;  %v504_v61 = vmul.f32 %v3761_v12, %v467_v59  ;;  %v704_v8 = vmul.f32 %v3803_v27, %v367_v37  ;;  %v904_v46 = vmul.f32 %v3816_v47, %v566_v36  ;;  %v1105_v6 = vmul.f32 %v3849_v16, %v3765_v24  ;;  %v468_v15 = vld [vmem:[#allocation2 + $0x228] sm:$0xff] }
  0xce   : > { %v804_v21 = vmul.f32 %v3788_v53, %v466_v3  ;;  %v1037_v11 = vadd.f32 %v1005_v54, %v935_v34  ;;  %v3860_v62 = vmul.f32 %v3857_v9, %v566_v36  ;;  %v3862_v48 = vadd.f32 %v1205_v39, %v1136_v45  ;;  %v368_v34 = vld [vmem:[#allocation2 + $0x227] sm:$0xff] }
  0xcf   : > { %v604_v60 = vmul.f32 %v3777_v17, %v567_v55  ;;  %v736_v30 = vadd.f32 %v704_v8, %v635_v35  ;;  %v936_v63 = vadd.f32 %v904_v46, %v835_v23  ;;  %v3865_v24 = vadd.f32 %v1105_v6, %v1036_v22  ;;  %v3871_v10 = vld [vmem:[%s5386_s1 + $0x9] ss:$0 sm:$0xff] }
  0xd0   : > { %5442 = vst [vmem:[#allocation52_spill] sm:$0xff] %v3860_v62  ;;  %v836_v0 = vadd.f32 %v804_v21, %v735_v43  ;;  %v1106_v2 = vmul.f32 %v3849_v16, %v466_v3  ;;  %v3874_v36 = vmul.f32 %v3871_v10, %v1273_v26  ;;  %v1374_v45 = vld [vmem:[#allocation2 + $0x204] sm:$0xff]  ;;  %v536_v39 = vadd.f32 %v504_v61, %v403_v31  ;;  %v3927_v62 = vld [vmem:[#allocation2 + $0x250] sm:$0xff] }
  0xd1   : > { %5443 = vst [vmem:[#allocation53_spill] sm:$0xff] %v3862_v48  ;;  %v636_v54 = vadd.f32 %v604_v60, %v535_v32  ;;  %v805_v8 = vmul.f32 %v3788_v53, %v467_v59  ;;  %v1475_v23 = vld [vmem:[#allocation2 + $0x205] sm:$0xff]  ;;  %v605_v22 = vmul.f32 %v3777_v17, %v568_v44  ;;  %v905_v3 = vmul.f32 %v3816_v47, %v567_v55  ;;  %v469_v48 = vld [vmem:[#allocation2 + $0x230] sm:$0xff] }
  0xd2   : > { %5444 = vst [vmem:[#allocation54_spill] sm:$0xff] %v3865_v24  ;;  %v1138_v35 = vadd.f32 %v1106_v2, %v1037_v11  ;;  %v1006_v43 = vmul.f32 %v3833_v19, %v367_v37  ;;  %v404_v6 = vmul.f32 %v3755_v13, %v368_v34  ;;  %v505_v21 = vmul.f32 %v3761_v12, %v468_v15  ;;  %v3886_v61 = vld [vmem:[%s5386_s1 + $0xa] ss:$0 sm:$0xff]  ;;  %v369_v37 = vld [vmem:[#allocation2 + $0x22f] sm:$0xff] }
  0xd3   : > { %5445 = vst [vmem:[#allocation55_spill] sm:$0xff] %v3874_v36  ;;  %v837_v46 = vadd.f32 %v805_v8, %v736_v30  ;;  %v705_v26 = vmul.f32 %v3803_v27, %v368_v34  ;;  %v3889_v32 = vmul.f32 %v3886_v61, %v1374_v45  ;;  %v937_v31 = vadd.f32 %v905_v3, %v836_v0  ;;  %v3895_v30 = vld [vmem:[%s5386_s1 + $0xb] ss:$0 sm:$0xff] }
  0xd4   : > { %v1038_v11 = vadd.f32 %v1006_v43, %v936_v63  ;;  %v1207_v60 = vmul.f32 %v3857_v9, %v567_v55  ;;  %v3898_v2 = vmul.f32 %v3895_v30, %v1475_v23  ;;  %v637_v8 = vadd.f32 %v605_v22, %v536_v39  ;;  %v569_v3 = vld [vmem:[#allocation2 + $0x229] sm:$0xff] }
  0xd5   : > { %5446 = vst [vmem:[#allocation56_spill] sm:$0xff] %v3889_v32  ;;  %v906_v36 = vmul.f32 %v3816_v47, %v568_v44  ;;  %v737_v28 = vadd.f32 %v705_v26, %v636_v54  ;;  %v1107_v45 = vmul.f32 %v3849_v16, %v467_v59  ;;  %v3903_v63 = vmul.f32 %v3857_v9, %v568_v44  ;;  %v1376_v39 = vld [vmem:[#allocation2 + $0x224] sm:$0xff] }
  0xd6   : > { %5447 = vst [vmem:[#allocation57_spill] sm:$0xff] %v3898_v2  ;;  %v3905_v55 = vadd.f32 %v1207_v60, %v1138_v35  ;;  %v1007_v0 = vmul.f32 %v3833_v19, %v368_v34  ;;  %v537_v32 = vadd.f32 %v505_v21, %v404_v6  ;;  %v806_v23 = vmul.f32 %v3788_v53, %v468_v15  ;;  %v1275_v2 = vld [vmem:[#allocation2 + $0x223] sm:$0xff] }
  0xd7   : > { %5448 = vst [vmem:[#allocation58_spill] sm:$0xff] %v3903_v63  ;;  %v938_v43 = vadd.f32 %v906_v36, %v837_v46  ;;  %v706_v22 = vmul.f32 %v3803_v27, %v369_v37  ;;  %v370_v54 = vld [vmem:[#allocation2 + $0x247] sm:$0xff]  ;;  %v3910_v26 = vadd.f32 %v1107_v45, %v1038_v11  ;;  %v405_v44 = vmul.f32 %v3755_v13, %v369_v37  ;;  %v570_v46 = vld [vmem:[#allocation2 + $0x231] sm:$0xff] }
  0xd8   : > { %5449 = vst [vmem:[#allocation59_spill] sm:$0xff] %v3905_v55  ;;  %v1039_v59 = vadd.f32 %v1007_v0, %v937_v31  ;;  %v506_v35 = vmul.f32 %v3761_v12, %v469_v48  ;;  %v470_v60 = vld [vmem:[#allocation2 + $0x248] sm:$0xff]  ;;  %v838_v55 = vadd.f32 %v806_v23, %v737_v28  ;;  %v1108_v34 = vmul.f32 %v3849_v16, %v468_v15 }
  0xd9   : > { %5450 = vst [vmem:[#allocation60_spill] sm:$0xff] %v3910_v26  ;;  %v1477_v36 = vld [vmem:[#allocation2 + $0x225] sm:$0xff]  ;;  %v606_v6 = vmul.f32 %v3777_v17, %v569_v3  ;;  %v738_v21 = vadd.f32 %v706_v22, %v637_v8  ;;  %v3917_v63 = vmul.f32 %v3871_v10, %v1275_v2  ;;  %v3920_v11 = vmul.f32 %v3886_v61, %v1376_v39  ;;  %v371_v26 = vld [vmem:[#allocation2 + $0x24f] sm:$0xff] }
  0xda   : > { %v807_v31 = vmul.f32 %v3788_v53, %v469_v48  ;;  %v406_v45 = vmul.f32 %v3755_v13, %v370_v54  ;;  %v907_v28 = vmul.f32 %v3816_v47, %v569_v3  ;;  %v1008_v15 = vmul.f32 %v3833_v19, %v369_v37 }
  0xdb   : > { %5451 = vst [vmem:[#allocation61_spill] sm:$0xff] %v3917_v63  ;;  %v638_v0 = vadd.f32 %v606_v6, %v537_v32  ;;  %v507_v23 = vmul.f32 %v3761_v12, %v470_v60  ;;  %v1140_v8 = vadd.f32 %v1108_v34, %v1039_v59  ;;  %v3930_v2 = vmul.f32 %v3895_v30, %v1477_v36  ;;  %v571_v6 = vld [vmem:[#allocation2 + $0x249] sm:$0xff] }
  0xdc   : > { %5452 = vst [vmem:[#allocation62_spill] sm:$0xff] %v3920_v11  ;;  %v538_v39 = vadd.f32 %v506_v35, %v405_v44  ;;  %v607_v22 = vmul.f32 %v3777_v17, %v570_v46  ;;  %v839_v11 = vadd.f32 %v807_v31, %v738_v21  ;;  %v939_v63 = vadd.f32 %v907_v28, %v838_v55  ;;  %v1378_v31 = vld [vmem:[#allocation2 + $0x244] sm:$0xff] }
  0xdd   : > { %5453 = vst [vmem:[#allocation63_spill] sm:$0xff] %v3930_v2  ;;  %v1040_v24 = vadd.f32 %v1008_v15, %v938_v43  ;;  %v707_v32 = vmul.f32 %v3803_v27, %v370_v54  ;;  %v1209_v37 = vmul.f32 %v3857_v9, %v569_v3  ;;  %v539_v49 = vadd.f32 %v507_v23, %v406_v45  ;;  %v1277_v3 = vld [vmem:[#allocation2 + $0x243] sm:$0xff] }
  0xde   : > { %v407_v1 = vmul.f32 %v3755_v13, %v371_v26  ;;  %v508_v59 = vmul.f32 %v3761_v12, %v3927_v62  ;;  %v908_v34 = vmul.f32 %v3816_v47, %v570_v46  ;;  %v1109_v44 = vmul.f32 %v3849_v16, %v469_v48  ;;  %v372_v28 = vld [vmem:[#allocation2 + $0x267] sm:$0xff] }
  0xdf   : > { %v739_v35 = vadd.f32 %v707_v32, %v638_v0  ;;  %v1009_v36 = vmul.f32 %v3833_v19, %v370_v54  ;;  %v639_v55 = vadd.f32 %v607_v22, %v538_v39  ;;  %v3942_v43 = vmul.f32 %v3857_v9, %v570_v46  ;;  %v572_v0 = vld [vmem:[#allocation2 + $0x251] sm:$0xff]  ;;  %v472_v32 = vld [vmem:[#allocation2 + $0x268] sm:$0xff] }
  0xe0   : > { %v3944_v21 = vadd.f32 %v1209_v37, %v1140_v8  ;;  %v608_v45 = vmul.f32 %v3777_v17, %v571_v6  ;;  %v940_v15 = vadd.f32 %v908_v34, %v839_v11  ;;  %v3947_v23 = vadd.f32 %v1109_v44, %v1040_v24  ;;  %v1479_v39 = vld [vmem:[#allocation2 + $0x245] sm:$0xff] }
  0xe1   : > { %5454 = vst [vmem:[#allocation64_spill] sm:$0xff] %v3942_v43  ;;  %v808_v2 = vmul.f32 %v3788_v53, %v470_v60  ;;  %v1041_v48 = vadd.f32 %v1009_v36, %v939_v63  ;;  %v1110_v54 = vmul.f32 %v3849_v16, %v470_v60  ;;  %v540_v46 = vadd.f32 %v508_v59, %v407_v1  ;;  %v373_v1 = vld [vmem:[#allocation2 + $0x26f] sm:$0xff] }
  0xe2   : > { %5455 = vst [vmem:[#allocation65_spill] sm:$0xff] %v3944_v21  ;;  %v640_v22 = vadd.f32 %v608_v45, %v539_v49  ;;  %v708_v8 = vmul.f32 %v3803_v27, %v371_v26  ;;  %v3953_v21 = vmul.f32 %v3871_v10, %v1277_v3  ;;  %v3956_v11 = vmul.f32 %v3886_v61, %v1378_v31  ;;  %v473_v49 = vld [vmem:[#allocation2 + $0x270] sm:$0xff] }
  0xe3   : > { %5456 = vst [vmem:[#allocation66_spill] sm:$0xff] %v3947_v23  ;;  %v840_v37 = vadd.f32 %v808_v2, %v739_v35  ;;  %v408_v24 = vmul.f32 %v3755_v13, %v372_v28  ;;  %v609_v63 = vmul.f32 %v3777_v17, %v572_v0  ;;  %v509_v44 = vmul.f32 %v3761_v12, %v472_v32  ;;  %v3968_v3 = vld [vmem:[#allocation2 + $0x269] sm:$0xff]  ;;  %v3975_v43 = vld [vmem:[#allocation2 + $0x271] sm:$0xff] }
  0xe4   : > { %5457 = vst [vmem:[#allocation67_spill] sm:$0xff] %v3953_v21  ;;  %v740_v34 = vadd.f32 %v708_v8, %v639_v55  ;;  %v709_v60 = vmul.f32 %v3803_v27, %v372_v28  ;;  %v1142_v59 = vadd.f32 %v1110_v54, %v1041_v48  ;;  %v3963_v2 = vmul.f32 %v3895_v30, %v1479_v39 }
  0xe5   : > { %5458 = vst [vmem:[#allocation68_spill] sm:$0xff] %v3956_v11  ;;  %v809_v35 = vmul.f32 %v3788_v53, %v3927_v62  ;;  %v909_v36 = vmul.f32 %v3816_v47, %v571_v6  ;;  %v641_v31 = vadd.f32 %v609_v63, %v540_v46  ;;  %v910_v55 = vmul.f32 %v3816_v47, %v572_v0 }
  0xe6   : > { %5459 = vst [vmem:[#allocation69_spill] sm:$0xff] %v3963_v2  ;;  %v541_v45 = vadd.f32 %v509_v44, %v408_v24  ;;  %v741_v8 = vadd.f32 %v709_v60, %v640_v22  ;;  %v1010_v21 = vmul.f32 %v3833_v19, %v371_v26  ;;  %v409_v48 = vmul.f32 %v3755_v13, %v373_v1  ;;  %v674_v13 = vld [vmem:[#allocation2 + $0x287] sm:$0xff] }
  0xe7   : > { %v941_v11 = vadd.f32 %v909_v36, %v840_v37  ;;  %v510_v54 = vmul.f32 %v3761_v12, %v473_v49  ;;  %v841_v39 = vadd.f32 %v809_v35, %v740_v34  ;;  %v810_v2 = vmul.f32 %v3788_v53, %v472_v32  ;;  %v1279_v36 = vld [vmem:[#allocation2 + $0x263] sm:$0xff] }
  0xe8   : > { %v610_v23 = vmul.f32 %v3777_v17, %v3968_v3  ;;  %v710_v46 = vmul.f32 %v3803_v27, %v373_v1  ;;  %v1042_v63 = vadd.f32 %v1010_v21, %v940_v15  ;;  %v1111_v22 = vmul.f32 %v3849_v16, %v3927_v62  ;;  %v775_v15 = vld [vmem:[#allocation2 + $0x288] sm:$0xff] }
  0xe9   : > { %v1211_v26 = vmul.f32 %v3857_v9, %v571_v6  ;;  %v542_v37 = vadd.f32 %v510_v54, %v409_v48  ;;  %v842_v24 = vadd.f32 %v810_v2, %v741_v8  ;;  %v1011_v12 = vmul.f32 %v3833_v19, %v372_v28  ;;  %v1380_v54 = vld [vmem:[#allocation2 + $0x264] sm:$0xff] }
  0xea   : > { %v642_v34 = vadd.f32 %v610_v23, %v541_v45  ;;  %v742_v44 = vadd.f32 %v710_v46, %v641_v31  ;;  %v3985_v60 = vmul.f32 %v3857_v9, %v572_v0  ;;  %v611_v21 = vmul.f32 %v3777_v17, %v3975_v43  ;;  %v1481_v2 = vld [vmem:[#allocation2 + $0x265] sm:$0xff]  ;;  %v675_v0 = vld [vmem:[#allocation2 + $0x28f] sm:$0xff] }
  0xeb   : > { %v3987_v35 = vadd.f32 %v1211_v26, %v1142_v59  ;;  %v811_v62 = vmul.f32 %v3788_v53, %v473_v49  ;;  %v942_v6 = vadd.f32 %v910_v55, %v841_v39  ;;  %v1043_v48 = vadd.f32 %v1011_v12, %v941_v11  ;;  %v876_v17 = vld [vmem:[#allocation2 + $0x289] sm:$0xff] }
  0xec   : > { %5460 = vst [vmem:[#allocation70_spill] sm:$0xff] %v3985_v60  ;;  %v911_v28 = vmul.f32 %v3816_v47, %v3968_v3  ;;  %v711_v23 = vmul.f32 %v3803_v27, %v674_v13  ;;  %v3995_v31 = vadd.f32 %v1111_v22, %v1042_v63  ;;  %v1112_v59 = vmul.f32 %v3849_v16, %v472_v32  ;;  %v776_v22 = vld [vmem:[#allocation2 + $0x290] sm:$0xff] }
  0xed   : > { %5461 = vst [vmem:[#allocation71_spill] sm:$0xff] %v3987_v35  ;;  %v643_v45 = vadd.f32 %v611_v21, %v542_v37  ;;  %v843_v8 = vadd.f32 %v811_v62, %v742_v44  ;;  %v3999_v46 = vmul.f32 %v3871_v10, %v1279_v36  ;;  %v812_v39 = vmul.f32 %v3788_v53, %v775_v15  ;;  %v4199_v60 = vld [vmem:[#allocation2 + $0x110] sm:$0xff] }
  0xee   : > { %5462 = vst [vmem:[#allocation72_spill] sm:$0xff] %v3995_v31  ;;  %v943_v55 = vadd.f32 %v911_v28, %v842_v24  ;;  %v743_v11 = vadd.f32 %v711_v23, %v642_v34  ;;  %v4003_v26 = vmul.f32 %v3886_v61, %v1380_v54  ;;  %v4006_v12 = vmul.f32 %v3895_v30, %v1481_v2  ;;  %v4013_v34 = vld [vmem:[#allocation2 + $0xab] sm:$0xff] }
  0xef   : > { %5463 = vst [vmem:[#allocation73_spill] sm:$0xff] %v3999_v46  ;;  %v912_v63 = vmul.f32 %v3816_v47, %v3975_v43  ;;  %v712_v32 = vmul.f32 %v3803_v27, %v675_v0  ;;  %v1144_v37 = vadd.f32 %v1112_v59, %v1043_v48  ;;  %v1013_v36 = vmul.f32 %v3833_v19, %v674_v13  ;;  %v4020_v48 = vld [vmem:[#allocation2 + $0xac] sm:$0xff] }
  0xf0   : > { %5464 = vst [vmem:[#allocation74_spill] sm:$0xff] %v4003_v26  ;;  %v844_v44 = vadd.f32 %v812_v39, %v743_v11  ;;  %v913_v24 = vmul.f32 %v3816_v47, %v876_v17  ;;  %v1012_v62 = vmul.f32 %v3833_v19, %v373_v1  ;;  %v1113_v54 = vmul.f32 %v3849_v16, %v473_v49  ;;  %v877_v11 = vld [vmem:[#allocation2 + $0x291] sm:$0xff] }
  0xf1   : > { %5465 = vst [vmem:[#allocation75_spill] sm:$0xff] %v4006_v12  ;;  %v944_v21 = vadd.f32 %v912_v63, %v843_v8  ;;  %v744_v2 = vadd.f32 %v712_v32, %v643_v45  ;;  %v1045_v28 = vadd.f32 %v1013_v36, %v943_v55  ;;  %v813_v23 = vmul.f32 %v3788_v53, %v776_v22  ;;  %v4031_v53 = vld [vmem:[%s5386_s1 + $0xc] ss:$0 sm:$0xff]  ;;  %v1454_v8 = vld [vmem:[#allocation2 + $0xad] sm:$0xff]  ;;  %v1382_v32 = vld [vmem:[#allocation2 + $0x284] sm:$0xff] }
  0xf2   : > { %v945_v12 = vadd.f32 %v913_v24, %v844_v44  ;;  %v1220_v27 = vadd.f32 %v3462_v14, %v3468_v51  ;;  %v1044_v13 = vadd.f32 %v1012_v62, %v942_v6  ;;  %v1213_v59 = vmul.f32 %v3857_v9, %v3968_v3  ;;  %v1554_v45 = vld [vmem:[#allocation2 + $0xa6] sm:$0xff]  ;;  %v4057_v62 = vld [vmem:[%s5386_s1 + $0xe] ss:$0 sm:$0xff]  ;;  %v2012_v46 = vld [vmem:[#allocation2 + $0x10] sm:$0xff] }
  0xf3   : > { %v1289_v1 = vmul.f32 %v3871_v10, %v4013_v34  ;;  %v1320_v49 = vadd.f32 %v3413_v29, %v3464_v33  ;;  %v1114_v14 = vmul.f32 %v3849_v16, %v775_v15  ;;  %v845_v51 = vadd.f32 %v813_v23, %v744_v2  ;;  %v4046_v15 = vld [vmem:[%s5386_s1 + $0xd] ss:$0 sm:$0xff]  ;;  %v4066_v23 = vld [vmem:[%s5386_s1 + $0xf] ss:$0 sm:$0xff] }
  0xf4   : > { %v1014_v6 = vmul.f32 %v3833_v19, %v675_v0  ;;  %v1047_v3 = vadd.f32 %v3376_v4, %v945_v12  ;;  %v4038_v55 = vmul.f32 %v3857_v9, %v3975_v43  ;;  %v1390_v29 = vmul.f32 %v3886_v61, %v4020_v48  ;;  %v1655_v12 = vld [vmem:[#allocation2 + $0xaa] sm:$0xff] }
  0xf5   : > { %v1321_v39 = vadd.f32 %v1289_v1, %v1220_v27  ;;  %v1421_v33 = vadd.f32 %v3422_v41, %v1320_v49  ;;  %v4048_v63 = vadd.f32 %v1213_v59, %v1144_v37  ;;  %v1146_v19 = vadd.f32 %v1114_v14, %v1045_v28  ;;  %v1281_v43 = vld [vmem:[#allocation2 + $0x283] sm:$0xff]  ;;  %v1555_v37 = vld [vmem:[#allocation2 + $0xae] sm:$0xff] }
  0xf6   : > { %5466 = vst [vmem:[#allocation76_spill] sm:$0xff] %v4038_v55  ;;  %v914_v4 = vmul.f32 %v3816_v47, %v877_v11  ;;  %v1046_v0 = vadd.f32 %v1014_v6, %v944_v21  ;;  %v1491_v36 = vmul.f32 %v3895_v30, %v1454_v8  ;;  %v1591_v41 = vmul.f32 %v4031_v53, %v1554_v45  ;;  %v4085_v1 = vld [vmem:[%s5386_s1 + $0x15] ss:$0 sm:$0xff]  ;;  %v2011_v14 = vld [vmem:[#allocation2 + $0x8] sm:$0xff]  ;;  %v4106_v6 = vld [vmem:[%s5386_s1 + $0x13] ss:$0 sm:$0xff] }
  0xf7   : > { %5467 = vst [vmem:[#allocation77_spill] sm:$0xff] %v4048_v63  ;;  %v1422_v44 = vadd.f32 %v1390_v29, %v1321_v39  ;;  %v1522_v24 = vadd.f32 %v3425_v42, %v1421_v33  ;;  %v4059_v2 = vadd.f32 %v1113_v54, %v1044_v13  ;;  %v1215_v21 = vmul.f32 %v3857_v9, %v876_v17  ;;  %v4071_v42 = vld [vmem:[%s5386_s1 + $0x10] ss:$0 sm:$0xff]  ;;  %v4080_v17 = vld [vmem:[#allocation2 + $0xe8] sm:$0xff] }
  0xf8   : > { %v946_v47 = vadd.f32 %v914_v4, %v845_v51  ;;  %v1148_v28 = vadd.f32 %v3379_v5, %v1047_v3  ;;  %v1115_v27 = vmul.f32 %v3849_v16, %v776_v22  ;;  %v1692_v13 = vmul.f32 %v4046_v15, %v1655_v12  ;;  %v4078_v5 = vld [vmem:[%s5386_s1 + $0x11] ss:$0 sm:$0xff]  ;;  %5469 = vst [vmem:[#allocation79_spill] sm:$0xff] %v4080_v17  ;;  %v4101_v51 = vld [vmem:[%s5386_s1 + $0x12] ss:$0 sm:$0xff]  ;;  %v4124_v4 = vld [vmem:[#allocation2 + $0x48] sm:$0xff] }
  0xf9   : > { %5468 = vst [vmem:[#allocation78_spill] sm:$0xff] %v4059_v2  ;;  %v1523_v59 = vadd.f32 %v1491_v36, %v1422_v44  ;;  %v1623_v54 = vadd.f32 %v1591_v41, %v1522_v24  ;;  %v4088_v49 = vmul.f32 %v3871_v10, %v1281_v43  ;;  %v4091_v16 = vmul.f32 %v3886_v61, %v1382_v32  ;;  %v4111_v3 = vld [vmem:[%s5386_s1 + $0x14] ss:$0 sm:$0xff]  ;;  %v4126_v12 = vld [vmem:[#allocation2 + $0x68] sm:$0xff]  ;;  %v4146_v24 = vld [vmem:[%s5386_s1 + $0x18] ss:$0 sm:$0xff] }
  0xfa   : > { %v4094_v22 = vmul.f32 %v3857_v9, %v877_v11  ;;  %v4096_v45 = vadd.f32 %v1215_v21, %v1146_v19  ;;  %v4116_v9 = vld [vmem:[%s5386_s1 + $0x16] ss:$0 sm:$0xff]  ;;  %v4118_v39 = vadd.f32 %v1115_v27, %v1046_v0  ;;  %v1777_v33 = vmul.f32 %v4057_v62, %v4013_v34  ;;  %v4122_v19 = vld [vmem:[#allocation2 + $0x28] sm:$0xff]  ;;  %v4141_v34 = vld [vmem:[%s5386_s1 + $0x17] ss:$0 sm:$0xff] }
  0xfb   : > { %5470 = vst [vmem:[#allocation80_spill] sm:$0xff] %v4088_v49  ;;  %v1656_v11 = vld [vmem:[#allocation2 + $0xb2] sm:$0xff]  ;;  %v1724_v29 = vadd.f32 %v1692_v13, %v1623_v54  ;;  %v1592_v43 = vmul.f32 %v4031_v53, %v1555_v37  ;;  %v4130_v32 = vadd.f32 %v3401_v18, %v946_v47  ;;  %v4133_v44 = vadd.f32 %v3407_v20, %v1148_v28  ;;  %v4149_v37 = vld [vmem:[#allocation2 + $0x108] sm:$0xff] }
  0xfc   : > { %5471 = vst [vmem:[#allocation81_spill] sm:$0xff] %v4091_v16  ;;  %v1862_v0 = vmul.f32 %v4066_v23, %v4020_v48  ;;  %v1947_v36 = vmul.f32 %v4071_v42, %v1454_v8  ;;  %v1756_v18 = vld [vmem:[#allocation2 + $0xb3] sm:$0xff]  ;;  %v2048_v20 = vmul.f32 %v4078_v5, %v2011_v14  ;;  %v4151_v47 = vld [vmem:[#allocation2 + $0x128] sm:$0xff]  ;;  %v1693_v8 = vmul.f32 %v4046_v15, %v1656_v11 }
  0xfd   : > { %5472 = vst [vmem:[#allocation82_spill] sm:$0xff] %v4094_v22  ;;  %v1809_v41 = vadd.f32 %v1777_v33, %v1724_v29  ;;  %v1624_v48 = vadd.f32 %v1592_v43, %v1523_v59  ;;  %v1254_v21 = vld [vmem:[#allocation2 + $0xcb] sm:$0xff]  ;;  %v2150_v28 = vmul.f32 %v4101_v51, %v4122_v19  ;;  %v2252_v27 = vmul.f32 %v4106_v6, %v4124_v4  ;;  %v1841_v29 = vld [vmem:[#allocation2 + $0xb4] sm:$0xff] }
  0xfe   : > { %5473 = vst [vmem:[#allocation83_spill] sm:$0xff] %v4096_v45  ;;  %v2354_v54 = vmul.f32 %v4111_v3, %v4126_v12  ;;  %v4162_v13 = vmul.f32 %v4085_v1, %v4080_v17  ;;  %v4164_v14 = vld [vmem:[#allocation2 + $0x148] sm:$0xff]  ;;  %v1778_v11 = vmul.f32 %v4057_v62, %v1756_v18  ;;  %v1926_v43 = vld [vmem:[#allocation2 + $0xb5] sm:$0xff]  ;;  %v1222_v16 = vadd.f32 %v3501_v7, %v3507_v40 }
  0xff   : > { %5474 = vst [vmem:[#allocation84_spill] sm:$0xff] %v4118_v39  ;;  %v1894_v59 = vadd.f32 %v1862_v0, %v1809_v41  ;;  %v1725_v33 = vadd.f32 %v1693_v8, %v1624_v48  ;;  %v1355_v49 = vld [vmem:[#allocation2 + $0xcc] sm:$0xff]  ;;  %v4175_v26 = vmul.f32 %v4141_v34, %v4151_v47  ;;  %v1291_v0 = vmul.f32 %v3871_v10, %v1254_v21 }
 0x100   : > { %5475 = vst [vmem:[#allocation85_spill] sm:$0xff] %v4130_v32  ;;  %v4177_v45 = vld [vmem:[#allocation2 + $0x30] sm:$0xff]  ;;  %v1322_v18 = vadd.f32 %v3430_v56, %v3503_v50  ;;  %v1556_v41 = vld [vmem:[#allocation2 + $0xc6] sm:$0xff]  ;;  %v4184_v7 = vmul.f32 %v4146_v24, %v4164_v14  ;;  %v1863_v8 = vmul.f32 %v4066_v23, %v1841_v29  ;;  %v1948_v39 = vmul.f32 %v4071_v42, %v1926_v43 }
 0x101   : > { %5476 = vst [vmem:[#allocation86_spill] sm:$0xff] %v4133_v44  ;;  %v4171_v44 = vmul.f32 %v4116_v9, %v4149_v37  ;;  %v1979_v48 = vadd.f32 %v1947_v36, %v1894_v59  ;;  %v1810_v40 = vadd.f32 %v1778_v11, %v1725_v33  ;;  %v1456_v22 = vld [vmem:[#allocation2 + $0xcd] sm:$0xff]  ;;  %v1323_v2 = vadd.f32 %v1291_v0, %v1222_v16  ;;  %v1927_v32 = vld [vmem:[#allocation2 + $0xd5] sm:$0xff] }
 0x102   : > { %v4188_v63 = vld [vmem:[#allocation2 + $0x50] sm:$0xff]  ;;  %v1392_v35 = vmul.f32 %v3886_v61, %v1355_v49  ;;  %v1423_v56 = vadd.f32 %v3433_v57, %v1322_v18  ;;  %v2049_v59 = vmul.f32 %v4078_v5, %v2012_v46  ;;  %v2151_v33 = vmul.f32 %v4101_v51, %v4177_v45 }
 0x103   : > { %v4190_v55 = vld [vmem:[#allocation2 + $0x70] sm:$0xff]  ;;  %v2080_v50 = vadd.f32 %v2048_v20, %v1979_v48  ;;  %v1895_v36 = vadd.f32 %v1863_v8, %v1810_v40  ;;  %v1493_v16 = vmul.f32 %v3895_v30, %v1456_v22  ;;  %v1593_v57 = vmul.f32 %v4031_v53, %v1556_v41 }
 0x104   : > { %v4197_v29 = vld [vmem:[#allocation2 + $0xf0] sm:$0xff]  ;;  %v1424_v31 = vadd.f32 %v1392_v35, %v1323_v2  ;;  %v1524_v0 = vadd.f32 %v3436_v58, %v1423_v56  ;;  %v2253_v46 = vmul.f32 %v4106_v6, %v4188_v63  ;;  %v2355_v48 = vmul.f32 %v4111_v3, %v4190_v55 }
 0x105   : > { %5477 = vst [vmem:[#allocation87_spill] sm:$0xff] %v4197_v29  ;;  %v1657_v11 = vld [vmem:[#allocation2 + $0xca] sm:$0xff]  ;;  %v2182_v20 = vadd.f32 %v2150_v28, %v2080_v50  ;;  %v1980_v18 = vadd.f32 %v1948_v39, %v1895_v36  ;;  %v2457_v35 = vmul.f32 %v4085_v1, %v4197_v29  ;;  %v1658_v41 = vld [vmem:[#allocation2 + $0xd2] sm:$0xff]  ;;  %v2559_v56 = vmul.f32 %v4116_v9, %v4199_v60 }
 0x106   : > { %v1557_v43 = vld [vmem:[#allocation2 + $0xce] sm:$0xff]  ;;  %v1525_v2 = vadd.f32 %v1493_v16, %v1424_v31  ;;  %v1625_v25 = vadd.f32 %v1593_v57, %v1524_v0  ;;  %v1694_v58 = vmul.f32 %v4046_v15, %v1657_v11  ;;  %v1779_v31 = vmul.f32 %v4057_v62, %v1254_v21 }
 0x107   : > { %v4208_v40 = vld [vmem:[#allocation2 + $0x130] sm:$0xff]  ;;  %v2284_v28 = vadd.f32 %v2252_v27, %v2182_v20  ;;  %v2081_v39 = vadd.f32 %v2049_v59, %v1980_v18  ;;  %v1594_v50 = vmul.f32 %v4031_v53, %v1557_v43  ;;  %v1695_v59 = vmul.f32 %v4046_v15, %v1658_v41 }
 0x108   : > { %v4210_v8 = vld [vmem:[#allocation2 + $0x150] sm:$0xff]  ;;  %v2661_v36 = vmul.f32 %v4141_v34, %v4208_v40  ;;  %v1726_v29 = vadd.f32 %v1694_v58, %v1625_v25  ;;  %v1864_v43 = vmul.f32 %v4066_v23, %v1355_v49  ;;  %v1949_v18 = vmul.f32 %v4071_v42, %v1456_v22 }
 0x109   : > { %v4222_v52 = vmul.f32 %v4146_v24, %v4210_v8  ;;  %v1757_v16 = vld [vmem:[#allocation2 + $0xd3] sm:$0xff]  ;;  %v2386_v11 = vadd.f32 %v2354_v54, %v2284_v28  ;;  %v2183_v0 = vadd.f32 %v2151_v33, %v2081_v39  ;;  %v1626_v27 = vadd.f32 %v1594_v50, %v1525_v2  ;;  %v1256_v33 = vld [vmem:[#allocation2 + $0xeb] sm:$0xff]  ;;  %v5478_v50 = vld [vmem:[#allocation11_spill] sm:$0xff] }
 0x10a   : > { %v1842_v57 = vld [vmem:[#allocation2 + $0xd4] sm:$0xff]  ;;  %v1811_v20 = vadd.f32 %v1779_v31, %v1726_v29  ;;  %v2050_v17 = vmul.f32 %v4078_v5, %v4122_v19  ;;  %v1780_v54 = vmul.f32 %v4057_v62, %v1757_v16  ;;  %v2152_v41 = vmul.f32 %v4101_v51, %v4124_v4  ;;  %v4238_v28 = vld [vmem:[#allocation2 + $0x88] sm:$0xff] }
 0x10b   : > { %v2488_v25 = vadd.f32 %v4162_v13, %v2386_v11  ;;  %v2285_v58 = vadd.f32 %v2253_v46, %v2183_v0  ;;  %v1727_v21 = vadd.f32 %v1695_v59, %v1626_v27  ;;  %v2254_v49 = vmul.f32 %v4106_v6, %v4126_v12  ;;  %v5479_v11 = vld [vmem:[#allocation12_spill] sm:$0xff]  ;;  %v5480_v0 = vld [vmem:[#allocation5_spill] sm:$0xff] }
 0x10c   : > { %v1896_v2 = vadd.f32 %v1864_v43, %v1811_v20  ;;  %v1865_v22 = vmul.f32 %v4066_v23, %v1842_v57  ;;  %v1950_v46 = vmul.f32 %v4071_v42, %v1927_v32  ;;  %v1224_v31 = vadd.f32 %v5478_v50, %v3544_v38  ;;  %v1357_v59 = vld [vmem:[#allocation2 + $0xec] sm:$0xff] }
 0x10d   : > { %v2590_v29 = vadd.f32 %v4171_v44, %v2488_v25  ;;  %v2387_v19 = vadd.f32 %v2355_v48, %v2285_v58  ;;  %v1812_v13 = vadd.f32 %v1780_v54, %v1727_v21  ;;  %v1293_v16 = vmul.f32 %v3871_v10, %v1256_v33  ;;  %v1558_v57 = vld [vmem:[#allocation2 + $0xe6] sm:$0xff]  ;;  %v4250_v48 = vld [vmem:[%s5387_s2] ss:$0 sm:$0xff]  ;;  %v5481_v58 = vld [vmem:[#allocation6_spill] sm:$0xff] }
 0x10e   : > { %v1981_v39 = vadd.f32 %v1949_v18, %v1896_v2  ;;  %v1324_v27 = vadd.f32 %v5480_v0, %v5479_v11  ;;  %v2051_v38 = vmul.f32 %v4078_v5, %v4177_v45  ;;  %v2356_v18 = vmul.f32 %v4111_v3, %v4238_v28  ;;  %v1659_v50 = vld [vmem:[#allocation2 + $0xea] sm:$0xff] }
 0x10f   : > { %v2692_v44 = vadd.f32 %v4175_v26, %v2590_v29  ;;  %v2489_v32 = vadd.f32 %v2457_v35, %v2387_v19  ;;  %v1897_v20 = vadd.f32 %v1865_v22, %v1812_v13  ;;  %v1325_v25 = vadd.f32 %v1293_v16, %v1224_v31  ;;  %v1458_v35 = vld [vmem:[#allocation2 + $0xed] sm:$0xff]  ;;  %v5482_v22 = vld [vmem:[#allocation7_spill] sm:$0xff] }
 0x110   : > { %v2082_v43 = vadd.f32 %v2050_v17, %v1981_v39  ;;  %v1425_v21 = vadd.f32 %v5481_v58, %v1324_v27  ;;  %v1394_v29 = vmul.f32 %v3886_v61, %v1357_v59  ;;  %v2153_v45 = vmul.f32 %v4101_v51, %v4188_v63  ;;  %v4273_v11 = vld [vmem:[#allocation2 + $0x90] sm:$0xff] }
 0x111   : > { %v2794_v54 = vadd.f32 %v4184_v7, %v2692_v44  ;;  %v2591_v26 = vadd.f32 %v2559_v56, %v2489_v32  ;;  %v1982_v2 = vadd.f32 %v1950_v46, %v1897_v20  ;;  %v1595_v7 = vmul.f32 %v4031_v53, %v1558_v57 }
 0x112   : > { %v2184_v17 = vadd.f32 %v2152_v41, %v2082_v43  ;;  %v1526_v19 = vadd.f32 %v5482_v22, %v1425_v21  ;;  %v1426_v39 = vadd.f32 %v1394_v29, %v1325_v25  ;;  %v2458_v16 = vmul.f32 %v4085_v1, %v4149_v37  ;;  %v4299_v22 = vld [vmem:[#allocation2 + $0x170] sm:$0xff] }
 0x113   : > { %v2830_v56 = vadd.f32 %v4250_v48, %v2794_v54  ;;  %v2693_v13 = vadd.f32 %v2661_v36, %v2591_v26  ;;  %v2083_v46 = vadd.f32 %v2051_v38, %v1982_v2  ;;  %v1696_v0 = vmul.f32 %v4046_v15, %v1659_v50  ;;  %v4284_v38 = vld [vmem:[#allocation2 + $0x168] sm:$0xff]  ;;  %v1660_v50 = vld [vmem:[#allocation2 + $0xf2] sm:$0xff] }
 0x114   : > { %v2286_v31 = vadd.f32 %v2254_v49, %v2184_v17  ;;  %v1627_v41 = vadd.f32 %v1595_v7, %v1526_v19  ;;  %v2255_v57 = vmul.f32 %v4106_v6, %v4190_v55  ;;  %v1495_v36 = vmul.f32 %v3895_v30, %v1458_v35  ;;  %v1559_v49 = vld [vmem:[#allocation2 + $0xee] sm:$0xff] }
 0x115   : > { %2862 = vst.msk [vmem:[%s4264_s25] sm:$0xff] %vm171_vm0, %v2830_v56  ;;  %v2795_v27 = vadd.f32 %v4222_v52, %v2693_v13  ;;  %v2185_v44 = vadd.f32 %v2153_v45, %v2083_v46  ;;  %v2560_v20 = vmul.f32 %v4116_v9, %v4151_v47  ;;  %v1781_v25 = vmul.f32 %v4057_v62, %v1256_v33  ;;  %v1758_v46 = vld [vmem:[#allocation2 + $0xf3] sm:$0xff] }
 0x116   : > { %v2388_v32 = vadd.f32 %v2356_v18, %v2286_v31  ;;  %v1728_v43 = vadd.f32 %v1696_v0, %v1627_v41  ;;  %v2357_v21 = vmul.f32 %v4111_v3, %v4273_v11  ;;  %v1527_v54 = vadd.f32 %v1495_v36, %v1426_v39  ;;  %v1843_v36 = vld [vmem:[#allocation2 + $0xf4] sm:$0xff] }
 0x117   : > { %v2831_v58 = vadd.f32 %v4250_v48, %v2795_v27  ;;  %v2287_v52 = vadd.f32 %v2255_v57, %v2185_v44  ;;  %v2662_v2 = vmul.f32 %v4141_v34, %v4164_v14  ;;  %v1866_v29 = vmul.f32 %v4066_v23, %v1357_v59 }
 0x118   : > { %v2490_v26 = vadd.f32 %v2458_v16, %v2388_v32  ;;  %v1813_v18 = vadd.f32 %v1781_v25, %v1728_v43  ;;  %v2764_v33 = vmul.f32 %v4146_v24, %v4284_v38  ;;  %v2459_v45 = vmul.f32 %v4085_v1, %v4199_v60  ;;  %v4307_v16 = vld [vmem:[#allocation2 + $0xa8] sm:$0xff] }
 0x119   : > { %2863 = vst.msk [vmem:[%s4264_s25 + $0x8] sm:$0xff] %vm171_vm0, %v2831_v58  ;;  %v2389_v17 = vadd.f32 %v2357_v21, %v2287_v52  ;;  %v1596_v19 = vmul.f32 %v4031_v53, %v1559_v49  ;;  %v1951_v13 = vmul.f32 %v4071_v42, %v1458_v35  ;;  %v2052_v59 = vmul.f32 %v4078_v5, %v4124_v4  ;;  %v1258_v43 = vld [vmem:[#allocation2 + $0x10b] sm:$0xff] }
 0x11a   : > { %v2592_v7 = vadd.f32 %v2560_v20, %v2490_v26  ;;  %v1898_v56 = vadd.f32 %v1866_v29, %v1813_v18  ;;  %v2561_v31 = vmul.f32 %v4116_v9, %v4208_v40  ;;  %v1697_v0 = vmul.f32 %v4046_v15, %v1660_v50  ;;  %v5483_v29 = vld [vmem:[#allocation17_spill] sm:$0xff]  ;;  %v5484_v50 = vld [vmem:[#allocation16_spill] sm:$0xff] }
 0x11b   : > { %v2491_v39 = vadd.f32 %v2459_v45, %v2389_v17  ;;  %v1628_v41 = vadd.f32 %v1596_v19, %v1527_v54  ;;  %v2663_v44 = vmul.f32 %v4141_v34, %v4210_v8  ;;  %v2765_v35 = vmul.f32 %v4146_v24, %v4299_v22  ;;  %v1928_v54 = vld [vmem:[#allocation2 + $0xf5] sm:$0xff]  ;;  %v1359_v45 = vld [vmem:[#allocation2 + $0x10c] sm:$0xff] }
 0x11c   : > { %v2694_v27 = vadd.f32 %v2662_v2, %v2592_v7  ;;  %v1983_v57 = vadd.f32 %v1951_v13, %v1898_v56  ;;  %v2154_v49 = vmul.f32 %v4101_v51, %v4126_v12  ;;  %v1782_v20 = vmul.f32 %v4057_v62, %v1758_v46  ;;  %v5485_v56 = vld [vmem:[#allocation18_spill] sm:$0xff]  ;;  %v5486_v13 = vld [vmem:[#allocation8_spill] sm:$0xff] }
 0x11d   : > { %v2593_v4 = vadd.f32 %v2561_v31, %v2491_v39  ;;  %v1729_v32 = vadd.f32 %v1697_v0, %v1628_v41  ;;  %v2256_v52 = vmul.f32 %v4106_v6, %v4238_v28  ;;  %v2358_v21 = vmul.f32 %v4111_v3, %v4307_v16  ;;  %v1560_v46 = vld [vmem:[#allocation2 + $0x106] sm:$0xff] }
 0x11e   : > { %v2796_v25 = vadd.f32 %v2764_v33, %v2694_v27  ;;  %v2084_v58 = vadd.f32 %v2052_v59, %v1983_v57  ;;  %v1867_v18 = vmul.f32 %v4066_v23, %v1843_v36  ;;  %v1226_v17 = vadd.f32 %v5484_v50, %v5483_v29  ;;  %v5487_v36 = vld [vmem:[#allocation9_spill] sm:$0xff] }
 0x11f   : > { %v2695_v26 = vadd.f32 %v2663_v44, %v2593_v4  ;;  %v1814_v2 = vadd.f32 %v1782_v20, %v1729_v32  ;;  %v1295_v7 = vmul.f32 %v3871_v10, %v1258_v43  ;;  %v1326_v59 = vadd.f32 %v5486_v13, %v5485_v56  ;;  %v5488_v32 = vld [vmem:[#allocation85_spill] sm:$0xff]  ;;  %v5489_v20 = vld [vmem:[#allocation3_spill] sm:$0xff] }
 0x120   : > { %v2832_v19 = vadd.f32 %v4250_v48, %v2796_v25  ;;  %v2186_v33 = vadd.f32 %v2154_v49, %v2084_v58  ;;  %v1952_v41 = vmul.f32 %v4071_v42, %v1928_v54  ;;  %v2053_v0 = vmul.f32 %v4078_v5, %v4188_v63  ;;  %v1460_v49 = vld [vmem:[#allocation2 + $0x10d] sm:$0xff] }
 0x121   : > { %v2797_v39 = vadd.f32 %v2765_v35, %v2695_v26  ;;  %v1899_v31 = vadd.f32 %v1867_v18, %v1814_v2  ;;  %v1327_v44 = vadd.f32 %v1295_v7, %v1226_v17  ;;  %v1396_v57 = vmul.f32 %v3886_v61, %v1359_v45  ;;  %v1661_v54 = vld [vmem:[#allocation2 + $0x10a] sm:$0xff]  ;;  %v5490_v18 = vld [vmem:[#allocation10_spill] sm:$0xff] }
 0x122   : > { %2864 = vst.msk [vmem:[%s4264_s25 + $0x10] sm:$0xff] %vm171_vm0, %v2832_v19  ;;  %v2288_v27 = vadd.f32 %v2256_v52, %v2186_v33  ;;  %v1427_v4 = vadd.f32 %v5487_v36, %v1326_v59  ;;  %v4337_v25 = vadd.f32 %v5489_v20, %v5488_v32  ;;  %v2460_v58 = vmul.f32 %v4085_v1, %v4151_v47  ;;  %v4342_v2 = vld [vmem:[#allocation2 + $0x188] sm:$0xff]  ;;  %v4352_v47 = vld [vmem:[#allocation2 + $0xb0] sm:$0xff] }
 0x123   : > { %v2833_v35 = vadd.f32 %v4250_v48, %v2797_v39  ;;  %v1984_v63 = vadd.f32 %v1952_v41, %v1899_v31  ;;  %v1428_v52 = vadd.f32 %v1396_v57, %v1327_v44  ;;  %v1597_v50 = vmul.f32 %v4031_v53, %v1560_v46  ;;  %v1561_v7 = vld [vmem:[#allocation2 + $0x10e] sm:$0xff] }
 0x124   : > { %v2390_v26 = vadd.f32 %v2358_v21, %v2288_v27  ;;  %v1528_v29 = vadd.f32 %v5490_v18, %v1427_v4  ;;  %v2562_v17 = vmul.f32 %v4116_v9, %v4164_v14  ;;  %v2155_v33 = vmul.f32 %v4101_v51, %v4190_v55  ;;  %v4364_v57 = vld [vmem:[#allocation2 + $0x190] sm:$0xff] }
 0x125   : > { %2865 = vst.msk [vmem:[%s4264_s25 + $0x18] sm:$0xff] %vm171_vm0, %v2833_v35  ;;  %v2085_v19 = vadd.f32 %v2053_v0, %v1984_v63  ;;  %v1497_v21 = vmul.f32 %v3895_v30, %v1460_v49  ;;  %v2664_v13 = vmul.f32 %v4141_v34, %v4284_v38  ;;  %v1698_v46 = vmul.f32 %v4046_v15, %v1661_v54  ;;  %v1662_v32 = vld [vmem:[#allocation2 + $0x112] sm:$0xff] }
 0x126   : > { %v2492_v56 = vadd.f32 %v2460_v58, %v2390_v26  ;;  %v1629_v59 = vadd.f32 %v1597_v50, %v1528_v29  ;;  %v2766_v39 = vmul.f32 %v4146_v24, %v4342_v2  ;;  %v2257_v41 = vmul.f32 %v4106_v6, %v4273_v11  ;;  %v1759_v29 = vld [vmem:[#allocation2 + $0x113] sm:$0xff] }
 0x127   : > { %v2187_v31 = vadd.f32 %v2155_v33, %v2085_v19  ;;  %v1529_v0 = vadd.f32 %v1497_v21, %v1428_v52  ;;  %v2359_v44 = vmul.f32 %v4111_v3, %v4352_v47  ;;  %v1783_v4 = vmul.f32 %v4057_v62, %v1258_v43  ;;  %v1844_v19 = vld [vmem:[#allocation2 + $0x114] sm:$0xff] }
 0x128   : > { %v2594_v27 = vadd.f32 %v2562_v17, %v2492_v56  ;;  %v1730_v36 = vadd.f32 %v1698_v46, %v1629_v59  ;;  %v2461_v35 = vmul.f32 %v4085_v1, %v4208_v40  ;;  %v2563_v58 = vmul.f32 %v4116_v9, %v4210_v8 }
 0x129   : > { %v2289_v20 = vadd.f32 %v2257_v41, %v2187_v31  ;;  %v1598_v63 = vmul.f32 %v4031_v53, %v1561_v7  ;;  %v2665_v26 = vmul.f32 %v4141_v34, %v4299_v22  ;;  %v1868_v18 = vmul.f32 %v4066_v23, %v1359_v45  ;;  %v1929_v41 = vld [vmem:[#allocation2 + $0x115] sm:$0xff] }
 0x12a   : > { %v2696_v54 = vadd.f32 %v2664_v13, %v2594_v27  ;;  %v1815_v52 = vadd.f32 %v1783_v4, %v1730_v36  ;;  %v2767_v43 = vmul.f32 %v4146_v24, %v4364_v57  ;;  %v1699_v40 = vmul.f32 %v4046_v15, %v1662_v32  ;;  %v1260_v13 = vld [vmem:[#allocation2 + $0x12b] sm:$0xff] }
 0x12b   : > { %v2391_v50 = vadd.f32 %v2359_v44, %v2289_v20  ;;  %v1630_v17 = vadd.f32 %v1598_v63, %v1529_v0  ;;  %v1953_v7 = vmul.f32 %v4071_v42, %v1460_v49  ;;  %v2054_v56 = vmul.f32 %v4078_v5, %v4126_v12  ;;  %v1361_v44 = vld [vmem:[#allocation2 + $0x12c] sm:$0xff]  ;;  %v5492_v20 = vld [vmem:[#allocation22_spill] sm:$0xff] }
 0x12c   : > { %v2798_v33 = vadd.f32 %v2766_v39, %v2696_v54  ;;  %v1900_v21 = vadd.f32 %v1868_v18, %v1815_v52  ;;  %v2156_v45 = vmul.f32 %v4101_v51, %v4238_v28  ;;  %v1784_v31 = vmul.f32 %v4057_v62, %v1759_v29  ;;  %v4388_v36 = vld [vmem:[#allocation2 + $0xc8] sm:$0xff]  ;;  %v5493_v29 = vld [vmem:[#allocation23_spill] sm:$0xff] }
 0x12d   : > { %v2493_v59 = vadd.f32 %v2461_v35, %v2391_v50  ;;  %v1731_v46 = vadd.f32 %v1699_v40, %v1630_v17  ;;  %v2258_v39 = vmul.f32 %v4106_v6, %v4307_v16  ;;  %v1869_v49 = vmul.f32 %v4066_v23, %v1844_v19  ;;  %v5491_v32 = vld [vmem:[#allocation24_spill] sm:$0xff]  ;;  %v5494_v50 = vld [vmem:[#allocation13_spill] sm:$0xff] }
 0x12e   : > { %v2834_v0 = vadd.f32 %v4250_v48, %v2798_v33  ;;  %v1985_v27 = vadd.f32 %v1953_v7, %v1900_v21  ;;  %v1228_v35 = vadd.f32 %v5492_v20, %v5491_v32  ;;  %v1297_v63 = vmul.f32 %v3871_v10, %v1260_v13  ;;  %v1462_v7 = vld [vmem:[#allocation2 + $0x12d] sm:$0xff] }
 0x12f   : > { %v2595_v12 = vadd.f32 %v2563_v58, %v2493_v59  ;;  %v1816_v4 = vadd.f32 %v1784_v31, %v1731_v46  ;;  %v1954_v52 = vmul.f32 %v4071_v42, %v1929_v41  ;;  %v2055_v18 = vmul.f32 %v4078_v5, %v4190_v55  ;;  %v1562_v58 = vld [vmem:[#allocation2 + $0x126] sm:$0xff]  ;;  %v5495_v46 = vld [vmem:[#allocation14_spill] sm:$0xff]  ;;  %v1563_v20 = vld [vmem:[#allocation2 + $0x12e] sm:$0xff] }
 0x130   : > { %2866 = vst.msk [vmem:[%s4264_s25 + $0x20] sm:$0xff] %vm171_vm0, %v2834_v0  ;;  %v2086_v54 = vadd.f32 %v2054_v56, %v1985_v27  ;;  %v1328_v17 = vadd.f32 %v5494_v50, %v5493_v29  ;;  %v1329_v33 = vadd.f32 %v1297_v63, %v1228_v35  ;;  %v1398_v21 = vmul.f32 %v3886_v61, %v1361_v44  ;;  %v1663_v27 = vld [vmem:[#allocation2 + $0x12a] sm:$0xff] }
 0x131   : > { %v2697_v40 = vadd.f32 %v2665_v26, %v2595_v12  ;;  %v1901_v19 = vadd.f32 %v1869_v49, %v1816_v4  ;;  %v2360_v10 = vmul.f32 %v4111_v3, %v4388_v36  ;;  %v2462_v56 = vmul.f32 %v4085_v1, %v4164_v14  ;;  %v4408_v61 = vld [vmem:[#allocation2 + $0x1a8] sm:$0xff]  ;;  %v5496_v4 = vld [vmem:[#allocation15_spill] sm:$0xff] }
 0x132   : > { %v2188_v59 = vadd.f32 %v2156_v45, %v2086_v54  ;;  %v1429_v31 = vadd.f32 %v5495_v46, %v1328_v17  ;;  %v2564_v41 = vmul.f32 %v4116_v9, %v4284_v38  ;;  %v1430_v26 = vadd.f32 %v1398_v21, %v1329_v33  ;;  %v4410_v45 = vld [vmem:[#allocation2 + $0xd0] sm:$0xff] }
 0x133   : > { %v2799_v55 = vadd.f32 %v2767_v43, %v2697_v40  ;;  %v1986_v0 = vadd.f32 %v1954_v52, %v1901_v19  ;;  %v1499_v12 = vmul.f32 %v3895_v30, %v1462_v7  ;;  %v1599_v14 = vmul.f32 %v4031_v53, %v1562_v58  ;;  %v1664_v40 = vld [vmem:[#allocation2 + $0x132] sm:$0xff] }
 0x134   : > { %v2290_v49 = vadd.f32 %v2258_v39, %v2188_v59  ;;  %v1530_v32 = vadd.f32 %v5496_v4, %v1429_v31  ;;  %v2666_v35 = vmul.f32 %v4141_v34, %v4342_v2  ;;  %v2157_v39 = vmul.f32 %v4101_v51, %v4273_v11  ;;  %v4429_v33 = vld [vmem:[#allocation2 + $0x1b0] sm:$0xff] }
 0x135   : > { %v2835_v43 = vadd.f32 %v4250_v48, %v2799_v55  ;;  %v2087_v63 = vadd.f32 %v2055_v18, %v1986_v0  ;;  %v1531_v52 = vadd.f32 %v1499_v12, %v1430_v26  ;;  %v1700_v50 = vmul.f32 %v4046_v15, %v1663_v27  ;;  %v1760_v26 = vld [vmem:[#allocation2 + $0x133] sm:$0xff] }
 0x136   : > { %v2392_v54 = vadd.f32 %v2360_v10, %v2290_v49  ;;  %v1631_v29 = vadd.f32 %v1599_v14, %v1530_v32  ;;  %v2768_v30 = vmul.f32 %v4146_v24, %v4408_v61  ;;  %v2259_v58 = vmul.f32 %v4106_v6, %v4352_v47  ;;  %v1845_v14 = vld [vmem:[#allocation2 + $0x134] sm:$0xff] }
 0x137   : > { %2867 = vst.msk [vmem:[%s4264_s25 + $0x28] sm:$0xff] %vm171_vm0, %v2835_v43  ;;  %v2189_v17 = vadd.f32 %v2157_v39, %v2087_v63  ;;  %v2361_v18 = vmul.f32 %v4111_v3, %v4410_v45  ;;  %v1785_v59 = vmul.f32 %v4057_v62, %v1260_v13  ;;  %v1600_v10 = vmul.f32 %v4031_v53, %v1563_v20 }
 0x138   : > { %v2494_v19 = vadd.f32 %v2462_v56, %v2392_v54  ;;  %v1732_v21 = vadd.f32 %v1700_v50, %v1631_v29  ;;  %v2463_v31 = vmul.f32 %v4085_v1, %v4210_v8  ;;  %v2565_v55 = vmul.f32 %v4116_v9, %v4299_v22  ;;  %v1930_v50 = vld [vmem:[#allocation2 + $0x135] sm:$0xff] }
 0x139   : > { %v2291_v46 = vadd.f32 %v2259_v58, %v2189_v17  ;;  %v1870_v0 = vmul.f32 %v4066_v23, %v1361_v44  ;;  %v1632_v56 = vadd.f32 %v1600_v10, %v1531_v52  ;;  %v1701_v12 = vmul.f32 %v4046_v15, %v1664_v40 }
 0x13a   : > { %v2596_v27 = vadd.f32 %v2564_v41, %v2494_v19  ;;  %v1817_v49 = vadd.f32 %v1785_v59, %v1732_v21  ;;  %v2667_v13 = vmul.f32 %v4141_v34, %v4364_v57  ;;  %v2769_v32 = vmul.f32 %v4146_v24, %v4429_v33  ;;  %v1262_v41 = vld [vmem:[#allocation2 + $0x14b] sm:$0xff]  ;;  %v5497_v19 = vld [vmem:[#allocation30_spill] sm:$0xff] }
 0x13b   : > { %v2393_v4 = vadd.f32 %v2361_v18, %v2291_v46  ;;  %v1955_v8 = vmul.f32 %v4071_v42, %v1462_v7  ;;  %v1733_v63 = vadd.f32 %v1701_v12, %v1632_v56  ;;  %v1786_v44 = vmul.f32 %v4057_v62, %v1760_v26  ;;  %v1363_v18 = vld [vmem:[#allocation2 + $0x14c] sm:$0xff] }
 0x13c   : > { %v2698_v20 = vadd.f32 %v2666_v35, %v2596_v27  ;;  %v1902_v43 = vadd.f32 %v1870_v0, %v1817_v49  ;;  %v2056_v54 = vmul.f32 %v4078_v5, %v4238_v28  ;;  %v2158_v52 = vmul.f32 %v4101_v51, %v4307_v16  ;;  %v5498_v21 = vld [vmem:[#allocation28_spill] sm:$0xff]  ;;  %v5499_v46 = vld [vmem:[#allocation29_spill] sm:$0xff] }
 0x13d   : > { %v2495_v39 = vadd.f32 %v2463_v31, %v2393_v4  ;;  %v2260_v29 = vmul.f32 %v4106_v6, %v4388_v36  ;;  %v1818_v58 = vadd.f32 %v1786_v44, %v1733_v63  ;;  %v1871_v35 = vmul.f32 %v4066_v23, %v1845_v14  ;;  %v4457_v28 = vld [vmem:[%s5386_s1 + $0x9] ss:$0 sm:$0xff]  ;;  %v5500_v31 = vld [vmem:[#allocation19_spill] sm:$0xff]  ;;  %v4467_v4 = vld [vmem:[%s5386_s1 + $0xa] ss:$0 sm:$0xff] }
 0x13e   : > { %v2800_v17 = vadd.f32 %v2768_v30, %v2698_v20  ;;  %v1987_v7 = vadd.f32 %v1955_v8, %v1902_v43  ;;  %v1230_v59 = vadd.f32 %v5498_v21, %v5497_v19  ;;  %v1299_v10 = vmul.f32 %v4457_v28, %v1262_v41  ;;  %v1564_v0 = vld [vmem:[#allocation2 + $0x146] sm:$0xff] }
 0x13f   : > { %v2597_v40 = vadd.f32 %v2565_v55, %v2495_v39  ;;  %v1330_v30 = vadd.f32 %v5500_v31, %v5499_v46  ;;  %v1903_v49 = vadd.f32 %v1871_v35, %v1818_v58  ;;  %v1956_v55 = vmul.f32 %v4071_v42, %v1930_v50  ;;  %v5501_v14 = vld [vmem:[#allocation20_spill] sm:$0xff]  ;;  %v5502_v63 = vld [vmem:[#allocation79_spill] sm:$0xff]  ;;  %v5503_v58 = vld [vmem:[#allocation21_spill] sm:$0xff] }
 0x140   : > { %v2836_v26 = vadd.f32 %v4250_v48, %v2800_v17  ;;  %v2088_v27 = vadd.f32 %v2056_v54, %v1987_v7  ;;  %v1331_v12 = vadd.f32 %v1299_v10, %v1230_v59  ;;  %v1400_v8 = vmul.f32 %v4467_v4, %v1363_v18  ;;  %v1464_v54 = vld [vmem:[#allocation2 + $0x14d] sm:$0xff] }
 0x141   : > { %v2699_v56 = vadd.f32 %v2667_v13, %v2597_v40  ;;  %v1431_v20 = vadd.f32 %v5501_v14, %v1330_v30  ;;  %v2362_v44 = vmul.f32 %v4111_v3, %v5502_v63  ;;  %v1988_v39 = vadd.f32 %v1956_v55, %v1903_v49  ;;  %v1665_v50 = vld [vmem:[#allocation2 + $0x14a] sm:$0xff] }
 0x142   : > { %2868 = vst.msk [vmem:[%s4264_s25 + $0x30] sm:$0xff] %vm171_vm0, %v2836_v26  ;;  %v2190_v43 = vadd.f32 %v2158_v52, %v2088_v27  ;;  %v2057_v13 = vmul.f32 %v4078_v5, %v4273_v11  ;;  %v1432_v7 = vadd.f32 %v1400_v8, %v1331_v12  ;;  %v1601_v40 = vmul.f32 %v4031_v53, %v1564_v0  ;;  %v4484_v11 = vld [vmem:[#allocation2 + $0x1c8] sm:$0xff] }
 0x143   : > { %v2801_v17 = vadd.f32 %v2769_v32, %v2699_v56  ;;  %v1532_v35 = vadd.f32 %v5503_v58, %v1431_v20  ;;  %v2464_v52 = vmul.f32 %v4085_v1, %v4284_v38  ;;  %v2159_v59 = vmul.f32 %v4101_v51, %v4352_v47  ;;  %v4489_v32 = vld [vmem:[%s5386_s1 + $0xb] ss:$0 sm:$0xff]  ;;  %v1565_v30 = vld [vmem:[#allocation2 + $0x14e] sm:$0xff] }
 0x144   : > { %v2292_v19 = vadd.f32 %v2260_v29, %v2190_v43  ;;  %v2089_v21 = vadd.f32 %v2057_v13, %v1988_v39  ;;  %v1501_v46 = vmul.f32 %v4489_v32, %v1464_v54  ;;  %v1702_v29 = vmul.f32 %v4046_v15, %v1665_v50  ;;  %v5504_v43 = vld [vmem:[#allocation87_spill] sm:$0xff]  ;;  %v1666_v39 = vld [vmem:[#allocation2 + $0x152] sm:$0xff] }
 0x145   : > { %v2837_v10 = vadd.f32 %v4250_v48, %v2801_v17  ;;  %v1633_v31 = vadd.f32 %v1601_v40, %v1532_v35  ;;  %v2566_v0 = vmul.f32 %v4116_v9, %v4342_v2  ;;  %v2261_v27 = vmul.f32 %v4106_v6, %v4410_v45  ;;  %v4508_v50 = vld [vmem:[#allocation2 + $0x1d0] sm:$0xff] }
 0x146   : > { %v2394_v38 = vadd.f32 %v2362_v44, %v2292_v19  ;;  %v2191_v26 = vadd.f32 %v2159_v59, %v2089_v21  ;;  %v2668_v49 = vmul.f32 %v4141_v34, %v4408_v61  ;;  %v1533_v55 = vadd.f32 %v1501_v46, %v1432_v7  ;;  %v1846_v46 = vld [vmem:[#allocation2 + $0x154] sm:$0xff] }
 0x147   : > { %2869 = vst.msk [vmem:[%s4264_s25 + $0x38] sm:$0xff] %vm171_vm0, %v2837_v10  ;;  %v1734_v56 = vadd.f32 %v1702_v29, %v1633_v31  ;;  %v1787_v12 = vmul.f32 %v4057_v62, %v1262_v41  ;;  %v2770_v14 = vmul.f32 %v4146_v24, %v4484_v11  ;;  %v2363_v44 = vmul.f32 %v4111_v3, %v5504_v43 }
 0x148   : > { %v2496_v8 = vadd.f32 %v2464_v52, %v2394_v38  ;;  %v2293_v20 = vadd.f32 %v2261_v27, %v2191_v26  ;;  %v2465_v13 = vmul.f32 %v4085_v1, %v4299_v22  ;;  %v1872_v7 = vmul.f32 %v4066_v23, %v1363_v18  ;;  %v1761_v52 = vld [vmem:[#allocation2 + $0x153] sm:$0xff]  ;;  %v1264_v38 = vld [vmem:[#allocation2 + $0x16b] sm:$0xff] }
 0x149   : > { %v1819_v17 = vadd.f32 %v1787_v12, %v1734_v56  ;;  %v1602_v58 = vmul.f32 %v4031_v53, %v1565_v30  ;;  %v2567_v40 = vmul.f32 %v4116_v9, %v4364_v57  ;;  %v2669_v19 = vmul.f32 %v4141_v34, %v4429_v33 }
 0x14a   : > { %v2598_v41 = vadd.f32 %v2566_v0, %v2496_v8  ;;  %v2395_v35 = vadd.f32 %v2363_v44, %v2293_v20  ;;  %v1957_v59 = vmul.f32 %v4071_v42, %v1464_v54  ;;  %v1703_v10 = vmul.f32 %v4046_v15, %v1666_v39  ;;  %v1365_v20 = vld [vmem:[#allocation2 + $0x16c] sm:$0xff]  ;;  %v5505_v39 = vld [vmem:[#allocation35_spill] sm:$0xff] }
 0x14b   : > { %v1904_v21 = vadd.f32 %v1872_v7, %v1819_v17  ;;  %v1634_v22 = vadd.f32 %v1602_v58, %v1533_v55  ;;  %v2771_v29 = vmul.f32 %v4146_v24, %v4508_v50  ;;  %v2058_v30 = vmul.f32 %v4078_v5, %v4307_v16  ;;  %v1931_v55 = vld [vmem:[#allocation2 + $0x155] sm:$0xff] }
 0x14c   : > { %v2700_v31 = vadd.f32 %v2668_v49, %v2598_v41  ;;  %v2497_v18 = vadd.f32 %v2465_v13, %v2395_v35  ;;  %v2160_v26 = vmul.f32 %v4101_v51, %v4388_v36  ;;  %v1788_v54 = vmul.f32 %v4057_v62, %v1761_v52  ;;  %v5506_v13 = vld [vmem:[#allocation34_spill] sm:$0xff]  ;;  %v5507_v35 = vld [vmem:[#allocation36_spill] sm:$0xff] }
 0x14d   : > { %v1989_v0 = vadd.f32 %v1957_v59, %v1904_v21  ;;  %v1735_v27 = vadd.f32 %v1703_v10, %v1634_v22  ;;  %v2262_v49 = vmul.f32 %v4106_v6, %v5502_v63  ;;  %v1873_v8 = vmul.f32 %v4066_v23, %v1846_v46  ;;  %v1566_v63 = vld [vmem:[#allocation2 + $0x166] sm:$0xff] }
 0x14e   : > { %v2802_v56 = vadd.f32 %v2770_v14, %v2700_v31  ;;  %v2599_v12 = vadd.f32 %v2567_v40, %v2497_v18  ;;  %v1232_v17 = vadd.f32 %v5506_v13, %v5505_v39  ;;  %v1301_v7 = vmul.f32 %v4457_v28, %v1264_v38  ;;  %v5508_v40 = vld [vmem:[#allocation25_spill] sm:$0xff] }
 0x14f   : > { %v2090_v44 = vadd.f32 %v2058_v30, %v1989_v0  ;;  %v1820_v16 = vadd.f32 %v1788_v54, %v1735_v27  ;;  %v1958_v14 = vmul.f32 %v4071_v42, %v1931_v55  ;;  %v1332_v52 = vadd.f32 %v5508_v40, %v5507_v35  ;;  %v1466_v46 = vld [vmem:[#allocation2 + $0x16d] sm:$0xff]  ;;  %v5509_v42 = vld [vmem:[#allocation26_spill] sm:$0xff] }
 0x150   : > { %v2838_v58 = vadd.f32 %v4250_v48, %v2802_v56  ;;  %v2701_v41 = vadd.f32 %v2669_v19, %v2599_v12  ;;  %v1333_v22 = vadd.f32 %v1301_v7, %v1232_v17  ;;  %v1402_v10 = vmul.f32 %v4467_v4, %v1365_v20  ;;  %v1667_v55 = vld [vmem:[#allocation2 + $0x16a] sm:$0xff]  ;;  %v1668_v35 = vld [vmem:[#allocation2 + $0x172] sm:$0xff] }
 0x151   : > { %v2192_v21 = vadd.f32 %v2160_v26, %v2090_v44  ;;  %v1905_v59 = vadd.f32 %v1873_v8, %v1820_v16  ;;  %v2364_v18 = vmul.f32 %v4111_v3, %v4149_v37  ;;  %v2466_v19 = vmul.f32 %v4085_v1, %v4342_v2  ;;  %v4546_v12 = vld [vmem:[#allocation2 + $0x1e8] sm:$0xff]  ;;  %v5510_v37 = vld [vmem:[#allocation27_spill] sm:$0xff] }
 0x152   : > { %2870 = vst.msk [vmem:[%s4264_s25 + $0x40] sm:$0xff] %vm171_vm0, %v2838_v58  ;;  %v2803_v31 = vadd.f32 %v2771_v29, %v2701_v41  ;;  %v1433_v30 = vadd.f32 %v5509_v42, %v1332_v52  ;;  %v2059_v26 = vmul.f32 %v4078_v5, %v4352_v47  ;;  %v1434_v54 = vadd.f32 %v1402_v10, %v1333_v22  ;;  %v1567_v44 = vld [vmem:[#allocation2 + $0x16e] sm:$0xff] }
 0x153   : > { %v2294_v0 = vadd.f32 %v2262_v49, %v2192_v21  ;;  %v1990_v27 = vadd.f32 %v1958_v14, %v1905_v59  ;;  %v1503_v29 = vmul.f32 %v4489_v32, %v1466_v46  ;;  %v1603_v2 = vmul.f32 %v4031_v53, %v1566_v63  ;;  %v4566_v52 = vld [vmem:[#allocation2 + $0x1f0] sm:$0xff] }
 0x154   : > { %v2839_v56 = vadd.f32 %v4250_v48, %v2803_v31  ;;  %v1534_v8 = vadd.f32 %v5510_v37, %v1433_v30  ;;  %v2568_v49 = vmul.f32 %v4116_v9, %v4408_v61  ;;  %v2161_v5 = vmul.f32 %v4101_v51, %v4410_v45  ;;  %v4611_v37 = vld [vmem:[%s5386_s1 + $0x11] ss:$0 sm:$0xff] }
 0x155   : > { %v2396_v16 = vadd.f32 %v2364_v18, %v2294_v0  ;;  %v2091_v39 = vadd.f32 %v2059_v26, %v1990_v27  ;;  %v2670_v47 = vmul.f32 %v4141_v34, %v4484_v11  ;;  %v1535_v13 = vadd.f32 %v1503_v29, %v1434_v54  ;;  %v4597_v27 = vld [vmem:[%s5386_s1 + $0x10] ss:$0 sm:$0xff] }
 0x156   : > { %2871 = vst.msk [vmem:[%s4264_s25 + $0x48] sm:$0xff] %vm171_vm0, %v2839_v56  ;;  %v1635_v17 = vadd.f32 %v1603_v2, %v1534_v8  ;;  %v1704_v7 = vmul.f32 %v4046_v15, %v1667_v55  ;;  %v2772_v53 = vmul.f32 %v4146_v24, %v4546_v12  ;;  %v2263_v14 = vmul.f32 %v4106_v6, %v5504_v43  ;;  %v4572_v15 = vld [vmem:[%s5386_s1 + $0xc] ss:$0 sm:$0xff]  ;;  %v4603_v55 = vld [vmem:[%s5386_s1 + $0xe] ss:$0 sm:$0xff]  ;;  %v1932_v2 = vld [vmem:[#allocation2 + $0x175] sm:$0xff] }
 0x157   : > { %v2498_v58 = vadd.f32 %v2466_v19, %v2396_v16  ;;  %v2193_v41 = vadd.f32 %v2161_v5, %v2091_v39  ;;  %v2365_v40 = vmul.f32 %v4111_v3, %v4199_v60  ;;  %v1789_v21 = vmul.f32 %v4057_v62, %v1264_v38  ;;  %v1762_v3 = vld [vmem:[#allocation2 + $0x173] sm:$0xff]  ;;  %v4580_v62 = vld [vmem:[#allocation2 + $0xe8] sm:$0xff] }
 0x158   : > { %v1736_v63 = vadd.f32 %v1704_v7, %v1635_v17  ;;  %v1604_v59 = vmul.f32 %v4572_v15, %v1567_v44  ;;  %v2467_v43 = vmul.f32 %v4085_v1, %v4364_v57  ;;  %v2569_v60 = vmul.f32 %v4116_v9, %v4429_v33  ;;  %v4585_v19 = vld [vmem:[%s5386_s1 + $0xd] ss:$0 sm:$0xff]  ;;  %v4624_v5 = vld [vmem:[%s5386_s1 + $0xf] ss:$0 sm:$0xff]  ;;  %v5511_v17 = vld [vmem:[#allocation42_spill] sm:$0xff] }
 0x159   : > { %v2600_v22 = vadd.f32 %v2568_v49, %v2498_v58  ;;  %v2295_v10 = vadd.f32 %v2263_v14, %v2193_v41  ;;  %v1874_v18 = vmul.f32 %v4066_v23, %v1365_v20  ;;  %v1705_v42 = vmul.f32 %v4585_v19, %v1668_v35  ;;  %v4592_v57 = vld [vmem:[#allocation2 + $0x108] sm:$0xff]  ;;  %v1847_v23 = vld [vmem:[#allocation2 + $0x174] sm:$0xff] }
 0x15a   : > { %v1821_v31 = vadd.f32 %v1789_v21, %v1736_v63  ;;  %v1636_v38 = vadd.f32 %v1604_v59, %v1535_v13  ;;  %v2671_v1 = vmul.f32 %v4141_v34, %v4508_v50  ;;  %v2773_v9 = vmul.f32 %v4146_v24, %v4566_v52  ;;  %v4606_v24 = vld [vmem:[#allocation2 + $0x18b] sm:$0xff]  ;;  %v5514_v63 = vld [vmem:[#allocation31_spill] sm:$0xff] }
 0x15b   : > { %v2702_v30 = vadd.f32 %v2670_v47, %v2600_v22  ;;  %v2397_v0 = vadd.f32 %v2365_v40, %v2295_v10  ;;  %v1959_v26 = vmul.f32 %v4597_v27, %v1466_v46  ;;  %v1790_v34 = vmul.f32 %v4603_v55, %v1762_v3  ;;  %v4619_v49 = vld [vmem:[#allocation2 + $0x128] sm:$0xff]  ;;  %v4635_v35 = vld [vmem:[#allocation2 + $0xf0] sm:$0xff] }
 0x15c   : > { %v1906_v20 = vadd.f32 %v1874_v18, %v1821_v31  ;;  %v1737_v54 = vadd.f32 %v1705_v42, %v1636_v38  ;;  %v2060_v46 = vmul.f32 %v4611_v37, %v4388_v36  ;;  %v2162_v8 = vmul.f32 %v4101_v51, %v4580_v62  ;;  %v4627_v36 = vld [vmem:[#allocation2 + $0x18c] sm:$0xff]  ;;  %v4644_v10 = vld [vmem:[%s5386_s1 + $0x14] ss:$0 sm:$0xff] }
 0x15d   : > { %v2804_v56 = vadd.f32 %v2772_v53, %v2702_v30  ;;  %v2499_v29 = vadd.f32 %v2467_v43, %v2397_v0  ;;  %v2264_v16 = vmul.f32 %v4106_v6, %v4592_v57  ;;  %v1875_v47 = vmul.f32 %v4624_v5, %v1847_v23  ;;  %v5512_v7 = vld [vmem:[#allocation40_spill] sm:$0xff]  ;;  %v5513_v40 = vld [vmem:[#allocation41_spill] sm:$0xff] }
 0x15e   : > { %v1991_v44 = vadd.f32 %v1959_v26, %v1906_v20  ;;  %v1822_v39 = vadd.f32 %v1790_v34, %v1737_v54  ;;  %v1234_v58 = vadd.f32 %v5512_v7, %v5511_v17  ;;  %v1303_v6 = vmul.f32 %v4457_v28, %v4606_v24  ;;  %v1568_v59 = vld [vmem:[#allocation2 + $0x186] sm:$0xff]  ;;  %v4652_v42 = vld [vmem:[#allocation2 + $0x110] sm:$0xff] }
 0x15f   : > { %v2840_v51 = vadd.f32 %v4250_v48, %v2804_v56  ;;  %v2601_v13 = vadd.f32 %v2569_v60, %v2499_v29  ;;  %v1960_v14 = vmul.f32 %v4597_v27, %v1932_v2  ;;  %v1334_v21 = vadd.f32 %v5514_v63, %v5513_v40  ;;  %v5515_v30 = vld [vmem:[#allocation32_spill] sm:$0xff]  ;;  %v4658_v20 = vld [vmem:[%s5386_s1 + $0x15] ss:$0 sm:$0xff]  ;;  %v4665_v54 = vld [vmem:[%s5386_s1 + $0x12] ss:$0 sm:$0xff] }
 0x160   : > { %v2092_v53 = vadd.f32 %v2060_v46, %v1991_v44  ;;  %v1907_v41 = vadd.f32 %v1875_v47, %v1822_v39  ;;  %v2366_v43 = vmul.f32 %v4644_v10, %v4619_v49  ;;  %v1335_v60 = vadd.f32 %v1303_v6, %v1234_v58  ;;  %v1669_v56 = vld [vmem:[#allocation2 + $0x18a] sm:$0xff]  ;;  %v4679_v47 = vld [vmem:[%s5386_s1 + $0x16] ss:$0 sm:$0xff]  ;;  %v4704_v63 = vld [vmem:[%s5386_s1 + $0x18] ss:$0 sm:$0xff] }
 0x161   : > { %2872 = vst.msk [vmem:[%s4264_s25 + $0x50] sm:$0xff] %vm171_vm0, %v2840_v51  ;;  %v2703_v22 = vadd.f32 %v2671_v1, %v2601_v13  ;;  %v1404_v3 = vmul.f32 %v4467_v4, %v4627_v36  ;;  %v2061_v38 = vmul.f32 %v4611_v37, %v4410_v45  ;;  %v1435_v0 = vadd.f32 %v5515_v30, %v1334_v21  ;;  %v1468_v1 = vld [vmem:[#allocation2 + $0x18d] sm:$0xff] }
 0x162   : > { %v2194_v31 = vadd.f32 %v2162_v8, %v2092_v53  ;;  %v1992_v18 = vadd.f32 %v1960_v14, %v1907_v41  ;;  %v2468_v26 = vmul.f32 %v4658_v20, %v4408_v61  ;;  %v2163_v45 = vmul.f32 %v4665_v54, %v4635_v35  ;;  %v4671_v8 = vld [vmem:[#allocation2 + $0x130] sm:$0xff] }
 0x163   : > { %v2805_v23 = vadd.f32 %v2773_v9, %v2703_v22  ;;  %v1436_v34 = vadd.f32 %v1404_v3, %v1335_v60  ;;  %v4669_v9 = vld [vmem:[#allocation2 + $0x208] sm:$0xff]  ;;  %v5516_v2 = vld [vmem:[#allocation33_spill] sm:$0xff]  ;;  %v1605_v61 = vmul.f32 %v4572_v15, %v1568_v59  ;;  %v1505_v17 = vmul.f32 %v4489_v32, %v1468_v1 }
 0x164   : > { %v2296_v29 = vadd.f32 %v2264_v16, %v2194_v31  ;;  %v2093_v46 = vadd.f32 %v2061_v38, %v1992_v18  ;;  %v1536_v44 = vadd.f32 %v5516_v2, %v1435_v0  ;;  %v2570_v16 = vmul.f32 %v4679_v47, %v4484_v11  ;;  %v4686_v51 = vld [vmem:[%s5386_s1 + $0x13] ss:$0 sm:$0xff]  ;;  %v4697_v14 = vld [vmem:[%s5386_s1 + $0x17] ss:$0 sm:$0xff] }
 0x165   : > { %v2841_v39 = vadd.f32 %v4250_v48, %v2805_v23  ;;  %v2265_v13 = vmul.f32 %v4686_v51, %v4652_v42  ;;  %v1569_v7 = vld [vmem:[#allocation2 + $0x18e] sm:$0xff]  ;;  %v1706_v41 = vmul.f32 %v4585_v19, %v1669_v56  ;;  %v2672_v40 = vmul.f32 %v4697_v14, %v4546_v12 }
 0x166   : > { %v2398_v58 = vadd.f32 %v2366_v43, %v2296_v29  ;;  %v2195_v6 = vadd.f32 %v2163_v45, %v2093_v46  ;;  %v1637_v53 = vadd.f32 %v1605_v61, %v1536_v44  ;;  %v2774_v21 = vmul.f32 %v4704_v63, %v4669_v9  ;;  %v4710_v3 = vld [vmem:[#allocation2 + $0x210] sm:$0xff] }
 0x167   : > { %2873 = vst.msk [vmem:[%s4264_s25 + $0x58] sm:$0xff] %vm171_vm0, %v2841_v39  ;;  %v2367_v59 = vmul.f32 %v4644_v10, %v4671_v8  ;;  %v1537_v22 = vadd.f32 %v1505_v17, %v1436_v34  ;;  %v1791_v18 = vmul.f32 %v4603_v55, %v4606_v24  ;;  %v1670_v38 = vld [vmem:[#allocation2 + $0x192] sm:$0xff]  ;;  %v2469_v30 = vmul.f32 %v4658_v20, %v4429_v33 }
 0x168   : > { %v2500_v43 = vadd.f32 %v2468_v26, %v2398_v58  ;;  %v2297_v60 = vadd.f32 %v2265_v13, %v2195_v6  ;;  %v1738_v31 = vadd.f32 %v1706_v41, %v1637_v53  ;;  %v2571_v0 = vmul.f32 %v4679_v47, %v4508_v50  ;;  %v1763_v46 = vld [vmem:[#allocation2 + $0x193] sm:$0xff] }
 0x169   : > { %v2673_v23 = vmul.f32 %v4697_v14, %v4566_v52  ;;  %v1606_v45 = vmul.f32 %v4572_v15, %v1569_v7  ;;  %v1876_v29 = vmul.f32 %v4624_v5, %v4627_v36  ;;  %v2775_v24 = vmul.f32 %v4704_v63, %v4710_v3  ;;  %v1848_v61 = vld [vmem:[#allocation2 + $0x194] sm:$0xff]  ;;  %v1268_v7 = vld [vmem:[#allocation2 + $0x1ab] sm:$0xff] }
 0x16a   : > { %v2602_v26 = vadd.f32 %v2570_v16, %v2500_v43  ;;  %v2399_v34 = vadd.f32 %v2367_v59, %v2297_v60  ;;  %v1823_v56 = vadd.f32 %v1791_v18, %v1738_v31  ;;  %v1961_v33 = vmul.f32 %v4597_v27, %v1468_v1  ;;  %v1933_v53 = vld [vmem:[#allocation2 + $0x195] sm:$0xff]  ;;  %v1369_v43 = vld [vmem:[#allocation2 + $0x1ac] sm:$0xff] }
 0x16b   : > { %v1638_v2 = vadd.f32 %v1606_v45, %v1537_v22  ;;  %v1707_v44 = vmul.f32 %v4585_v19, %v1670_v38  ;;  %v2062_v16 = vmul.f32 %v4611_v37, %v4580_v62  ;;  %v2164_v36 = vmul.f32 %v4665_v54, %v4592_v57  ;;  %v4735_v60 = vld [vmem:[#allocation2 + $0x148] sm:$0xff]  ;;  %v5518_v18 = vld [vmem:[#allocation46_spill] sm:$0xff]  ;;  %v5519_v45 = vld [vmem:[#allocation47_spill] sm:$0xff] }
 0x16c   : > { %v2704_v39 = vadd.f32 %v2672_v40, %v2602_v26  ;;  %v2501_v13 = vadd.f32 %v2469_v30, %v2399_v34  ;;  %v1908_v17 = vadd.f32 %v1876_v29, %v1823_v56  ;;  %v2266_v58 = vmul.f32 %v4686_v51, %v4619_v49  ;;  %v5517_v31 = vld [vmem:[#allocation48_spill] sm:$0xff]  ;;  %v5520_v26 = vld [vmem:[#allocation37_spill] sm:$0xff] }
 0x16d   : > { %v1739_v6 = vadd.f32 %v1707_v44, %v1638_v2  ;;  %v1792_v1 = vmul.f32 %v4603_v55, %v1763_v46  ;;  %v1877_v40 = vmul.f32 %v4624_v5, %v1848_v61  ;;  %v1236_v38 = vadd.f32 %v5518_v18, %v5517_v31  ;;  %v1570_v56 = vld [vmem:[#allocation2 + $0x1a6] sm:$0xff]  ;;  %v5521_v61 = vld [vmem:[#allocation38_spill] sm:$0xff]  ;;  %v1571_v18 = vld [vmem:[#allocation2 + $0x1ae] sm:$0xff] }
 0x16e   : > { %v2806_v41 = vadd.f32 %v2774_v21, %v2704_v39  ;;  %v2603_v59 = vadd.f32 %v2571_v0, %v2501_v13  ;;  %v1993_v22 = vadd.f32 %v1961_v33, %v1908_v17  ;;  %v1305_v30 = vmul.f32 %v4457_v28, %v1268_v7  ;;  %v1470_v13 = vld [vmem:[#allocation2 + $0x1ad] sm:$0xff] }
 0x16f   : > { %v1824_v62 = vadd.f32 %v1792_v1, %v1739_v6  ;;  %v1336_v34 = vadd.f32 %v5520_v26, %v5519_v45  ;;  %v1962_v46 = vmul.f32 %v4597_v27, %v1933_v53  ;;  %v1406_v44 = vmul.f32 %v4467_v4, %v1369_v43  ;;  %v4762_v45 = vld [vmem:[#allocation2 + $0x150] sm:$0xff] }
 0x170   : > { %v2842_v21 = vadd.f32 %v4250_v48, %v2806_v41  ;;  %v2705_v0 = vadd.f32 %v2673_v23, %v2603_v59  ;;  %v2094_v29 = vadd.f32 %v2062_v16, %v1993_v22  ;;  %v1337_v2 = vadd.f32 %v1305_v30, %v1236_v38  ;;  %v1671_v16 = vld [vmem:[#allocation2 + $0x1aa] sm:$0xff]  ;;  %v5522_v59 = vld [vmem:[#allocation39_spill] sm:$0xff] }
 0x171   : > { %v1909_v33 = vadd.f32 %v1877_v40, %v1824_v62  ;;  %v1437_v39 = vadd.f32 %v5521_v61, %v1336_v34  ;;  %v2368_v1 = vmul.f32 %v4644_v10, %v4735_v60  ;;  %v2063_v23 = vmul.f32 %v4611_v37, %v4635_v35  ;;  %v4758_v38 = vld [vmem:[#allocation2 + $0x228] sm:$0xff] }
 0x172   : > { %2874 = vst.msk [vmem:[%s4264_s25 + $0x60] sm:$0xff] %vm171_vm0, %v2842_v21  ;;  %v2807_v17 = vadd.f32 %v2775_v24, %v2705_v0  ;;  %v2196_v6 = vadd.f32 %v2164_v36, %v2094_v29  ;;  %v1438_v41 = vadd.f32 %v1406_v44, %v1337_v2  ;;  %v1607_v40 = vmul.f32 %v4572_v15, %v1570_v56 }
 0x173   : > { %v1994_v53 = vadd.f32 %v1962_v46, %v1909_v33  ;;  %v1538_v22 = vadd.f32 %v5522_v59, %v1437_v39  ;;  %v2470_v24 = vmul.f32 %v4658_v20, %v4484_v11  ;;  %v1507_v36 = vmul.f32 %v4489_v32, %v1470_v13  ;;  %v1672_v33 = vld [vmem:[#allocation2 + $0x1b2] sm:$0xff] }
 0x174   : > { %v2843_v62 = vadd.f32 %v4250_v48, %v2807_v17  ;;  %v2298_v31 = vadd.f32 %v2266_v58, %v2196_v6  ;;  %v2165_v30 = vmul.f32 %v4665_v54, %v4652_v42  ;;  %v1708_v34 = vmul.f32 %v4585_v19, %v1671_v16 }
 0x175   : > { %v2095_v35 = vadd.f32 %v2063_v23, %v1994_v53  ;;  %v1639_v26 = vadd.f32 %v1607_v40, %v1538_v22  ;;  %v2572_v11 = vmul.f32 %v4679_v47, %v4546_v12  ;;  %v2674_v58 = vmul.f32 %v4697_v14, %v4669_v9 }
 0x176   : > { %2875 = vst.msk [vmem:[%s4264_s25 + $0x68] sm:$0xff] %vm171_vm0, %v2843_v62  ;;  %v2400_v48 = vadd.f32 %v2368_v1, %v2298_v31  ;;  %v1539_v56 = vadd.f32 %v1507_v36, %v1438_v41  ;;  %v2267_v0 = vmul.f32 %v4686_v51, %v4671_v8  ;;  %v1793_v46 = vmul.f32 %v4603_v55, %v1268_v7  ;;  %v4781_v1 = vld [vmem:[#allocation2 + $0x230] sm:$0xff] }
 0x177   : > { %v2197_v21 = vadd.f32 %v2165_v30, %v2095_v35  ;;  %v1740_v29 = vadd.f32 %v1708_v34, %v1639_v26  ;;  %v2776_v44 = vmul.f32 %v4704_v63, %v4758_v38  ;;  %v2369_v61 = vmul.f32 %v4644_v10, %v4762_v45  ;;  %v1764_v7 = vld [vmem:[#allocation2 + $0x1b3] sm:$0xff]  ;;  %v1270_v30 = vld [vmem:[#allocation2 + $0x1cb] sm:$0xff] }
 0x178   : > { %v2502_v2 = vadd.f32 %v2470_v24, %v2400_v48  ;;  %v1608_v39 = vmul.f32 %v4572_v15, %v1571_v18  ;;  %v2471_v6 = vmul.f32 %v4658_v20, %v4508_v50  ;;  %v1878_v16 = vmul.f32 %v4624_v5, %v1369_v43  ;;  %v1849_v24 = vld [vmem:[#allocation2 + $0x1b4] sm:$0xff] }
 0x179   : > { %v2299_v17 = vadd.f32 %v2267_v0, %v2197_v21  ;;  %v1825_v23 = vadd.f32 %v1793_v46, %v1740_v29  ;;  %v2573_v41 = vmul.f32 %v4679_v47, %v4566_v52  ;;  %v1709_v22 = vmul.f32 %v4585_v19, %v1672_v33  ;;  %v1371_v29 = vld [vmem:[#allocation2 + $0x1cc] sm:$0xff] }
 0x17a   : > { %v2604_v53 = vadd.f32 %v2572_v11, %v2502_v2  ;;  %v1640_v59 = vadd.f32 %v1608_v39, %v1539_v56  ;;  %v2675_v62 = vmul.f32 %v4697_v14, %v4710_v3  ;;  %v1963_v50 = vmul.f32 %v4597_v27, %v1470_v13  ;;  %v1934_v56 = vld [vmem:[#allocation2 + $0x1b5] sm:$0xff]  ;;  %v4800_v2 = vld [vmem:[#allocation2 + $0x168] sm:$0xff] }
 0x17b   : > { %v2401_v40 = vadd.f32 %v2369_v61, %v2299_v17  ;;  %v1910_v31 = vadd.f32 %v1878_v16, %v1825_v23  ;;  %v2777_v43 = vmul.f32 %v4704_v63, %v4781_v1  ;;  %v1794_v35 = vmul.f32 %v4603_v55, %v1764_v7  ;;  %v5523_v61 = vld [vmem:[#allocation54_spill] sm:$0xff]  ;;  %v5524_v39 = vld [vmem:[#allocation52_spill] sm:$0xff]  ;;  %v5525_v7 = vld [vmem:[#allocation53_spill] sm:$0xff] }
 0x17c   : > { %v2706_v36 = vadd.f32 %v2674_v58, %v2604_v53  ;;  %v1741_v18 = vadd.f32 %v1709_v22, %v1640_v59  ;;  %v2064_v48 = vmul.f32 %v4611_v37, %v4592_v57  ;;  %v2166_v11 = vmul.f32 %v4665_v54, %v4619_v49  ;;  %v5526_v53 = vld [vmem:[#allocation43_spill] sm:$0xff] }
 0x17d   : > { %v2503_v26 = vadd.f32 %v2471_v6, %v2401_v40  ;;  %v1995_v34 = vadd.f32 %v1963_v50, %v1910_v31  ;;  %v2268_v13 = vmul.f32 %v4686_v51, %v4735_v60  ;;  %v1879_v0 = vmul.f32 %v4624_v5, %v1849_v24  ;;  %v1572_v59 = vld [vmem:[#allocation2 + $0x1c6] sm:$0xff] }
 0x17e   : > { %v2808_v21 = vadd.f32 %v2776_v44, %v2706_v36  ;;  %v1826_v58 = vadd.f32 %v1794_v35, %v1741_v18  ;;  %v1238_v57 = vadd.f32 %v5524_v39, %v5523_v61  ;;  %v1307_v17 = vmul.f32 %v4457_v28, %v1270_v30  ;;  %v4808_v44 = vld [vmem:[%s5387_s2] ss:$0 sm:$0xff]  ;;  %v5527_v35 = vld [vmem:[#allocation44_spill] sm:$0xff] }
 0x17f   : > { %v2605_v46 = vadd.f32 %v2573_v41, %v2503_v26  ;;  %v2096_v33 = vadd.f32 %v2064_v48, %v1995_v34  ;;  %v1964_v16 = vmul.f32 %v4597_v27, %v1934_v56  ;;  %v1338_v41 = vadd.f32 %v5526_v53, %v5525_v7  ;;  %v1472_v34 = vld [vmem:[#allocation2 + $0x1cd] sm:$0xff] }
 0x180   : > { %v2844_v6 = vadd.f32 %v4808_v44, %v2808_v21  ;;  %v1911_v23 = vadd.f32 %v1879_v0, %v1826_v58  ;;  %v1339_v31 = vadd.f32 %v1307_v17, %v1238_v57  ;;  %v1408_v50 = vmul.f32 %v4467_v4, %v1371_v29  ;;  %v1673_v21 = vld [vmem:[#allocation2 + $0x1ca] sm:$0xff] }
 0x181   : > { %v2707_v22 = vadd.f32 %v2675_v62, %v2605_v46  ;;  %v2198_v40 = vadd.f32 %v2166_v11, %v2096_v33  ;;  %v2370_v24 = vmul.f32 %v4644_v10, %v4800_v2  ;;  %v2065_v18 = vmul.f32 %v4611_v37, %v4652_v42  ;;  %v4824_v58 = vld [vmem:[#allocation2 + $0x248] sm:$0xff]  ;;  %v5528_v33 = vld [vmem:[#allocation45_spill] sm:$0xff] }
 0x182   : > { %2876 = vst.msk [vmem:[%s4264_s25 + $0x70] sm:$0xff] %vm171_vm0, %v2844_v6  ;;  %v1996_v36 = vadd.f32 %v1964_v16, %v1911_v23  ;;  %v1439_v26 = vadd.f32 %v5527_v35, %v1338_v41  ;;  %v2472_v62 = vmul.f32 %v4658_v20, %v4546_v12  ;;  %v1440_v11 = vadd.f32 %v1408_v50, %v1339_v31  ;;  %v4833_v12 = vld [vmem:[#allocation2 + $0x170] sm:$0xff] }
 0x183   : > { %v2809_v48 = vadd.f32 %v2777_v43, %v2707_v22  ;;  %v2300_v56 = vadd.f32 %v2268_v13, %v2198_v40  ;;  %v2167_v46 = vmul.f32 %v4665_v54, %v4671_v8  ;;  %v1609_v42 = vmul.f32 %v4572_v15, %v1572_v59  ;;  %v1573_v17 = vld [vmem:[#allocation2 + $0x1ce] sm:$0xff] }
 0x184   : > { %v2097_v0 = vadd.f32 %v2065_v18, %v1996_v36  ;;  %v1540_v61 = vadd.f32 %v5528_v33, %v1439_v26  ;;  %v2574_v13 = vmul.f32 %v4679_v47, %v4669_v9  ;;  %v1509_v57 = vmul.f32 %v4489_v32, %v1472_v34  ;;  %v4847_v50 = vld [vmem:[#allocation2 + $0x250] sm:$0xff] }
 0x185   : > { %v2845_v39 = vadd.f32 %v4808_v44, %v2809_v48  ;;  %v2402_v43 = vadd.f32 %v2370_v24, %v2300_v56  ;;  %v2269_v23 = vmul.f32 %v4686_v51, %v4762_v45  ;;  %v1710_v7 = vmul.f32 %v4585_v19, %v1673_v21  ;;  %v1674_v18 = vld [vmem:[#allocation2 + $0x1d2] sm:$0xff] }
 0x186   : > { %v2199_v6 = vadd.f32 %v2167_v46, %v2097_v0  ;;  %v1641_v16 = vadd.f32 %v1609_v42, %v1540_v61  ;;  %v2676_v41 = vmul.f32 %v4697_v14, %v4758_v38  ;;  %v2778_v59 = vmul.f32 %v4704_v63, %v4824_v58  ;;  %v1765_v46 = vld [vmem:[#allocation2 + $0x1d3] sm:$0xff] }
 0x187   : > { %2877 = vst.msk [vmem:[%s4264_s25 + $0x78] sm:$0xff] %vm171_vm0, %v2845_v39  ;;  %v2504_v53 = vadd.f32 %v2472_v62, %v2402_v43  ;;  %v1541_v22 = vadd.f32 %v1509_v57, %v1440_v11  ;;  %v2371_v31 = vmul.f32 %v4644_v10, %v4833_v12  ;;  %v1795_v36 = vmul.f32 %v4603_v55, %v1270_v30  ;;  %v1850_v42 = vld [vmem:[#allocation2 + $0x1d4] sm:$0xff] }
 0x188   : > { %v2301_v40 = vadd.f32 %v2269_v23, %v2199_v6  ;;  %v1742_v24 = vadd.f32 %v1710_v7, %v1641_v16  ;;  %v2473_v26 = vmul.f32 %v4658_v20, %v4566_v52  ;;  %v2575_v48 = vmul.f32 %v4679_v47, %v4710_v3  ;;  %v4866_v23 = vld [vmem:[#allocation2 + $0x188] sm:$0xff] }
 0x189   : > { %v2606_v35 = vadd.f32 %v2574_v13, %v2504_v53  ;;  %v1610_v56 = vmul.f32 %v4572_v15, %v1573_v17  ;;  %v2677_v11 = vmul.f32 %v4697_v14, %v4781_v1  ;;  %v1880_v0 = vmul.f32 %v4624_v5, %v1371_v29  ;;  %v1272_v17 = vld [vmem:[#allocation2 + $0x1eb] sm:$0xff] }
 0x18a   : > { %v2403_v62 = vadd.f32 %v2371_v31, %v2301_v40  ;;  %v1827_v21 = vadd.f32 %v1795_v36, %v1742_v24  ;;  %v2779_v30 = vmul.f32 %v4704_v63, %v4847_v50  ;;  %v1711_v52 = vmul.f32 %v4585_v19, %v1674_v18  ;;  %v1935_v40 = vld [vmem:[#allocation2 + $0x1d5] sm:$0xff]  ;;  %v5529_v24 = vld [vmem:[#allocation60_spill] sm:$0xff] }
 0x18b   : > { %v2708_v33 = vadd.f32 %v2676_v41, %v2606_v35  ;;  %v1642_v61 = vadd.f32 %v1610_v56, %v1541_v22  ;;  %v1965_v13 = vmul.f32 %v4597_v27, %v1472_v34  ;;  %v2066_v57 = vmul.f32 %v4611_v37, %v4619_v49  ;;  %v1373_v49 = vld [vmem:[#allocation2 + $0x1ec] sm:$0xff]  ;;  %v5530_v36 = vld [vmem:[#allocation58_spill] sm:$0xff] }
 0x18c   : > { %v2505_v39 = vadd.f32 %v2473_v26, %v2403_v62  ;;  %v1912_v43 = vadd.f32 %v1880_v0, %v1827_v21  ;;  %v2168_v29 = vmul.f32 %v4665_v54, %v4735_v60  ;;  %v1796_v7 = vmul.f32 %v4603_v55, %v1765_v46  ;;  %v5531_v62 = vld [vmem:[#allocation59_spill] sm:$0xff]  ;;  %v5532_v21 = vld [vmem:[#allocation49_spill] sm:$0xff] }
 0x18d   : > { %v2810_v6 = vadd.f32 %v2778_v59, %v2708_v33  ;;  %v1743_v16 = vadd.f32 %v1711_v52, %v1642_v61  ;;  %v2270_v22 = vmul.f32 %v4686_v51, %v4800_v2  ;;  %v1881_v34 = vmul.f32 %v4624_v5, %v1850_v42  ;;  %v1474_v46 = vld [vmem:[#allocation2 + $0x1ed] sm:$0xff] }
 0x18e   : > { %v2607_v53 = vadd.f32 %v2575_v48, %v2505_v39  ;;  %v1997_v41 = vadd.f32 %v1965_v13, %v1912_v43  ;;  %v1240_v18 = vadd.f32 %v5530_v36, %v5529_v24  ;;  %v1309_v35 = vmul.f32 %v4457_v28, %v1272_v17  ;;  %v1574_v33 = vld [vmem:[#allocation2 + $0x1e6] sm:$0xff]  ;;  %v1575_v36 = vld [vmem:[#allocation2 + $0x1ee] sm:$0xff] }
 0x18f   : > { %v2846_v59 = vadd.f32 %v4808_v44, %v2810_v6  ;;  %v1828_v31 = vadd.f32 %v1796_v7, %v1743_v16  ;;  %v2372_v48 = vmul.f32 %v4644_v10, %v4866_v23  ;;  %v1340_v0 = vadd.f32 %v5532_v21, %v5531_v62 }
 0x190   : > { %v2709_v26 = vadd.f32 %v2677_v11, %v2607_v53  ;;  %v2098_v56 = vadd.f32 %v2066_v57, %v1997_v41  ;;  %v1966_v52 = vmul.f32 %v4597_v27, %v1935_v40  ;;  %v1341_v42 = vadd.f32 %v1309_v35, %v1240_v18  ;;  %v5533_v57 = vld [vmem:[#allocation50_spill] sm:$0xff] }
 0x191   : > { %2878 = vst.msk [vmem:[%s4264_s25 + $0x80] sm:$0xff] %vm171_vm0, %v2846_v59  ;;  %v1913_v61 = vadd.f32 %v1881_v34, %v1828_v31  ;;  %v1410_v39 = vmul.f32 %v4467_v4, %v1373_v49  ;;  %v2474_v11 = vmul.f32 %v4658_v20, %v4669_v9  ;;  %v1441_v6 = vadd.f32 %v5533_v57, %v1340_v0  ;;  %v1675_v34 = vld [vmem:[#allocation2 + $0x1ea] sm:$0xff] }
 0x192   : > { %v2811_v43 = vadd.f32 %v2779_v30, %v2709_v26  ;;  %v2200_v13 = vadd.f32 %v2168_v29, %v2098_v56  ;;  %v2067_v7 = vmul.f32 %v4611_v37, %v4671_v8  ;;  %v1511_v41 = vmul.f32 %v4489_v32, %v1474_v46  ;;  %v4891_v31 = vld [vmem:[#allocation2 + $0x268] sm:$0xff]  ;;  %v4893_v30 = vld [vmem:[#allocation2 + $0x190] sm:$0xff]  ;;  %v5534_v29 = vld [vmem:[#allocation51_spill] sm:$0xff] }
 0x193   : > { %v1998_v16 = vadd.f32 %v1966_v52, %v1913_v61  ;;  %v1442_v53 = vadd.f32 %v1410_v39, %v1341_v42  ;;  %v1542_v9 = vadd.f32 %v5534_v29, %v1441_v6  ;;  %v1611_v24 = vmul.f32 %v4572_v15, %v1574_v33  ;;  %v1676_v42 = vld [vmem:[#allocation2 + $0x1f2] sm:$0xff] }
 0x194   : > { %v2847_v40 = vadd.f32 %v4808_v44, %v2811_v43  ;;  %v2302_v59 = vadd.f32 %v2270_v22, %v2200_v13  ;;  %v2576_v18 = vmul.f32 %v4679_v47, %v4758_v38  ;;  %v2678_v8 = vmul.f32 %v4697_v14, %v4824_v58  ;;  %v4912_v43 = vld [vmem:[#allocation2 + $0x270] sm:$0xff] }
 0x195   : > { %v2099_v35 = vadd.f32 %v2067_v7, %v1998_v16  ;;  %v2169_v26 = vmul.f32 %v4665_v54, %v4762_v45  ;;  %v1543_v56 = vadd.f32 %v1511_v41, %v1442_v53  ;;  %v1643_v62 = vadd.f32 %v1611_v24, %v1542_v9  ;;  %v1766_v41 = vld [vmem:[#allocation2 + $0x1f3] sm:$0xff] }
 0x196   : > { %2879 = vst.msk [vmem:[%s4264_s25 + $0x88] sm:$0xff] %vm171_vm0, %v2847_v40  ;;  %v2404_v22 = vadd.f32 %v2372_v48, %v2302_v59  ;;  %v1712_v21 = vmul.f32 %v4585_v19, %v1675_v34  ;;  %v2780_v0 = vmul.f32 %v4704_v63, %v4891_v31  ;;  %v2271_v61 = vmul.f32 %v4686_v51, %v4833_v12  ;;  %v1851_v24 = vld [vmem:[#allocation2 + $0x1f4] sm:$0xff] }
 0x197   : > { %v2201_v33 = vadd.f32 %v2169_v26, %v2099_v35  ;;  %v2373_v52 = vmul.f32 %v4644_v10, %v4893_v30  ;;  %v1797_v48 = vmul.f32 %v4603_v55, %v1272_v17  ;;  %v1612_v57 = vmul.f32 %v4572_v15, %v1575_v36 }
 0x198   : > { %v2506_v39 = vadd.f32 %v2474_v11, %v2404_v22  ;;  %v1744_v13 = vadd.f32 %v1712_v21, %v1643_v62  ;;  %v2475_v16 = vmul.f32 %v4658_v20, %v4710_v3  ;;  %v2577_v7 = vmul.f32 %v4679_v47, %v4781_v1 }
 0x199   : > { %v2303_v6 = vadd.f32 %v2271_v61, %v2201_v33  ;;  %v1882_v53 = vmul.f32 %v4624_v5, %v1373_v49  ;;  %v1644_v11 = vadd.f32 %v1612_v57, %v1543_v56  ;;  %v1713_v59 = vmul.f32 %v4585_v19, %v1676_v42  ;;  %v1936_v33 = vld [vmem:[#allocation2 + $0x1f5] sm:$0xff]  ;;  %v1375_v42 = vld [vmem:[#allocation2 + $0x20c] sm:$0xff] }
 0x19a   : > { %v2608_v34 = vadd.f32 %v2576_v18, %v2506_v39  ;;  %v1829_v40 = vadd.f32 %v1797_v48, %v1744_v13  ;;  %v2679_v17 = vmul.f32 %v4697_v14, %v4847_v50  ;;  %v2781_v9 = vmul.f32 %v4704_v63, %v4912_v43  ;;  %v1274_v18 = vld [vmem:[#allocation2 + $0x20b] sm:$0xff]  ;;  %v5535_v48 = vld [vmem:[#allocation66_spill] sm:$0xff] }
 0x19b   : > { %v2405_v29 = vadd.f32 %v2373_v52, %v2303_v6  ;;  %v1967_v3 = vmul.f32 %v4597_v27, %v1474_v46  ;;  %v1745_v26 = vadd.f32 %v1713_v59, %v1644_v11  ;;  %v1798_v49 = vmul.f32 %v4603_v55, %v1766_v41  ;;  %v4935_v13 = vld [vmem:[#allocation2 + $0x1a8] sm:$0xff] }
 0x19c   : > { %v2710_v36 = vadd.f32 %v2678_v8, %v2608_v34  ;;  %v1914_v35 = vadd.f32 %v1882_v53, %v1829_v40  ;;  %v2068_v56 = vmul.f32 %v4611_v37, %v4735_v60  ;;  %v2170_v62 = vmul.f32 %v4665_v54, %v4800_v2  ;;  %v5536_v57 = vld [vmem:[#allocation64_spill] sm:$0xff]  ;;  %v5538_v53 = vld [vmem:[#allocation55_spill] sm:$0xff] }
 0x19d   : > { %v2507_v22 = vadd.f32 %v2475_v16, %v2405_v29  ;;  %v2272_v21 = vmul.f32 %v4686_v51, %v4866_v23  ;;  %v1830_v52 = vadd.f32 %v1798_v49, %v1745_v26  ;;  %v1883_v8 = vmul.f32 %v4624_v5, %v1851_v24  ;;  %v5537_v16 = vld [vmem:[#allocation65_spill] sm:$0xff]  ;;  %v1576_v34 = vld [vmem:[#allocation2 + $0x206] sm:$0xff] }
 0x19e   : > { %v2812_v61 = vadd.f32 %v2780_v0, %v2710_v36  ;;  %v1999_v46 = vadd.f32 %v1967_v3, %v1914_v35  ;;  %v1242_v60 = vadd.f32 %v5536_v57, %v5535_v48  ;;  %v1311_v6 = vmul.f32 %v4457_v28, %v1274_v18  ;;  %v5539_v24 = vld [vmem:[#allocation56_spill] sm:$0xff]  ;;  %v4961_v57 = vld [vmem:[#allocation2 + $0x1b0] sm:$0xff] }
 0x19f   : > { %v2609_v39 = vadd.f32 %v2577_v7, %v2507_v22  ;;  %v1342_v41 = vadd.f32 %v5538_v53, %v5537_v16  ;;  %v1915_v11 = vadd.f32 %v1883_v8, %v1830_v52  ;;  %v1968_v59 = vmul.f32 %v4597_v27, %v1936_v33  ;;  %v1476_v22 = vld [vmem:[#allocation2 + $0x20d] sm:$0xff] }
 0x1a0   : > { %v2848_v0 = vadd.f32 %v4808_v44, %v2812_v61  ;;  %v2100_v40 = vadd.f32 %v2068_v56, %v1999_v46  ;;  %v1343_v3 = vadd.f32 %v1311_v6, %v1242_v60  ;;  %v1412_v7 = vmul.f32 %v4467_v4, %v1375_v42  ;;  %v1677_v56 = vld [vmem:[#allocation2 + $0x20a] sm:$0xff] }
 0x1a1   : > { %v2711_v29 = vadd.f32 %v2679_v17, %v2609_v39  ;;  %v1443_v36 = vadd.f32 %v5539_v24, %v1342_v41  ;;  %v2374_v28 = vmul.f32 %v4644_v10, %v4935_v13  ;;  %v2000_v26 = vadd.f32 %v1968_v59, %v1915_v11  ;;  %v5540_v17 = vld [vmem:[#allocation57_spill] sm:$0xff] }
 0x1a2   : > { %2880 = vst.msk [vmem:[%s4264_s25 + $0x90] sm:$0xff] %vm171_vm0, %v2848_v0  ;;  %v2202_v35 = vadd.f32 %v2170_v62, %v2100_v40  ;;  %v2069_v49 = vmul.f32 %v4611_v37, %v4762_v45  ;;  %v1444_v33 = vadd.f32 %v1412_v7, %v1343_v3  ;;  %v1613_v4 = vmul.f32 %v4572_v15, %v1576_v34  ;;  %v4959_v45 = vld [vmem:[#allocation2 + $0x288] sm:$0xff]  ;;  %v1678_v7 = vld [vmem:[#allocation2 + $0x212] sm:$0xff] }
 0x1a3   : > { %v2813_v61 = vadd.f32 %v2781_v9, %v2711_v29  ;;  %v1544_v46 = vadd.f32 %v5540_v17, %v1443_v36  ;;  %v2476_v62 = vmul.f32 %v4658_v20, %v4758_v38  ;;  %v2171_v39 = vmul.f32 %v4665_v54, %v4833_v12  ;;  %v1577_v16 = vld [vmem:[#allocation2 + $0x20e] sm:$0xff] }
 0x1a4   : > { %v2304_v52 = vadd.f32 %v2272_v21, %v2202_v35  ;;  %v2101_v8 = vadd.f32 %v2069_v49, %v2000_v26  ;;  %v1513_v9 = vmul.f32 %v4489_v32, %v1476_v22  ;;  %v1714_v6 = vmul.f32 %v4585_v19, %v1677_v56  ;;  %v4980_v36 = vld [vmem:[#allocation2 + $0x290] sm:$0xff] }
 0x1a5   : > { %v2849_v48 = vadd.f32 %v4808_v44, %v2813_v61  ;;  %v1645_v60 = vadd.f32 %v1613_v4, %v1544_v46  ;;  %v2578_v38 = vmul.f32 %v4679_v47, %v4824_v58  ;;  %v2273_v41 = vmul.f32 %v4686_v51, %v4893_v30 }
 0x1a6   : > { %v2406_v21 = vadd.f32 %v2374_v28, %v2304_v52  ;;  %v2203_v53 = vadd.f32 %v2171_v39, %v2101_v8  ;;  %v2680_v34 = vmul.f32 %v4697_v14, %v4891_v31  ;;  %v1545_v0 = vadd.f32 %v1513_v9, %v1444_v33  ;;  %v1767_v33 = vld [vmem:[#allocation2 + $0x213] sm:$0xff] }
 0x1a7   : > { %2881 = vst.msk [vmem:[%s4264_s25 + $0x98] sm:$0xff] %vm171_vm0, %v2849_v48  ;;  %v1746_v40 = vadd.f32 %v1714_v6, %v1645_v60  ;;  %v1799_v32 = vmul.f32 %v4603_v55, %v1274_v18  ;;  %v2782_v59 = vmul.f32 %v4704_v63, %v4959_v45  ;;  %v2375_v3 = vmul.f32 %v4644_v10, %v4961_v57  ;;  %v1852_v52 = vld [vmem:[#allocation2 + $0x214] sm:$0xff]  ;;  %v4994_v48 = vld [vmem:[#allocation2 + $0x22b] sm:$0xff] }
 0x1a8   : > { %v2508_v11 = vadd.f32 %v2476_v62, %v2406_v21  ;;  %v2305_v29 = vadd.f32 %v2273_v41, %v2203_v53  ;;  %v2477_v24 = vmul.f32 %v4658_v20, %v4781_v1  ;;  %v1884_v28 = vmul.f32 %v4624_v5, %v1375_v42 }
 0x1a9   : > { %v1831_v35 = vadd.f32 %v1799_v32, %v1746_v40  ;;  %v1614_v26 = vmul.f32 %v4572_v15, %v1577_v16  ;;  %v2579_v56 = vmul.f32 %v4679_v47, %v4847_v50  ;;  %v2681_v61 = vmul.f32 %v4697_v14, %v4912_v43  ;;  %v1937_v16 = vld [vmem:[#allocation2 + $0x215] sm:$0xff]  ;;  %v5541_v32 = vld [vmem:[#allocation72_spill] sm:$0xff] }
 0x1aa   : > { %v2610_v18 = vadd.f32 %v2578_v38, %v2508_v11  ;;  %v2407_v49 = vadd.f32 %v2375_v3, %v2305_v29  ;;  %v1969_v46 = vmul.f32 %v4597_v27, %v1476_v22  ;;  %v1715_v4 = vmul.f32 %v4585_v19, %v1678_v7  ;;  %v5542_v11 = vld [vmem:[#allocation70_spill] sm:$0xff]  ;;  %v5009_v3 = vld [vmem:[%s5386_s1 + $0x9] ss:$0 sm:$0xff] }
 0x1ab   : > { %v1916_v17 = vadd.f32 %v1884_v28, %v1831_v35  ;;  %v1646_v1 = vadd.f32 %v1614_v26, %v1545_v0  ;;  %v2783_v8 = vmul.f32 %v4704_v63, %v4980_v36  ;;  %v2070_v39 = vmul.f32 %v4611_v37, %v4800_v2  ;;  %v5002_v2 = vld [vmem:[#allocation2 + $0x1c8] sm:$0xff]  ;;  %v5543_v28 = vld [vmem:[#allocation71_spill] sm:$0xff]  ;;  %v5544_v26 = vld [vmem:[#allocation61_spill] sm:$0xff] }
 0x1ac   : > { %v2712_v62 = vadd.f32 %v2680_v34, %v2610_v18  ;;  %v2509_v42 = vadd.f32 %v2477_v24, %v2407_v49  ;;  %v2172_v60 = vmul.f32 %v4665_v54, %v4866_v23  ;;  %v1800_v22 = vmul.f32 %v4603_v55, %v1767_v33  ;;  %v1377_v34 = vld [vmem:[#allocation2 + $0x22c] sm:$0xff] }
 0x1ad   : > { %v2001_v9 = vadd.f32 %v1969_v46, %v1916_v17  ;;  %v1747_v6 = vadd.f32 %v1715_v4, %v1646_v1  ;;  %v2274_v53 = vmul.f32 %v4686_v51, %v4935_v13  ;;  %v1885_v41 = vmul.f32 %v4624_v5, %v1852_v52  ;;  %v1578_v49 = vld [vmem:[#allocation2 + $0x226] sm:$0xff] }
 0x1ae   : > { %v2814_v21 = vadd.f32 %v2782_v59, %v2712_v62  ;;  %v2611_v38 = vadd.f32 %v2579_v56, %v2509_v42  ;;  %v1244_v29 = vadd.f32 %v5542_v11, %v5541_v32  ;;  %v1313_v59 = vmul.f32 %v5009_v3, %v4994_v48  ;;  %v5020_v46 = vld [vmem:[%s5386_s1 + $0xa] ss:$0 sm:$0xff]  ;;  %v1478_v4 = vld [vmem:[#allocation2 + $0x22d] sm:$0xff]  ;;  %v5545_v42 = vld [vmem:[#allocation62_spill] sm:$0xff] }
 0x1af   : > { %v2102_v0 = vadd.f32 %v2070_v39, %v2001_v9  ;;  %v1832_v40 = vadd.f32 %v1800_v22, %v1747_v6  ;;  %v1970_v35 = vmul.f32 %v4597_v27, %v1937_v16  ;;  %v1344_v18 = vadd.f32 %v5544_v26, %v5543_v28  ;;  %v1679_v16 = vld [vmem:[#allocation2 + $0x22a] sm:$0xff] }
 0x1b0   : > { %v2850_v7 = vadd.f32 %v4808_v44, %v2814_v21  ;;  %v2713_v24 = vadd.f32 %v2681_v61, %v2611_v38  ;;  %v1345_v17 = vadd.f32 %v1313_v59, %v1244_v29  ;;  %v1414_v1 = vmul.f32 %v5020_v46, %v1377_v34  ;;  %v5033_v38 = vld [vmem:[#allocation2 + $0x2a8] sm:$0xff]  ;;  %v5047_v59 = vld [vmem:[#allocation2 + $0x1d0] sm:$0xff] }
 0x1b1   : > { %v2204_v56 = vadd.f32 %v2172_v60, %v2102_v0  ;;  %v1917_v33 = vadd.f32 %v1885_v41, %v1832_v40  ;;  %v2376_v52 = vmul.f32 %v4644_v10, %v5002_v2  ;;  %v2478_v62 = vmul.f32 %v4658_v20, %v4824_v58  ;;  %v5546_v41 = vld [vmem:[#allocation63_spill] sm:$0xff]  ;;  %v1579_v40 = vld [vmem:[#allocation2 + $0x22e] sm:$0xff] }
 0x1b2   : > { %2882 = vst.msk [vmem:[%s4264_s25 + $0xa0] sm:$0xff] %vm171_vm0, %v2850_v7  ;;  %v2815_v61 = vadd.f32 %v2783_v8, %v2713_v24  ;;  %v1445_v39 = vadd.f32 %v5545_v42, %v1344_v18  ;;  %v2071_v6 = vmul.f32 %v4611_v37, %v4833_v12  ;;  %v1446_v22 = vadd.f32 %v1414_v1, %v1345_v17  ;;  %v5038_v8 = vld [vmem:[%s5386_s1 + $0xb] ss:$0 sm:$0xff]  ;;  %v5060_v1 = vld [vmem:[#allocation2 + $0x2b0] sm:$0xff] }
 0x1b3   : > { %v2306_v9 = vadd.f32 %v2274_v53, %v2204_v56  ;;  %v2002_v60 = vadd.f32 %v1970_v35, %v1917_v33  ;;  %v1515_v58 = vmul.f32 %v5038_v8, %v1478_v4  ;;  %v1615_v0 = vmul.f32 %v4572_v15, %v1578_v49  ;;  %v1680_v33 = vld [vmem:[#allocation2 + $0x232] sm:$0xff] }
 0x1b4   : > { %v2851_v21 = vadd.f32 %v4808_v44, %v2815_v61  ;;  %v1546_v53 = vadd.f32 %v5546_v41, %v1445_v39  ;;  %v2580_v12 = vmul.f32 %v4679_v47, %v4891_v31  ;;  %v2173_v29 = vmul.f32 %v4665_v54, %v4893_v30 }
 0x1b5   : > { %v2408_v32 = vadd.f32 %v2376_v52, %v2306_v9  ;;  %v2103_v11 = vadd.f32 %v2071_v6, %v2002_v60  ;;  %v2682_v7 = vmul.f32 %v4697_v14, %v4959_v45  ;;  %v1547_v24 = vadd.f32 %v1515_v58, %v1446_v22  ;;  %v1768_v6 = vld [vmem:[#allocation2 + $0x233] sm:$0xff] }
 0x1b6   : > { %2883 = vst.msk [vmem:[%s4264_s25 + $0xa8] sm:$0xff] %vm171_vm0, %v2851_v21  ;;  %v1647_v35 = vadd.f32 %v1615_v0, %v1546_v53  ;;  %v1716_v28 = vmul.f32 %v4585_v19, %v1679_v16  ;;  %v2784_v18 = vmul.f32 %v4704_v63, %v5033_v38  ;;  %v2275_v56 = vmul.f32 %v4686_v51, %v4961_v57  ;;  %v1853_v0 = vld [vmem:[#allocation2 + $0x234] sm:$0xff] }
 0x1b7   : > { %v2510_v26 = vadd.f32 %v2478_v62, %v2408_v32  ;;  %v2205_v49 = vadd.f32 %v2173_v29, %v2103_v11  ;;  %v2377_v17 = vmul.f32 %v4644_v10, %v5047_v59  ;;  %v1801_v52 = vmul.f32 %v4603_v55, %v4994_v48  ;;  %v5077_v11 = vld [vmem:[#allocation2 + $0x24b] sm:$0xff] }
 0x1b8   : > { %v1748_v61 = vadd.f32 %v1716_v28, %v1647_v35  ;;  %v1616_v42 = vmul.f32 %v4572_v15, %v1579_v40  ;;  %v2479_v9 = vmul.f32 %v4658_v20, %v4847_v50  ;;  %v2581_v60 = vmul.f32 %v4679_v47, %v4912_v43 }
 0x1b9   : > { %v2612_v62 = vadd.f32 %v2580_v12, %v2510_v26  ;;  %v2307_v39 = vadd.f32 %v2275_v56, %v2205_v49  ;;  %v1886_v16 = vmul.f32 %v4624_v5, %v1377_v34  ;;  %v1717_v58 = vmul.f32 %v4585_v19, %v1680_v33  ;;  %v5088_v49 = vld [vmem:[#allocation2 + $0x24c] sm:$0xff] }
 0x1ba   : > { %v1833_v22 = vadd.f32 %v1801_v52, %v1748_v61  ;;  %v1648_v21 = vadd.f32 %v1616_v42, %v1547_v24  ;;  %v2683_v15 = vmul.f32 %v4697_v14, %v4980_v36  ;;  %v2785_v48 = vmul.f32 %v4704_v63, %v5060_v1  ;;  %v1938_v24 = vld [vmem:[#allocation2 + $0x235] sm:$0xff]  ;;  %v5548_v33 = vld [vmem:[#allocation76_spill] sm:$0xff] }
 0x1bb   : > { %v2714_v41 = vadd.f32 %v2682_v7, %v2612_v62  ;;  %v2409_v53 = vadd.f32 %v2377_v17, %v2307_v39  ;;  %v1971_v40 = vmul.f32 %v4597_v27, %v1478_v4  ;;  %v1802_v12 = vmul.f32 %v4603_v55, %v1768_v6  ;;  %v5085_v4 = vld [vmem:[#allocation2 + $0x1e8] sm:$0xff]  ;;  %v5549_v39 = vld [vmem:[#allocation77_spill] sm:$0xff] }
 0x1bc   : > { %v1918_v50 = vadd.f32 %v1886_v16, %v1833_v22  ;;  %v1749_v32 = vadd.f32 %v1717_v58, %v1648_v21  ;;  %v2072_v19 = vmul.f32 %v4611_v37, %v4866_v23  ;;  %v2174_v7 = vmul.f32 %v4665_v54, %v4935_v13  ;;  %v5547_v23 = vld [vmem:[#allocation78_spill] sm:$0xff]  ;;  %v1580_v22 = vld [vmem:[#allocation2 + $0x246] sm:$0xff] }
 0x1bd   : > { %v2816_v34 = vadd.f32 %v2784_v18, %v2714_v41  ;;  %v2511_v29 = vadd.f32 %v2479_v9, %v2409_v53  ;;  %v2276_v28 = vmul.f32 %v4686_v51, %v5002_v2  ;;  %v1887_v55 = vmul.f32 %v4624_v5, %v1853_v0  ;;  %v5550_v9 = vld [vmem:[#allocation67_spill] sm:$0xff] }
 0x1be   : > { %v2003_v35 = vadd.f32 %v1971_v40, %v1918_v50  ;;  %v1834_v26 = vadd.f32 %v1802_v12, %v1749_v32  ;;  %v1246_v17 = vadd.f32 %v5548_v33, %v5547_v23  ;;  %v1315_v61 = vmul.f32 %v5009_v3, %v5077_v11  ;;  %v1480_v50 = vld [vmem:[#allocation2 + $0x24d] sm:$0xff] }
 0x1bf   : > { %v2852_v18 = vadd.f32 %v4808_v44, %v2816_v34  ;;  %v2613_v56 = vadd.f32 %v2581_v60, %v2511_v29  ;;  %v1972_v62 = vmul.f32 %v4597_v27, %v1938_v24  ;;  %v1346_v6 = vadd.f32 %v5550_v9, %v5549_v39  ;;  %v5551_v27 = vld [vmem:[#allocation68_spill] sm:$0xff]  ;;  %v5147_v9 = vld [vmem:[#allocation2 + $0x2d0] sm:$0xff] }
 0x1c0   : > { %v2104_v52 = vadd.f32 %v2072_v19, %v2003_v35  ;;  %v1919_v42 = vadd.f32 %v1887_v55, %v1834_v26  ;;  %v2378_v60 = vmul.f32 %v4644_v10, %v5085_v4  ;;  %v1347_v16 = vadd.f32 %v1315_v61, %v1246_v17  ;;  %v1681_v12 = vld [vmem:[#allocation2 + $0x24a] sm:$0xff]  ;;  %v5143_v61 = vld [vmem:[%s5386_s1 + $0x14] ss:$0 sm:$0xff] }
 0x1c1   : > { %2884 = vst.msk [vmem:[%s4264_s25 + $0xb0] sm:$0xff] %vm171_vm0, %v2852_v18  ;;  %v2715_v5 = vadd.f32 %v2683_v15, %v2613_v56  ;;  %v1416_v21 = vmul.f32 %v5020_v46, %v5088_v49  ;;  %v2073_v53 = vmul.f32 %v4611_v37, %v4893_v30  ;;  %v1447_v0 = vadd.f32 %v5551_v27, %v1346_v6  ;;  %v5111_v29 = vld [vmem:[#allocation2 + $0x2c8] sm:$0xff]  ;;  %v5552_v37 = vld [vmem:[#allocation69_spill] sm:$0xff] }
 0x1c2   : > { %v2206_v58 = vadd.f32 %v2174_v7, %v2104_v52  ;;  %v2004_v41 = vadd.f32 %v1972_v62, %v1919_v42  ;;  %v2480_v32 = vmul.f32 %v4658_v20, %v4891_v31  ;;  %v2175_v15 = vmul.f32 %v4665_v54, %v4961_v57  ;;  %v5113_v7 = vld [vmem:[#allocation2 + $0x1f0] sm:$0xff]  ;;  %v5131_v23 = vld [vmem:[%s5386_s1 + $0xd] ss:$0 sm:$0xff] }
 0x1c3   : > { %v2817_v40 = vadd.f32 %v2785_v48, %v2715_v5  ;;  %v1448_v10 = vadd.f32 %v1416_v21, %v1347_v16  ;;  %v1548_v30 = vadd.f32 %v5552_v37, %v1447_v0  ;;  %v5119_v48 = vld [vmem:[%s5386_s1 + $0xc] ss:$0 sm:$0xff]  ;;  %v2582_v24 = vmul.f32 %v4679_v47, %v4959_v45  ;;  %v1581_v26 = vld [vmem:[#allocation2 + $0x24e] sm:$0xff] }
 0x1c4   : > { %v2308_v34 = vadd.f32 %v2276_v28, %v2206_v58  ;;  %v2105_v19 = vadd.f32 %v2073_v53, %v2004_v41  ;;  %v1617_v31 = vmul.f32 %v5119_v48, %v1580_v22  ;;  %v2277_v35 = vmul.f32 %v4686_v51, %v5047_v59  ;;  %v5152_v22 = vld [vmem:[%s5386_s1 + $0xe] ss:$0 sm:$0xff] }
 0x1c5   : > { %v2853_v54 = vadd.f32 %v4808_v44, %v2817_v40  ;;  %v1517_v28 = vmul.f32 %v5038_v8, %v1480_v50  ;;  %v1718_v33 = vmul.f32 %v5131_v23, %v1681_v12  ;;  %v2684_v17 = vmul.f32 %v4697_v14, %v5033_v38  ;;  %v5166_v40 = vld [vmem:[%s5386_s1 + $0xf] ss:$0 sm:$0xff] }
 0x1c6   : > { %v2410_v55 = vadd.f32 %v2378_v60, %v2308_v34  ;;  %v2207_v18 = vadd.f32 %v2175_v15, %v2105_v19  ;;  %v1649_v56 = vadd.f32 %v1617_v31, %v1548_v30  ;;  %v2786_v51 = vmul.f32 %v4704_v63, %v5111_v29  ;;  %v1682_v60 = vld [vmem:[#allocation2 + $0x252] sm:$0xff] }
 0x1c7   : > { %2885 = vst.msk [vmem:[%s4264_s25 + $0xb8] sm:$0xff] %vm171_vm0, %v2853_v54  ;;  %v2379_v52 = vmul.f32 %v5143_v61, %v5113_v7  ;;  %v1549_v42 = vadd.f32 %v1517_v28, %v1448_v10  ;;  %v1803_v5 = vmul.f32 %v5152_v22, %v5077_v11  ;;  %v2481_v16 = vmul.f32 %v4658_v20, %v4912_v43  ;;  %v1769_v20 = vld [vmem:[#allocation2 + $0x253] sm:$0xff]  ;;  %v1280_v37 = vld [vmem:[#allocation2 + $0x26b] sm:$0xff] }
 0x1c8   : > { %v2512_v62 = vadd.f32 %v2480_v32, %v2410_v55  ;;  %v2309_v39 = vadd.f32 %v2277_v35, %v2207_v18  ;;  %v1750_v6 = vadd.f32 %v1718_v33, %v1649_v56  ;;  %v2583_v21 = vmul.f32 %v4679_v47, %v4980_v36  ;;  %v1854_v10 = vld [vmem:[#allocation2 + $0x254] sm:$0xff]  ;;  %v5196_v31 = vld [vmem:[%s5386_s1 + $0x13] ss:$0 sm:$0xff]  ;;  %v5202_v33 = vld [vmem:[#allocation2 + $0x208] sm:$0xff] }
 0x1c9   : > { %v2685_v58 = vmul.f32 %v4697_v14, %v5060_v1  ;;  %v1618_v41 = vmul.f32 %v5119_v48, %v1581_v26  ;;  %v1888_v11 = vmul.f32 %v5166_v40, %v5088_v49  ;;  %v2787_v47 = vmul.f32 %v4704_v63, %v5147_v9  ;;  %v5175_v14 = vld [vmem:[%s5386_s1 + $0x10] ss:$0 sm:$0xff]  ;;  %v5182_v49 = vld [vmem:[%s5386_s1 + $0x11] ss:$0 sm:$0xff]  ;;  %v1939_v35 = vld [vmem:[#allocation2 + $0x255] sm:$0xff] }
 0x1ca   : > { %v2614_v53 = vadd.f32 %v2582_v24, %v2512_v62  ;;  %v2411_v27 = vadd.f32 %v2379_v52, %v2309_v39  ;;  %v1835_v0 = vadd.f32 %v1803_v5, %v1750_v6  ;;  %v1973_v43 = vmul.f32 %v5175_v14, %v1480_v50  ;;  %v5189_v50 = vld [vmem:[%s5386_s1 + $0x12] ss:$0 sm:$0xff]  ;;  %v5553_v52 = vld [vmem:[#allocation84_spill] sm:$0xff]  ;;  %v5555_v6 = vld [vmem:[#allocation83_spill] sm:$0xff] }
 0x1cb   : > { %v1650_v32 = vadd.f32 %v1618_v41, %v1549_v42  ;;  %v1719_v15 = vmul.f32 %v5131_v23, %v1682_v60  ;;  %v2074_v63 = vmul.f32 %v5182_v49, %v4935_v13  ;;  %v2176_v30 = vmul.f32 %v5189_v50, %v5002_v2  ;;  %v1381_v56 = vld [vmem:[#allocation2 + $0x26c] sm:$0xff]  ;;  %v5554_v42 = vld [vmem:[#allocation82_spill] sm:$0xff] }
 0x1cc   : > { %v2716_v12 = vadd.f32 %v2684_v17, %v2614_v53  ;;  %v2513_v34 = vadd.f32 %v2481_v16, %v2411_v27  ;;  %v1920_v19 = vadd.f32 %v1888_v11, %v1835_v0  ;;  %v2278_v54 = vmul.f32 %v5196_v31, %v5085_v4  ;;  %v5556_v5 = vld [vmem:[#allocation73_spill] sm:$0xff]  ;;  %v1582_v16 = vld [vmem:[#allocation2 + $0x266] sm:$0xff] }
 0x1cd   : > { %v1751_v24 = vadd.f32 %v1719_v15, %v1650_v32  ;;  %v1804_v13 = vmul.f32 %v5152_v22, %v1769_v20  ;;  %v1889_v18 = vmul.f32 %v5166_v40, %v1854_v10  ;;  %v1248_v62 = vadd.f32 %v5554_v42, %v5553_v52  ;;  %v5557_v20 = vld [vmem:[#allocation74_spill] sm:$0xff]  ;;  %v1482_v32 = vld [vmem:[#allocation2 + $0x26d] sm:$0xff] }
 0x1ce   : > { %v2818_v28 = vadd.f32 %v2786_v51, %v2716_v12  ;;  %v2615_v26 = vadd.f32 %v2583_v21, %v2513_v34  ;;  %v2005_v55 = vadd.f32 %v1973_v43, %v1920_v19  ;;  %v1317_v39 = vmul.f32 %v5009_v3, %v1280_v37  ;;  %v1683_v34 = vld [vmem:[#allocation2 + $0x26a] sm:$0xff] }
 0x1cf   : > { %v1836_v17 = vadd.f32 %v1804_v13, %v1751_v24  ;;  %v1348_v60 = vadd.f32 %v5556_v5, %v5555_v6  ;;  %v1974_v53 = vmul.f32 %v5175_v14, %v1939_v35  ;;  %v1418_v11 = vmul.f32 %v5020_v46, %v1381_v56  ;;  %v5558_v24 = vld [vmem:[#allocation75_spill] sm:$0xff]  ;;  %v5234_v42 = vld [vmem:[#allocation2 + $0x210] sm:$0xff] }
 0x1d0   : > { %v2854_v51 = vadd.f32 %v4808_v44, %v2818_v28  ;;  %v2717_v21 = vadd.f32 %v2685_v58, %v2615_v26  ;;  %v2106_v41 = vadd.f32 %v2074_v63, %v2005_v55  ;;  %v1349_v0 = vadd.f32 %v1317_v39, %v1248_v62  ;;  %v1583_v55 = vld [vmem:[#allocation2 + $0x26e] sm:$0xff]  ;;  %v5249_v5 = vld [vmem:[%s5386_s1 + $0x17] ss:$0 sm:$0xff] }
 0x1d1   : > { %v1921_v27 = vadd.f32 %v1889_v18, %v1836_v17  ;;  %v1449_v43 = vadd.f32 %v5557_v20, %v1348_v60  ;;  %v2380_v12 = vmul.f32 %v5143_v61, %v5202_v33  ;;  %v2075_v58 = vmul.f32 %v5182_v49, %v4961_v57  ;;  %v5230_v18 = vld [vmem:[#allocation2 + $0x2e8] sm:$0xff] }
 0x1d2   : > { %2886 = vst.msk [vmem:[%s4264_s25 + $0xc0] sm:$0xff] %vm171_vm0, %v2854_v51  ;;  %v2819_v15 = vadd.f32 %v2787_v47, %v2717_v21  ;;  %v2208_v10 = vadd.f32 %v2176_v30, %v2106_v41  ;;  %v1450_v63 = vadd.f32 %v1418_v11, %v1349_v0  ;;  %v1619_v35 = vmul.f32 %v5119_v48, %v1582_v16  ;;  %v5225_v47 = vld [vmem:[%s5386_s1 + $0x15] ss:$0 sm:$0xff]  ;;  %v5259_v11 = vld [vmem:[%s5386_s1 + $0x18] ss:$0 sm:$0xff] }
 0x1d3   : > { %v2006_v19 = vadd.f32 %v1974_v53, %v1921_v27  ;;  %v1550_v13 = vadd.f32 %v5558_v24, %v1449_v43  ;;  %v2482_v30 = vmul.f32 %v5225_v47, %v4959_v45  ;;  %v1519_v57 = vmul.f32 %v5038_v8, %v1482_v32  ;;  %v5242_v45 = vld [vmem:[%s5386_s1 + $0x16] ss:$0 sm:$0xff] }
 0x1d4   : > { %v2855_v28 = vadd.f32 %v4808_v44, %v2819_v15  ;;  %v2310_v26 = vadd.f32 %v2278_v54, %v2208_v10  ;;  %v2177_v52 = vmul.f32 %v5189_v50, %v5047_v59  ;;  %v1720_v62 = vmul.f32 %v5131_v23, %v1683_v34  ;;  %v1684_v27 = vld [vmem:[#allocation2 + $0x272] sm:$0xff] }
 0x1d5   : > { %v2107_v17 = vadd.f32 %v2075_v58, %v2006_v19  ;;  %v1651_v54 = vadd.f32 %v1619_v35, %v1550_v13  ;;  %v2584_v6 = vmul.f32 %v5242_v45, %v5033_v38  ;;  %v2686_v60 = vmul.f32 %v5249_v5, %v5111_v29  ;;  %v1770_v19 = vld [vmem:[#allocation2 + $0x273] sm:$0xff] }
 0x1d6   : > { %2887 = vst.msk [vmem:[%s4264_s25 + $0xc8] sm:$0xff] %vm171_vm0, %v2855_v28  ;;  %v2412_v39 = vadd.f32 %v2380_v12, %v2310_v26  ;;  %v1551_v16 = vadd.f32 %v1519_v57, %v1450_v63  ;;  %v2279_v21 = vmul.f32 %v5196_v31, %v5113_v7  ;;  %v1805_v53 = vmul.f32 %v5152_v22, %v1280_v37  ;;  %v5268_v37 = vld [vmem:[#allocation2 + $0x2f0] sm:$0xff] }
 0x1d7   : > { %v2209_v51 = vadd.f32 %v2177_v52, %v2107_v17  ;;  %v1752_v41 = vadd.f32 %v1720_v62, %v1651_v54  ;;  %v2788_v20 = vmul.f32 %v5259_v11, %v5230_v18  ;;  %v2381_v43 = vmul.f32 %v5143_v61, %v5234_v42  ;;  %v1855_v57 = vld [vmem:[#allocation2 + $0x274] sm:$0xff]  ;;  %v1282_v54 = vld [vmem:[#allocation2 + $0x28b] sm:$0xff] }
 0x1d8   : > { %v2514_v0 = vadd.f32 %v2482_v30, %v2412_v39  ;;  %v1620_v15 = vmul.f32 %v5119_v48, %v1583_v55  ;;  %v2483_v12 = vmul.f32 %v5225_v47, %v4980_v36  ;;  %v1890_v34 = vmul.f32 %v5166_v40, %v1381_v56 }
 0x1d9   : > { %v2311_v10 = vadd.f32 %v2279_v21, %v2209_v51  ;;  %v1837_v58 = vadd.f32 %v1805_v53, %v1752_v41  ;;  %v2585_v24 = vmul.f32 %v5242_v45, %v5060_v1  ;;  %v1721_v35 = vmul.f32 %v5131_v23, %v1684_v27  ;;  %v1940_v51 = vld [vmem:[#allocation2 + $0x275] sm:$0xff]  ;;  %v1383_v53 = vld [vmem:[#allocation2 + $0x28c] sm:$0xff] }
 0x1da   : > { %v2616_v63 = vadd.f32 %v2584_v6, %v2514_v0  ;;  %v1652_v13 = vadd.f32 %v1620_v15, %v1551_v16  ;;  %v2687_v26 = vmul.f32 %v5249_v5, %v5147_v9  ;;  %v1975_v36 = vmul.f32 %v5175_v14, %v1482_v32  ;;  %v1483_v27 = vld [vmem:[#allocation2 + $0x285] sm:$0xff] }
 0x1db   : > { %v2413_v28 = vadd.f32 %v2381_v43, %v2311_v10  ;;  %v1922_v30 = vadd.f32 %v1890_v34, %v1837_v58  ;;  %v2789_v56 = vmul.f32 %v5259_v11, %v5268_v37  ;;  %v1806_v52 = vmul.f32 %v5152_v22, %v1770_v19  ;;  %v5559_v15 = vld [vmem:[#allocation4_spill] sm:$0xff]  ;;  %v5560_v19 = vld [vmem:[#allocation86_spill] sm:$0xff] }
 0x1dc   : > { %v2718_v55 = vadd.f32 %v2686_v60, %v2616_v63  ;;  %v1753_v17 = vadd.f32 %v1721_v35, %v1652_v13  ;;  %v2076_v6 = vmul.f32 %v5182_v49, %v5002_v2  ;;  %v2178_v16 = vmul.f32 %v5189_v50, %v5085_v4  ;;  %v5291_v58 = vld [vmem:[#allocation2 + $0x228] sm:$0xff] }
 0x1dd   : > { %v2515_v62 = vadd.f32 %v2483_v12, %v2413_v28  ;;  %v2007_v39 = vadd.f32 %v1975_v36, %v1922_v30  ;;  %v2280_v32 = vmul.f32 %v5196_v31, %v5202_v33  ;;  %v1891_v41 = vmul.f32 %v5166_v40, %v1855_v57  ;;  %v5561_v63 = vld [vmem:[#allocation80_spill] sm:$0xff] }
 0x1de   : > { %v2820_v21 = vadd.f32 %v2788_v20, %v2718_v55  ;;  %v1838_v60 = vadd.f32 %v1806_v52, %v1753_v17  ;;  %v1250_v10 = vadd.f32 %v5559_v15, %v4337_v25  ;;  %v1319_v2 = vmul.f32 %v5009_v3, %v1282_v54  ;;  %v1584_v35 = vld [vmem:[#allocation2 + $0x286] sm:$0xff]  ;;  %v5562_v55 = vld [vmem:[#allocation81_spill] sm:$0xff] }
 0x1df   : > { %v2617_v0 = vadd.f32 %v2585_v24, %v2515_v62  ;;  %v2108_v43 = vadd.f32 %v2076_v6, %v2007_v39  ;;  %v1976_v34 = vmul.f32 %v5175_v14, %v1940_v51  ;;  %v1350_v13 = vadd.f32 %v5561_v63, %v5560_v19  ;;  %v1484_v52 = vld [vmem:[#allocation2 + $0x28d] sm:$0xff] }
 0x1e0   : > { %v2856_v12 = vadd.f32 %v4808_v44, %v2820_v21  ;;  %v1923_v20 = vadd.f32 %v1891_v41, %v1838_v60  ;;  %v1351_v24 = vadd.f32 %v1319_v2, %v1250_v10  ;;  %v1420_v36 = vmul.f32 %v5020_v46, %v1383_v53 }
 0x1e1   : > { %v2719_v28 = vadd.f32 %v2687_v26, %v2617_v0  ;;  %v2210_v30 = vadd.f32 %v2178_v16, %v2108_v43  ;;  %v1520_v25 = vmul.f32 %v5038_v8, %v1483_v27  ;;  %v2077_v57 = vmul.f32 %v5182_v49, %v5047_v59  ;;  %v1685_v16 = vld [vmem:[#allocation2 + $0x28a] sm:$0xff] }
 0x1e2   : > { %2888 = vst.msk [vmem:[%s4264_s25 + $0xd0] sm:$0xff] %vm171_vm0, %v2856_v12  ;;  %v2008_v3 = vadd.f32 %v1976_v34, %v1923_v20  ;;  %v1451_v17 = vadd.f32 %v5562_v55, %v1350_v13  ;;  %v2382_v26 = vmul.f32 %v5143_v61, %v5291_v58  ;;  %v1452_v6 = vadd.f32 %v1420_v36, %v1351_v24  ;;  %v1585_v0 = vld [vmem:[#allocation2 + $0x28e] sm:$0xff] }
 0x1e3   : > { %v2821_v62 = vadd.f32 %v2789_v56, %v2719_v28  ;;  %v2312_v39 = vadd.f32 %v2280_v32, %v2210_v30  ;;  %v2179_v51 = vmul.f32 %v5189_v50, %v5113_v7  ;;  %v1621_v60 = vmul.f32 %v5119_v48, %v1584_v35  ;;  %v5311_v32 = vld [vmem:[#allocation2 + $0x230] sm:$0xff] }
 0x1e4   : > { %v2109_v46 = vadd.f32 %v2077_v57, %v2008_v3  ;;  %v1552_v21 = vadd.f32 %v1520_v25, %v1451_v17  ;;  %v2484_v56 = vmul.f32 %v5225_v47, %v5033_v38  ;;  %v1521_v27 = vmul.f32 %v5038_v8, %v1484_v52  ;;  %v5321_v38 = vld [vmem:[#allocation2 + $0x308] sm:$0xff]  ;;  %v1686_v13 = vld [vmem:[#allocation2 + $0x292] sm:$0xff] }
 0x1e5   : > { %v2857_v59 = vadd.f32 %v4808_v44, %v2821_v62  ;;  %v2414_v41 = vadd.f32 %v2382_v26, %v2312_v39  ;;  %v2281_v15 = vmul.f32 %v5196_v31, %v5234_v42  ;;  %v1722_v2 = vmul.f32 %v5131_v23, %v1685_v16  ;;  %v1771_v57 = vld [vmem:[#allocation2 + $0x293] sm:$0xff] }
 0x1e6   : > { %v2211_v43 = vadd.f32 %v2179_v51, %v2109_v46  ;;  %v1653_v10 = vadd.f32 %v1621_v60, %v1552_v21  ;;  %v2586_v44 = vmul.f32 %v5242_v45, %v5111_v29  ;;  %v1553_v20 = vadd.f32 %v1521_v27, %v1452_v6  ;;  %v1856_v16 = vld [vmem:[#allocation2 + $0x294] sm:$0xff] }
 0x1e7   : > { %2889 = vst.msk [vmem:[%s4264_s25 + $0xd8] sm:$0xff] %vm171_vm0, %v2857_v59  ;;  %v2516_v12 = vadd.f32 %v2484_v56, %v2414_v41  ;;  %v2383_v8 = vmul.f32 %v5143_v61, %v5311_v32  ;;  %v1807_v63 = vmul.f32 %v5152_v22, %v1282_v54  ;;  %v2688_v28 = vmul.f32 %v5249_v5, %v5230_v18  ;;  %v2754_v46 = vld [vmem:[#allocation2 + $0x310] sm:$0xff] }
 0x1e8   : > { %v2313_v34 = vadd.f32 %v2281_v15, %v2211_v43  ;;  %v1754_v19 = vadd.f32 %v1722_v2, %v1653_v10  ;;  %v1622_v30 = vmul.f32 %v5119_v48, %v1585_v0  ;;  %v2485_v36 = vmul.f32 %v5225_v47, %v5060_v1  ;;  %v1941_v41 = vld [vmem:[#allocation2 + $0x295] sm:$0xff] }
 0x1e9   : > { %v2618_v35 = vadd.f32 %v2586_v44, %v2516_v12  ;;  %v1892_v3 = vmul.f32 %v5166_v40, %v1383_v53  ;;  %v2790_v17 = vmul.f32 %v5259_v11, %v5321_v38  ;;  %v1723_v62 = vmul.f32 %v5131_v23, %v1686_v13 }
 0x1ea   : > { %v2415_v24 = vadd.f32 %v2383_v8, %v2313_v34  ;;  %v1839_v25 = vadd.f32 %v1807_v63, %v1754_v19  ;;  %v1654_v54 = vadd.f32 %v1622_v30, %v1553_v20  ;;  %v2587_v26 = vmul.f32 %v5242_v45, %v5147_v9  ;;  %v2348_v30 = vld [vmem:[#allocation2 + $0x250] sm:$0xff] }
 0x1eb   : > { %v2720_v55 = vadd.f32 %v2688_v28, %v2618_v35  ;;  %v1977_v6 = vmul.f32 %v5175_v14, %v1484_v52  ;;  %v1808_v51 = vmul.f32 %v5152_v22, %v1771_v57  ;;  %v2689_v60 = vmul.f32 %v5249_v5, %v5268_v37  ;;  %v3066_v52 = vld [vmem:[%s5387_s2] ss:$0 sm:$0xff] }
 0x1ec   : > { %v2517_v39 = vadd.f32 %v2485_v36, %v2415_v24  ;;  %v1924_v48 = vadd.f32 %v1892_v3, %v1839_v25  ;;  %v1755_v53 = vadd.f32 %v1723_v62, %v1654_v54  ;;  %v2078_v23 = vmul.f32 %v5182_v49, %v5085_v4  ;;  %v2347_v4 = vld [vmem:[#allocation2 + $0x248] sm:$0xff] }
 0x1ed   : > { %v2822_v1 = vadd.f32 %v2790_v17, %v2720_v55  ;;  %v1893_v0 = vmul.f32 %v5166_v40, %v1856_v16  ;;  %v2791_v22 = vmul.f32 %v5259_v11, %v2754_v46  ;;  %v2180_v10 = vmul.f32 %v5189_v50, %v5202_v33  ;;  %v2755_v24 = vld [vmem:[#allocation2 + $0x328] sm:$0xff] }
 0x1ee   : > { %v2619_v21 = vadd.f32 %v2587_v26, %v2517_v39  ;;  %v2009_v59 = vadd.f32 %v1977_v6, %v1924_v48  ;;  %v1840_v27 = vadd.f32 %v1808_v51, %v1755_v53  ;;  %v1978_v12 = vmul.f32 %v5175_v14, %v1941_v41 }
 0x1ef   : > { %v2858_v56 = vadd.f32 %v3066_v52, %v2822_v1  ;;  %v2282_v34 = vmul.f32 %v5196_v31, %v5291_v58  ;;  %v2079_v8 = vmul.f32 %v5182_v49, %v5113_v7  ;;  %v2384_v33 = vmul.f32 %v5143_v61, %v2347_v4 }
 0x1f0   : > { %v2721_v43 = vadd.f32 %v2689_v60, %v2619_v21  ;;  %v2110_v15 = vadd.f32 %v2078_v23, %v2009_v59  ;;  %v1925_v2 = vadd.f32 %v1893_v0, %v1840_v27  ;;  %v2486_v13 = vmul.f32 %v5225_v47, %v5111_v29 }
 0x1f1   : > { %2890 = vst.msk [vmem:[%s4264_s25 + $0xe0] sm:$0xff] %vm171_vm0, %v2858_v56  ;;  %v2181_v14 = vmul.f32 %v5189_v50, %v5234_v42  ;;  %v2588_v58 = vmul.f32 %v5242_v45, %v5230_v18  ;;  %v2283_v49 = vmul.f32 %v5196_v31, %v5311_v32  ;;  %v2690_v29 = vmul.f32 %v5249_v5, %v5321_v38  ;;  %v2756_v32 = vld [vmem:[#allocation2 + $0x330] sm:$0xff] }
 0x1f2   : > { %v2823_v44 = vadd.f32 %v2791_v22, %v2721_v43  ;;  %v2212_v20 = vadd.f32 %v2180_v10, %v2110_v15  ;;  %v2010_v40 = vadd.f32 %v1978_v12, %v1925_v2  ;;  %v2385_v50 = vmul.f32 %v5143_v61, %v2348_v30 }
 0x1f3   : > { %v2487_v42 = vmul.f32 %v5225_v47, %v5147_v9  ;;  %v2792_v18 = vmul.f32 %v5259_v11, %v2755_v24  ;;  %v2589_v55 = vmul.f32 %v5242_v45, %v5268_v37  ;;  %v2691_v38 = vmul.f32 %v5249_v5, %v2754_v46 }
 0x1f4   : > { %v2859_v19 = vadd.f32 %v3066_v52, %v2823_v44  ;;  %v2314_v63 = vadd.f32 %v2282_v34, %v2212_v20  ;;  %v2111_v35 = vadd.f32 %v2079_v8, %v2010_v40  ;;  %v2793_v61 = vmul.f32 %v5259_v11, %v2756_v32 }
 0x1f6   : > { %2891 = vst.msk [vmem:[%s4264_s25 + $0xe8] sm:$0xff] %vm171_vm0, %v2859_v19  ;;  %v2416_v28 = vadd.f32 %v2384_v33, %v2314_v63  ;;  %v2213_v7 = vadd.f32 %v2181_v14, %v2111_v35 }
 0x1f8   : > { %v2518_v36 = vadd.f32 %v2486_v13, %v2416_v28  ;;  %v2315_v25 = vadd.f32 %v2283_v49, %v2213_v7 }
 0x1fa   : > { %v2620_v3 = vadd.f32 %v2588_v58, %v2518_v36  ;;  %v2417_v57 = vadd.f32 %v2385_v50, %v2315_v25 }
 0x1fc   : > { %v2722_v31 = vadd.f32 %v2690_v29, %v2620_v3  ;;  %v2519_v17 = vadd.f32 %v2487_v42, %v2417_v57 }
 0x1fe   : > { %v2824_v54 = vadd.f32 %v2792_v18, %v2722_v31  ;;  %v2621_v62 = vadd.f32 %v2589_v55, %v2519_v17 }
 0x200   : > { %v2860_v39 = vadd.f32 %v3066_v52, %v2824_v54  ;;  %v2723_v26 = vadd.f32 %v2691_v38, %v2621_v62 }
 0x202   : > { %2892 = vst.msk [vmem:[%s4264_s25 + $0xf0] sm:$0xff] %vm171_vm0, %v2860_v39  ;;  %v2825_v9 = vadd.f32 %v2793_v61, %v2723_v26 }
 0x204   : > { %v2861_v47 = vadd.f32 %v3066_v52, %v2825_v9 }
 0x206   : > { %2893 = vst.msk [vmem:[%s4264_s25 + $0xf8] sm:$0xff] %vm171_vm0, %v2861_v47 }
 0x207 PF: > { %s13_s12 = sadd.s32 1, %s3073_s12  }
 0x208   : > { %p10_p4 = scmp.ge.s32.totalorder %s13_s12, 4  }
 0x20a   :  { %12 = sbr.rel (!%p10_p4) target bundleno = 1 (0x1), region = 96 }

</bundles_post_ra>
